<compile_context>
chip_gen: v7x
topology: tpu7x:2x2x1
jax: 0.10.0
libtpu: 0.0.40
codegen_flags: <defaults>
</compile_context>

<pallas_src>
import jax
import jax.numpy as jnp
import numpy as np
from jax.experimental import pallas as pl
from jax.experimental.pallas import tpu as pltpu

K = 7          # Conv3d kernel size
PAD = K // 2   # padding = 3


def _round_up(x, m):
    return (x + m - 1) // m * m


def _pick_nb(n, d):
    """Batch elements per grid step: fill MXU rows (~256) but keep >= 2 grid steps."""
    nb = max(1, min(n, 256 // max(d, 1)))
    if n >= 2:
        nb = max(1, min(nb, n // 2))
    while n % nb:
        nb -= 1
    return nb


def _build_shift_weight_matrix(w, H, W, HW_pad):
    """Scatter Conv3d(1,2,7,7,7) weights into G[c, kd] (HW_pad, HW_pad) such that
    out_plane(d) = sum_{c,kd} feat_plane[c, d + kd - PAD] @ G[c, kd],
    with the H/W zero-padding baked in (out-of-range taps simply absent)."""
    w2 = jnp.asarray(w, jnp.float32).reshape(2, K, K, K)        # (c, kd, kh, kw)

    kh_l, kw_l, src_l, dst_l = [], [], [], []
    for kh in range(K):
        for kw in range(K):
            for h in range(H):
                for wcol in range(W):
                    hs, ws = h + kh - PAD, wcol + kw - PAD
                    if 0 <= hs < H and 0 <= ws < W:
                        kh_l.append(kh)
                        kw_l.append(kw)
                        src_l.append(hs * W + ws)
                        dst_l.append(h * W + wcol)
    kh_i = np.asarray(kh_l, np.int32)
    kw_i = np.asarray(kw_l, np.int32)
    src_i = np.asarray(src_l, np.int32)
    dst_i = np.asarray(dst_l, np.int32)

    vals = w2[:, :, kh_i, kw_i]                                  # (2, K, nnz)
    g = jnp.zeros((2, K, HW_pad, HW_pad), jnp.float32)
    g = g.at[:, :, src_i, dst_i].add(vals)
    return g


def _make_kernel(C, D, HW, HW_pad, DP_BUF, R0, NB):
    def kernel(x_ref, g_ref, o_ref, feat_ref):
        # x_ref:    (NB, C, D, HW)            VMEM, lane-dense batch block
        # g_ref:    (2, K, HW_pad, HW_pad)    VMEM-resident shift-and-weight matrices
        # o_ref:    (NB*D, HW)                conv output rows (batch-major, depth-minor)
        # feat_ref: (2, NB, DP_BUF, HW_pad)   depth-zero-padded [mean, max] planes
        x = x_ref[...].astype(jnp.float32)
        mean_map = jnp.mean(x, axis=1)                           # (NB, D, HW)
        max_map = jnp.max(x, axis=1)                             # (NB, D, HW)

        # Zero every step (safe under "parallel" grid semantics on multi-core chips),
        # then write the interior at sublane-aligned rows [R0, R0 + D).
        feat_ref[...] = jnp.zeros((2, NB, DP_BUF, HW_pad), jnp.float32)
        feat_ref[0, :, R0:R0 + D, :HW] = mean_map
        feat_ref[1, :, R0:R0 + D, :HW] = max_map

        # 14 accumulating MXU matmuls: (NB*D, HW_pad) @ (HW_pad, HW_pad), f32 acc.
        acc = jnp.zeros((NB * D, HW_pad), jnp.float32)
        for c in range(2):                       # 0 = mean plane, 1 = max plane
            for kd in range(K):
                row0 = R0 - PAD + kd             # rows holding depth taps d + kd - PAD
                lhs = feat_ref[c, :, row0:row0 + D, :].reshape(NB * D, HW_pad)
                acc = acc + jnp.dot(lhs, g_ref[c, kd],
                                    preferred_element_type=jnp.float32)

        o_ref[...] = jax.nn.sigmoid(acc[:, :HW]).astype(o_ref.dtype)

    return kernel


def spatial_attention(x, w):
    """x: (N, C, D, H, W) float32; w: (1, 2, 7, 7, 7) float32 Conv3d weight."""
    N, C, D, H, W = x.shape
    HW = H * W
    HW_pad = _round_up(HW, 128)
    R0 = _round_up(PAD, 8)                       # sublane-aligned interior row start
    DP_BUF = _round_up(R0 + D + PAD, 8)          # padded depth rows in scratch
    NB = _pick_nb(N, D)

    x_flat = x.reshape(N, C, D, HW)
    g = _build_shift_weight_matrix(w, H, W, HW_pad)

    kernel = _make_kernel(C, D, HW, HW_pad, DP_BUF, R0, NB)

    out_flat = pl.pallas_call(
        kernel,
        out_shape=jax.ShapeDtypeStruct((N * D, HW), jnp.float32),
        grid_spec=pltpu.PrefetchScalarGridSpec(
            num_scalar_prefetch=0,
            grid=(N // NB,),
            in_specs=[
                pl.BlockSpec((NB, C, D, HW), lambda n: (n, 0, 0, 0)),
                # Constant index_map -> G is DMA'd once and stays VMEM-resident.
                pl.BlockSpec((2, K, HW_pad, HW_pad), lambda n: (0, 0, 0, 0)),
            ],
            out_specs=pl.BlockSpec((NB * D, HW), lambda n: (n, 0)),
            scratch_shapes=[pltpu.VMEM((2, NB, DP_BUF, HW_pad), jnp.float32)],
        ),
        compiler_params=pltpu.CompilerParams(
            dimension_semantics=("parallel",)),
    )(x_flat, g)

    return out_flat.reshape(N, 1, D, H, W)


def spatial_attention_ref(x, w):
    """Pure-JAX reference mirroring the PyTorch forward."""
    feat_avg = jnp.mean(x, axis=1, keepdims=True)
    feat_max = jnp.max(x, axis=1, keepdims=True)
    feature = jnp.concatenate([feat_avg, feat_max], axis=1)
    out = jax.lax.conv_general_dilated(
        feature, w,
        window_strides=(1, 1, 1),
        padding=[(PAD, PAD)] * 3,
        dimension_numbers=("NCDHW", "OIDHW", "NCDHW"))
    return jax.nn.sigmoid(out)


if __name__ == "__main__":
    key = jax.random.PRNGKey(0)
    kx, kw_key = jax.random.split(key)

    # Small shapes consistent with Conv3d input: (N, C, D, H, W)
    N, C, D, H, W = 2, 4, 8, 16, 16
    x = jax.random.normal(kx, (N, C, D, H, W), dtype=jnp.float32)

    # Deterministic Conv3d(2, 1, 7, bias=False) weight init (kaiming-uniform-ish).
    fan_in = 2 * K * K * K
    bound = 1.0 / (fan_in ** 0.5)
    w = jax.random.uniform(kw_key, (1, 2, K, K, K), dtype=jnp.float32,
                           minval=-bound, maxval=bound)

    out = jax.block_until_ready(spatial_attention(x, w))
    ref = spatial_attention_ref(x, w)

    assert out.shape == (N, 1, D, H, W), out.shape
    # Tolerance leaves headroom for MXU f32 pass-decomposition rounding while still
    # verifying the conv/pool/sigmoid semantics.
    if not jnp.allclose(out, ref, atol=1e-3, rtol=1e-3):
        raise AssertionError(
            f"mismatch: max abs err = {float(jnp.max(jnp.abs(out - ref)))}")

    print("KERNEL_OK")
</pallas_src>

<mosaic_0001>
module attributes {stable_mosaic.version = 11 : i64} {
  func.func @kernel(%arg0: i32, %arg1: memref<1x4x8x256xf32, #tpu.memory_space<vmem>>, %arg2: memref<2x7x256x256xf32, #tpu.memory_space<vmem>>, %arg3: memref<8x256xf32, #tpu.memory_space<vmem>>, %arg4: memref<2x1x24x256xf32, #tpu.memory_space<vmem>>) attributes {dimension_semantics = [#tpu.dimension_semantics<parallel>], iteration_bounds = array<i64: 2>, scalar_prefetch = 0 : i64, scratch_operands = 1 : i64, tpu.core_type = #tpu.core_type<tc>, window_params = [{transform_indices = @transform_0, window_bounds = array<i64: 1, 4, 8, 256>}, {pipeline_mode = #tpu.pipeline_mode<synchronous>, transform_indices = @transform_1, window_bounds = array<i64: 2, 7, 256, 256>}, {transform_indices = @transform_2, window_bounds = array<i64: 8, 256>}]} {
    %c0 = arith.constant 0 : index
    %c0_0 = arith.constant 0 : index
    %c0_1 = arith.constant 0 : index
    %c0_2 = arith.constant 0 : index
    %0 = vector.load %arg1[%c0, %c0_0, %c0_1, %c0_2] : memref<1x4x8x256xf32, #tpu.memory_space<vmem>>, vector<1x4x8x256xf32>
    %cst = arith.constant dense<0.000000e+00> : vector<1x8x256xf32>
    %1 = vector.multi_reduction <add>, %0, %cst [1] : vector<1x4x8x256xf32> to vector<1x8x256xf32>
    %cst_3 = arith.constant 4.000000e+00 : f32
    %2 = vector.broadcast %cst_3 : f32 to vector<1x8x256xf32>
    %3 = arith.divf %1, %2 : vector<1x8x256xf32>
    %cst_4 = arith.constant dense<0xFF800000> : vector<1x8x256xf32>
    %4 = vector.multi_reduction <maximumf>, %0, %cst_4 [1] : vector<1x4x8x256xf32> to vector<1x8x256xf32>
    %cst_5 = arith.constant 0.000000e+00 : f32
    %5 = vector.broadcast %cst_5 : f32 to vector<2x1x24x256xf32>
    %c0_6 = arith.constant 0 : index
    %c0_7 = arith.constant 0 : index
    %c0_8 = arith.constant 0 : index
    %c0_9 = arith.constant 0 : index
    %6 = vector.load %arg4[%c0_6, %c0_7, %c0_8, %c0_9] : memref<2x1x24x256xf32, #tpu.memory_space<vmem>>, vector<2x1x24x256xf32>
    tpu.vector_store %arg4[%c0_6, %c0_7, %c0_8, %c0_9], %5 {strides = array<i32>} : memref<2x1x24x256xf32, #tpu.memory_space<vmem>>, vector<2x1x24x256xf32>,
    %c0_10 = arith.constant 0 : index
    %c0_11 = arith.constant 0 : index
    %c8 = arith.constant 8 : index
    %c0_12 = arith.constant 0 : index
    %7 = vector.load %arg4[%c0_10, %c0_11, %c8, %c0_12] : memref<2x1x24x256xf32, #tpu.memory_space<vmem>>, vector<1x1x8x256xf32>
    %8 = vector.shape_cast %7 : vector<1x1x8x256xf32> to vector<1x8x256xf32>
    %9 = vector.shape_cast %3 : vector<1x8x256xf32> to vector<1x1x8x256xf32>
    tpu.vector_store %arg4[%c0_10, %c0_11, %c8, %c0_12], %9 {strides = array<i32>} : memref<2x1x24x256xf32, #tpu.memory_space<vmem>>, vector<1x1x8x256xf32>,
    %c1 = arith.constant 1 : index
    %c0_13 = arith.constant 0 : index
    %c8_14 = arith.constant 8 : index
    %c0_15 = arith.constant 0 : index
    %10 = vector.load %arg4[%c1, %c0_13, %c8_14, %c0_15] : memref<2x1x24x256xf32, #tpu.memory_space<vmem>>, vector<1x1x8x256xf32>
    %11 = vector.shape_cast %10 : vector<1x1x8x256xf32> to vector<1x8x256xf32>
    %12 = vector.shape_cast %4 : vector<1x8x256xf32> to vector<1x1x8x256xf32>
    tpu.vector_store %arg4[%c1, %c0_13, %c8_14, %c0_15], %12 {strides = array<i32>} : memref<2x1x24x256xf32, #tpu.memory_space<vmem>>, vector<1x1x8x256xf32>,
    %cst_16 = arith.constant 0.000000e+00 : f32
    %13 = vector.broadcast %cst_16 : f32 to vector<8x256xf32>
    %c0_17 = arith.constant 0 : index
    %c0_18 = arith.constant 0 : index
    %c5 = arith.constant 5 : index
    %c0_19 = arith.constant 0 : index
    %14 = vector.load %arg4[%c0_17, %c0_18, %c5, %c0_19] : memref<2x1x24x256xf32, #tpu.memory_space<vmem>>, vector<1x1x8x256xf32>
    %15 = vector.shape_cast %14 : vector<1x1x8x256xf32> to vector<1x8x256xf32>
    %16 = vector.shape_cast %15 : vector<1x8x256xf32> to vector<8x256xf32>
    %c0_20 = arith.constant 0 : index
    %c0_21 = arith.constant 0 : index
    %c0_22 = arith.constant 0 : index
    %c0_23 = arith.constant 0 : index
    %17 = vector.load %arg2[%c0_20, %c0_21, %c0_22, %c0_23] : memref<2x7x256x256xf32, #tpu.memory_space<vmem>>, vector<1x1x256x256xf32>
    %18 = vector.shape_cast %17 : vector<1x1x256x256xf32> to vector<256x256xf32>
    %cst_24 = arith.constant dense<0.000000e+00> : vector<8x256xf32>
    %19 = tpu.matmul %16, %18, %cst_24 {dimension_numbers = #tpu.dot_dimension_numbers<[1], [0], [0], [1], [0, 0, 1, 1], [], []>} : vector<8x256xf32>, vector<256x256xf32>, vector<8x256xf32> -> vector<8x256xf32>
    %20 = arith.addf %13, %19 : vector<8x256xf32>
    %c0_25 = arith.constant 0 : index
    %c0_26 = arith.constant 0 : index
    %c6 = arith.constant 6 : index
    %c0_27 = arith.constant 0 : index
    %21 = vector.load %arg4[%c0_25, %c0_26, %c6, %c0_27] : memref<2x1x24x256xf32, #tpu.memory_space<vmem>>, vector<1x1x8x256xf32>
    %22 = vector.shape_cast %21 : vector<1x1x8x256xf32> to vector<1x8x256xf32>
    %23 = vector.shape_cast %22 : vector<1x8x256xf32> to vector<8x256xf32>
    %c0_28 = arith.constant 0 : index
    %c1_29 = arith.constant 1 : index
    %c0_30 = arith.constant 0 : index
    %c0_31 = arith.constant 0 : index
    %24 = vector.load %arg2[%c0_28, %c1_29, %c0_30, %c0_31] : memref<2x7x256x256xf32, #tpu.memory_space<vmem>>, vector<1x1x256x256xf32>
    %25 = vector.shape_cast %24 : vector<1x1x256x256xf32> to vector<256x256xf32>
    %cst_32 = arith.constant dense<0.000000e+00> : vector<8x256xf32>
    %26 = tpu.matmul %23, %25, %cst_32 {dimension_numbers = #tpu.dot_dimension_numbers<[1], [0], [0], [1], [0, 0, 1, 1], [], []>} : vector<8x256xf32>, vector<256x256xf32>, vector<8x256xf32> -> vector<8x256xf32>
    %27 = arith.addf %20, %26 : vector<8x256xf32>
    %c0_33 = arith.constant 0 : index
    %c0_34 = arith.constant 0 : index
    %c7 = arith.constant 7 : index
    %c0_35 = arith.constant 0 : index
    %28 = vector.load %arg4[%c0_33, %c0_34, %c7, %c0_35] : memref<2x1x24x256xf32, #tpu.memory_space<vmem>>, vector<1x1x8x256xf32>
    %29 = vector.shape_cast %28 : vector<1x1x8x256xf32> to vector<1x8x256xf32>
    %30 = vector.shape_cast %29 : vector<1x8x256xf32> to vector<8x256xf32>
    %c0_36 = arith.constant 0 : index
    %c2 = arith.constant 2 : index
    %c0_37 = arith.constant 0 : index
    %c0_38 = arith.constant 0 : index
    %31 = vector.load %arg2[%c0_36, %c2, %c0_37, %c0_38] : memref<2x7x256x256xf32, #tpu.memory_space<vmem>>, vector<1x1x256x256xf32>
    %32 = vector.shape_cast %31 : vector<1x1x256x256xf32> to vector<256x256xf32>
    %cst_39 = arith.constant dense<0.000000e+00> : vector<8x256xf32>
    %33 = tpu.matmul %30, %32, %cst_39 {dimension_numbers = #tpu.dot_dimension_numbers<[1], [0], [0], [1], [0, 0, 1, 1], [], []>} : vector<8x256xf32>, vector<256x256xf32>, vector<8x256xf32> -> vector<8x256xf32>
    %34 = arith.addf %27, %33 : vector<8x256xf32>
    %c0_40 = arith.constant 0 : index
    %c0_41 = arith.constant 0 : index
    %c8_42 = arith.constant 8 : index
    %c0_43 = arith.constant 0 : index
    %35 = vector.load %arg4[%c0_40, %c0_41, %c8_42, %c0_43] : memref<2x1x24x256xf32, #tpu.memory_space<vmem>>, vector<1x1x8x256xf32>
    %36 = vector.shape_cast %35 : vector<1x1x8x256xf32> to vector<1x8x256xf32>
    %37 = vector.shape_cast %36 : vector<1x8x256xf32> to vector<8x256xf32>
    %c0_44 = arith.constant 0 : index
    %c3 = arith.constant 3 : index
    %c0_45 = arith.constant 0 : index
    %c0_46 = arith.constant 0 : index
    %38 = vector.load %arg2[%c0_44, %c3, %c0_45, %c0_46] : memref<2x7x256x256xf32, #tpu.memory_space<vmem>>, vector<1x1x256x256xf32>
    %39 = vector.shape_cast %38 : vector<1x1x256x256xf32> to vector<256x256xf32>
    %cst_47 = arith.constant dense<0.000000e+00> : vector<8x256xf32>
    %40 = tpu.matmul %37, %39, %cst_47 {dimension_numbers = #tpu.dot_dimension_numbers<[1], [0], [0], [1], [0, 0, 1, 1], [], []>} : vector<8x256xf32>, vector<256x256xf32>, vector<8x256xf32> -> vector<8x256xf32>
    %41 = arith.addf %34, %40 : vector<8x256xf32>
    %c0_48 = arith.constant 0 : index
    %c0_49 = arith.constant 0 : index
    %c9 = arith.constant 9 : index
    %c0_50 = arith.constant 0 : index
    %42 = vector.load %arg4[%c0_48, %c0_49, %c9, %c0_50] : memref<2x1x24x256xf32, #tpu.memory_space<vmem>>, vector<1x1x8x256xf32>
    %43 = vector.shape_cast %42 : vector<1x1x8x256xf32> to vector<1x8x256xf32>
    %44 = vector.shape_cast %43 : vector<1x8x256xf32> to vector<8x256xf32>
    %c0_51 = arith.constant 0 : index
    %c4 = arith.constant 4 : index
    %c0_52 = arith.constant 0 : index
    %c0_53 = arith.constant 0 : index
    %45 = vector.load %arg2[%c0_51, %c4, %c0_52, %c0_53] : memref<2x7x256x256xf32, #tpu.memory_space<vmem>>, vector<1x1x256x256xf32>
    %46 = vector.shape_cast %45 : vector<1x1x256x256xf32> to vector<256x256xf32>
    %cst_54 = arith.constant dense<0.000000e+00> : vector<8x256xf32>
    %47 = tpu.matmul %44, %46, %cst_54 {dimension_numbers = #tpu.dot_dimension_numbers<[1], [0], [0], [1], [0, 0, 1, 1], [], []>} : vector<8x256xf32>, vector<256x256xf32>, vector<8x256xf32> -> vector<8x256xf32>
    %48 = arith.addf %41, %47 : vector<8x256xf32>
    %c0_55 = arith.constant 0 : index
    %c0_56 = arith.constant 0 : index
    %c10 = arith.constant 10 : index
    %c0_57 = arith.constant 0 : index
    %49 = vector.load %arg4[%c0_55, %c0_56, %c10, %c0_57] : memref<2x1x24x256xf32, #tpu.memory_space<vmem>>, vector<1x1x8x256xf32>
    %50 = vector.shape_cast %49 : vector<1x1x8x256xf32> to vector<1x8x256xf32>
    %51 = vector.shape_cast %50 : vector<1x8x256xf32> to vector<8x256xf32>
    %c0_58 = arith.constant 0 : index
    %c5_59 = arith.constant 5 : index
    %c0_60 = arith.constant 0 : index
    %c0_61 = arith.constant 0 : index
    %52 = vector.load %arg2[%c0_58, %c5_59, %c0_60, %c0_61] : memref<2x7x256x256xf32, #tpu.memory_space<vmem>>, vector<1x1x256x256xf32>
    %53 = vector.shape_cast %52 : vector<1x1x256x256xf32> to vector<256x256xf32>
    %cst_62 = arith.constant dense<0.000000e+00> : vector<8x256xf32>
    %54 = tpu.matmul %51, %53, %cst_62 {dimension_numbers = #tpu.dot_dimension_numbers<[1], [0], [0], [1], [0, 0, 1, 1], [], []>} : vector<8x256xf32>, vector<256x256xf32>, vector<8x256xf32> -> vector<8x256xf32>
    %55 = arith.addf %48, %54 : vector<8x256xf32>
    %c0_63 = arith.constant 0 : index
    %c0_64 = arith.constant 0 : index
    %c11 = arith.constant 11 : index
    %c0_65 = arith.constant 0 : index
    %56 = vector.load %arg4[%c0_63, %c0_64, %c11, %c0_65] : memref<2x1x24x256xf32, #tpu.memory_space<vmem>>, vector<1x1x8x256xf32>
    %57 = vector.shape_cast %56 : vector<1x1x8x256xf32> to vector<1x8x256xf32>
    %58 = vector.shape_cast %57 : vector<1x8x256xf32> to vector<8x256xf32>
    %c0_66 = arith.constant 0 : index
    %c6_67 = arith.constant 6 : index
    %c0_68 = arith.constant 0 : index
    %c0_69 = arith.constant 0 : index
    %59 = vector.load %arg2[%c0_66, %c6_67, %c0_68, %c0_69] : memref<2x7x256x256xf32, #tpu.memory_space<vmem>>, vector<1x1x256x256xf32>
    %60 = vector.shape_cast %59 : vector<1x1x256x256xf32> to vector<256x256xf32>
    %cst_70 = arith.constant dense<0.000000e+00> : vector<8x256xf32>
    %61 = tpu.matmul %58, %60, %cst_70 {dimension_numbers = #tpu.dot_dimension_numbers<[1], [0], [0], [1], [0, 0, 1, 1], [], []>} : vector<8x256xf32>, vector<256x256xf32>, vector<8x256xf32> -> vector<8x256xf32>
    %62 = arith.addf %55, %61 : vector<8x256xf32>
    %c1_71 = arith.constant 1 : index
    %c0_72 = arith.constant 0 : index
    %c5_73 = arith.constant 5 : index
    %c0_74 = arith.constant 0 : index
    %63 = vector.load %arg4[%c1_71, %c0_72, %c5_73, %c0_74] : memref<2x1x24x256xf32, #tpu.memory_space<vmem>>, vector<1x1x8x256xf32>
    %64 = vector.shape_cast %63 : vector<1x1x8x256xf32> to vector<1x8x256xf32>
    %65 = vector.shape_cast %64 : vector<1x8x256xf32> to vector<8x256xf32>
    %c1_75 = arith.constant 1 : index
    %c0_76 = arith.constant 0 : index
    %c0_77 = arith.constant 0 : index
    %c0_78 = arith.constant 0 : index
    %66 = vector.load %arg2[%c1_75, %c0_76, %c0_77, %c0_78] : memref<2x7x256x256xf32, #tpu.memory_space<vmem>>, vector<1x1x256x256xf32>
    %67 = vector.shape_cast %66 : vector<1x1x256x256xf32> to vector<256x256xf32>
    %cst_79 = arith.constant dense<0.000000e+00> : vector<8x256xf32>
    %68 = tpu.matmul %65, %67, %cst_79 {dimension_numbers = #tpu.dot_dimension_numbers<[1], [0], [0], [1], [0, 0, 1, 1], [], []>} : vector<8x256xf32>, vector<256x256xf32>, vector<8x256xf32> -> vector<8x256xf32>
    %69 = arith.addf %62, %68 : vector<8x256xf32>
    %c1_80 = arith.constant 1 : index
    %c0_81 = arith.constant 0 : index
    %c6_82 = arith.constant 6 : index
    %c0_83 = arith.constant 0 : index
    %70 = vector.load %arg4[%c1_80, %c0_81, %c6_82, %c0_83] : memref<2x1x24x256xf32, #tpu.memory_space<vmem>>, vector<1x1x8x256xf32>
    %71 = vector.shape_cast %70 : vector<1x1x8x256xf32> to vector<1x8x256xf32>
    %72 = vector.shape_cast %71 : vector<1x8x256xf32> to vector<8x256xf32>
    %c1_84 = arith.constant 1 : index
    %c1_85 = arith.constant 1 : index
    %c0_86 = arith.constant 0 : index
    %c0_87 = arith.constant 0 : index
    %73 = vector.load %arg2[%c1_84, %c1_85, %c0_86, %c0_87] : memref<2x7x256x256xf32, #tpu.memory_space<vmem>>, vector<1x1x256x256xf32>
    %74 = vector.shape_cast %73 : vector<1x1x256x256xf32> to vector<256x256xf32>
    %cst_88 = arith.constant dense<0.000000e+00> : vector<8x256xf32>
    %75 = tpu.matmul %72, %74, %cst_88 {dimension_numbers = #tpu.dot_dimension_numbers<[1], [0], [0], [1], [0, 0, 1, 1], [], []>} : vector<8x256xf32>, vector<256x256xf32>, vector<8x256xf32> -> vector<8x256xf32>
    %76 = arith.addf %69, %75 : vector<8x256xf32>
    %c1_89 = arith.constant 1 : index
    %c0_90 = arith.constant 0 : index
    %c7_91 = arith.constant 7 : index
    %c0_92 = arith.constant 0 : index
    %77 = vector.load %arg4[%c1_89, %c0_90, %c7_91, %c0_92] : memref<2x1x24x256xf32, #tpu.memory_space<vmem>>, vector<1x1x8x256xf32>
    %78 = vector.shape_cast %77 : vector<1x1x8x256xf32> to vector<1x8x256xf32>
    %79 = vector.shape_cast %78 : vector<1x8x256xf32> to vector<8x256xf32>
    %c1_93 = arith.constant 1 : index
    %c2_94 = arith.constant 2 : index
    %c0_95 = arith.constant 0 : index
    %c0_96 = arith.constant 0 : index
    %80 = vector.load %arg2[%c1_93, %c2_94, %c0_95, %c0_96] : memref<2x7x256x256xf32, #tpu.memory_space<vmem>>, vector<1x1x256x256xf32>
    %81 = vector.shape_cast %80 : vector<1x1x256x256xf32> to vector<256x256xf32>
    %cst_97 = arith.constant dense<0.000000e+00> : vector<8x256xf32>
    %82 = tpu.matmul %79, %81, %cst_97 {dimension_numbers = #tpu.dot_dimension_numbers<[1], [0], [0], [1], [0, 0, 1, 1], [], []>} : vector<8x256xf32>, vector<256x256xf32>, vector<8x256xf32> -> vector<8x256xf32>
    %83 = arith.addf %76, %82 : vector<8x256xf32>
    %c1_98 = arith.constant 1 : index
    %c0_99 = arith.constant 0 : index
    %c8_100 = arith.constant 8 : index
    %c0_101 = arith.constant 0 : index
    %84 = vector.load %arg4[%c1_98, %c0_99, %c8_100, %c0_101] : memref<2x1x24x256xf32, #tpu.memory_space<vmem>>, vector<1x1x8x256xf32>
    %85 = vector.shape_cast %84 : vector<1x1x8x256xf32> to vector<1x8x256xf32>
    %86 = vector.shape_cast %85 : vector<1x8x256xf32> to vector<8x256xf32>
    %c1_102 = arith.constant 1 : index
    %c3_103 = arith.constant 3 : index
    %c0_104 = arith.constant 0 : index
    %c0_105 = arith.constant 0 : index
    %87 = vector.load %arg2[%c1_102, %c3_103, %c0_104, %c0_105] : memref<2x7x256x256xf32, #tpu.memory_space<vmem>>, vector<1x1x256x256xf32>
    %88 = vector.shape_cast %87 : vector<1x1x256x256xf32> to vector<256x256xf32>
    %cst_106 = arith.constant dense<0.000000e+00> : vector<8x256xf32>
    %89 = tpu.matmul %86, %88, %cst_106 {dimension_numbers = #tpu.dot_dimension_numbers<[1], [0], [0], [1], [0, 0, 1, 1], [], []>} : vector<8x256xf32>, vector<256x256xf32>, vector<8x256xf32> -> vector<8x256xf32>
    %90 = arith.addf %83, %89 : vector<8x256xf32>
    %c1_107 = arith.constant 1 : index
    %c0_108 = arith.constant 0 : index
    %c9_109 = arith.constant 9 : index
    %c0_110 = arith.constant 0 : index
    %91 = vector.load %arg4[%c1_107, %c0_108, %c9_109, %c0_110] : memref<2x1x24x256xf32, #tpu.memory_space<vmem>>, vector<1x1x8x256xf32>
    %92 = vector.shape_cast %91 : vector<1x1x8x256xf32> to vector<1x8x256xf32>
    %93 = vector.shape_cast %92 : vector<1x8x256xf32> to vector<8x256xf32>
    %c1_111 = arith.constant 1 : index
    %c4_112 = arith.constant 4 : index
    %c0_113 = arith.constant 0 : index
    %c0_114 = arith.constant 0 : index
    %94 = vector.load %arg2[%c1_111, %c4_112, %c0_113, %c0_114] : memref<2x7x256x256xf32, #tpu.memory_space<vmem>>, vector<1x1x256x256xf32>
    %95 = vector.shape_cast %94 : vector<1x1x256x256xf32> to vector<256x256xf32>
    %cst_115 = arith.constant dense<0.000000e+00> : vector<8x256xf32>
    %96 = tpu.matmul %93, %95, %cst_115 {dimension_numbers = #tpu.dot_dimension_numbers<[1], [0], [0], [1], [0, 0, 1, 1], [], []>} : vector<8x256xf32>, vector<256x256xf32>, vector<8x256xf32> -> vector<8x256xf32>
    %97 = arith.addf %90, %96 : vector<8x256xf32>
    %c1_116 = arith.constant 1 : index
    %c0_117 = arith.constant 0 : index
    %c10_118 = arith.constant 10 : index
    %c0_119 = arith.constant 0 : index
    %98 = vector.load %arg4[%c1_116, %c0_117, %c10_118, %c0_119] : memref<2x1x24x256xf32, #tpu.memory_space<vmem>>, vector<1x1x8x256xf32>
    %99 = vector.shape_cast %98 : vector<1x1x8x256xf32> to vector<1x8x256xf32>
    %100 = vector.shape_cast %99 : vector<1x8x256xf32> to vector<8x256xf32>
    %c1_120 = arith.constant 1 : index
    %c5_121 = arith.constant 5 : index
    %c0_122 = arith.constant 0 : index
    %c0_123 = arith.constant 0 : index
    %101 = vector.load %arg2[%c1_120, %c5_121, %c0_122, %c0_123] : memref<2x7x256x256xf32, #tpu.memory_space<vmem>>, vector<1x1x256x256xf32>
    %102 = vector.shape_cast %101 : vector<1x1x256x256xf32> to vector<256x256xf32>
    %cst_124 = arith.constant dense<0.000000e+00> : vector<8x256xf32>
    %103 = tpu.matmul %100, %102, %cst_124 {dimension_numbers = #tpu.dot_dimension_numbers<[1], [0], [0], [1], [0, 0, 1, 1], [], []>} : vector<8x256xf32>, vector<256x256xf32>, vector<8x256xf32> -> vector<8x256xf32>
    %104 = arith.addf %97, %103 : vector<8x256xf32>
    %c1_125 = arith.constant 1 : index
    %c0_126 = arith.constant 0 : index
    %c11_127 = arith.constant 11 : index
    %c0_128 = arith.constant 0 : index
    %105 = vector.load %arg4[%c1_125, %c0_126, %c11_127, %c0_128] : memref<2x1x24x256xf32, #tpu.memory_space<vmem>>, vector<1x1x8x256xf32>
    %106 = vector.shape_cast %105 : vector<1x1x8x256xf32> to vector<1x8x256xf32>
    %107 = vector.shape_cast %106 : vector<1x8x256xf32> to vector<8x256xf32>
    %c1_129 = arith.constant 1 : index
    %c6_130 = arith.constant 6 : index
    %c0_131 = arith.constant 0 : index
    %c0_132 = arith.constant 0 : index
    %108 = vector.load %arg2[%c1_129, %c6_130, %c0_131, %c0_132] : memref<2x7x256x256xf32, #tpu.memory_space<vmem>>, vector<1x1x256x256xf32>
    %109 = vector.shape_cast %108 : vector<1x1x256x256xf32> to vector<256x256xf32>
    %cst_133 = arith.constant dense<0.000000e+00> : vector<8x256xf32>
    %110 = tpu.matmul %107, %109, %cst_133 {dimension_numbers = #tpu.dot_dimension_numbers<[1], [0], [0], [1], [0, 0, 1, 1], [], []>} : vector<8x256xf32>, vector<256x256xf32>, vector<8x256xf32> -> vector<8x256xf32>
    %111 = arith.addf %104, %110 : vector<8x256xf32>
    %112 = arith.negf %111 : vector<8x256xf32>
    %113 = math.exp %112 : vector<8x256xf32>
    %cst_134 = arith.constant 1.000000e+00 : f32
    %114 = vector.broadcast %cst_134 : f32 to vector<8x256xf32>
    %115 = arith.addf %114, %113 : vector<8x256xf32>
    %116 = arith.divf %114, %115 : vector<8x256xf32>
    %c0_135 = arith.constant 0 : index
    %c0_136 = arith.constant 0 : index
    %117 = vector.load %arg3[%c0_135, %c0_136] : memref<8x256xf32, #tpu.memory_space<vmem>>, vector<8x256xf32>
    tpu.vector_store %arg3[%c0_135, %c0_136], %116 {strides = array<i32>} : memref<8x256xf32, #tpu.memory_space<vmem>>, vector<8x256xf32>,
    return
  }
  func.func @transform_0(%arg0: i32) -> (i32, i32, i32, i32) {
    %c0_i32 = arith.constant 0 : i32
    %c0_i32_0 = arith.constant 0 : i32
    %c0_i32_1 = arith.constant 0 : i32
    %c0_i32_2 = arith.constant 0 : i32
    return %arg0, %c0_i32, %c0_i32_0, %c0_i32_1 : i32, i32, i32, i32
  }
  func.func @transform_1(%arg0: i32) -> (i32, i32, i32, i32) {
    %c0_i32 = arith.constant 0 : i32
    %c0_i32_0 = arith.constant 0 : i32
    %c0_i32_1 = arith.constant 0 : i32
    %c0_i32_2 = arith.constant 0 : i32
    %c0_i32_3 = arith.constant 0 : i32
    return %c0_i32, %c0_i32_0, %c0_i32_1, %c0_i32_2 : i32, i32, i32, i32
  }
  func.func @transform_2(%arg0: i32) -> (i32, i32) {
    %c0_i32 = arith.constant 0 : i32
    %c0_i32_0 = arith.constant 0 : i32
    return %arg0, %c0_i32 : i32, i32
  }
}

</mosaic_0001>

<bundles_post_ra>
// kernel: tpu_custom_call.1
= control target key start
LH: loop header
LB: loop body
LE: loop exit
PB: predicated region body
PF: predicated region fallthrough
CT: control target
= control target key end

     0   :  { %7 = vsyncpa [#allocation4], 0  ;;  %s3856_s0 = inlined_call_operand.hbm [shape: f32[2,4,8,256], index: 0, kind: input, shape index: {}]   ;;  %s3857_s1 = inlined_call_operand.hbm [shape: f32[2,7,256,256], index: 1, kind: input, shape index: {}]   ;;  %s3858_s2 = inlined_call_operand.hbm [shape: f32[16,256], index: 2, kind: output, shape index: {}]  }
   0x1   :  { %9 = vsyncpa [#allocation4 + $0x1], 0 }
   0x2   :  { %10 = vsyncpa [#allocation7], 0 }
   0x3   :  { %11 = vsyncpa [#allocation5], 0 }
   0x4   :  { %13 = vsyncpa [#allocation5 + $0x1], 0  ;;  %s3616_s9 = smov 0   ;;  %s3618_s10 = smov 0  }
   0x5   :  { %s3620_s11 = smov 0   ;;  %s3622_s12 = smov 0  }
   0x6 LB: > { %s3637_s13 = sadd.s32 4294967295, %s3593_s12   ;;  %s2455_s14 = sadd.s32 4294967294, %s3593_s12   ;;  %s3593_s12 = sphi %s3622_s12, %s3878_s12   ;;  %s3589_s11 = sphi %s3620_s11, %s3877_s11   ;;  %s3585_s10 = sphi %s3618_s10, %s3876_s10   ;;  %s3581_s9 = sphi %s3616_s9, %s3875_s9  }
   0x7   : > { %p39_p0 = scmp.ne.s32.totalorder %s3585_s10, %s3581_s9  ;;  %p3859_p1 = scmp.eq.s32.totalorder %s3637_s13, 0 }
   0x8   : > { %p90_p3 = scmp.eq.s32.totalorder %s2455_s14, 1  ;;  %p2456_p5 = scmp.ge.s32.totalorder %s3593_s12, 1 }
   0x9   : > { %p3646_p4 = por %p3859_p1, %p39_p0  ;;  %p97_p7 = scmp.lt.s32.totalorder %s3593_s12, 3 }
   0xa   : > { %p3651_p6 = por %p90_p3, %p39_p0  ;;  %s3595_s18 = smov [#allocation6]  }
   0xb   : > { %s3862_s15 = scalar_select %p3646_p4, 1, 0 }
   0xc   : > { %s3863_s16 = scalar_select %p3651_p6, 1, 0 }
   0xd   : > { %p3656_p8 = pnand %p2456_p5, %p97_p7  ;;  %s109_s19 = sshll.u32 %s3595_s18, 4  ;;  %s3660_s19 = int_to_ptr.vmem [resolvable:$true] %s109_s19 }
   0xe   : > { %s3672_s21 = sadd.s32 1, %s3593_s12   ;;  %s26_s22 = sadd.s32 1, %s3589_s11 }
   0xf   : > { %s3864_s17 = scalar_select %p3656_p8, 1, 0 }
  0x10   : > { %p3405_p9 = pneg %p3656_p8  ;;  %s23_s23 = ssub.s32 %s3593_s12, %s3672_s21 }
  0x11   : > { %s3465_s26 = scalar_lea.hbm %s3857_s1, 114688 }
  0x12   : > { %p3667_p11 = pnand %p3405_p9, %p3859_p1  ;;  %p3466_p12 = scmp.ne.s32.totalorder %s3857_s1, %s3465_s26 }
  0x13   : > { %p3472_p5 = scmp.lt.u32.totalorder %s3465_s26, %s3857_s1 }
  0x14   : > { %p3467_p13 = pneg %p3667_p11 }
  0x16   : > { %p3468_p0 = pnand %p3467_p13, %p3466_p12 }
  0x18   : > { %p3469_p3 = pneg %p3468_p0 }
  0x1a   : > { %p3474_p7 = pnand %p3472_p5, %p3469_p3 }
  0x1c   : > { %3477 = shalt.err (!%p3474_p7)
}
  0x1d   : > { %s3478_s3 = scalar_lea.vmem %s3660_s19, 114688  ;;  %p3486_p2 = scmp.lt.s32.totalorder %s3660_s19, %s3660_s19 }
  0x1e   : > { %p3479_p9 = scmp.ne.s32.totalorder %s3660_s19, %s3478_s3  ;;  %p3487_p6 = scmp.lt.s32.totalorder %s3478_s3, %s3478_s3 }
  0x20   : > { %p3481_p10 = pnand %p3479_p9, %p3467_p13  ;;  %p3488_p4 = por %p3487_p6, %p3486_p2 }
  0x22   : > { %p3482_p1 = pneg %p3481_p10 }
  0x24   : > { %p3489_p8 = pnand %p3488_p4, %p3482_p1 }
  0x26   : > { %3492 = shalt.err (!%p3489_p8)
}
  0x27   : > { %s3596_s4 = smov 256   ;;  %s3597_s5 = smov 16  }
  0x28   : > { %3408 = dma.hbm_to_vmem [thread:$0]  (!%p3667_p11), %s3857_s1, 114688, %s3660_s19, [#allocation7], %s3596_s4, %s3596_s4, %s3597_s5  }
  0x29   : > { %p24_p1 = scmp.eq.s32.totalorder %s23_s23, 0  ;;  %p33_p2 = scmp.ne.s32.totalorder %s3589_s11, %s3585_s10 }
  0x2a   : > { %p34_p4 = scmp.eq.s32.totalorder %s3593_s12, 0  ;;  %p3418_p6 = scmp.lt.s32.totalorder %s3593_s12, 2 }
  0x2b   : > { %s3706_s8 = scalar_select %p24_p1, %s3589_s11, %s26_s22  }
  0x2c   : > { %p35_p8 = por %p34_p4, %p33_p2  ;;  %p3866_p10 = scmp.eq.s32.totalorder %s3637_s13, 1 }
  0x2d   : > { %s123_s18 = sand.u32 1, %s3589_s11   ;;  %s2473_s20 = sshll.u32 %s3593_s12, 10 }
  0x2e   : > { %p3710_p12 = por %p3866_p10, %p33_p2  ;;  %s2459_s24 = sshll.u32 %s123_s18, 6 }
  0x2f   : > { %s3719_s27 = scalar_lea.hbm %s3856_s0, %s2473_s20  ;;  %s127_s19 = scalar_lea.vmem [#allocation3], %s2459_s24 }
  0x30   : > { %s134_s22 = sshll.u32 %s127_s19, 4  ;;  %p3721_p11 = pnand %p3418_p6, %p35_p8  ;;  %s3725_s22 = int_to_ptr.vmem [resolvable:$true] %s134_s22 }
  0x31   : > { %s3727_s28 = scalar_lea.sflag [#allocation4], %s123_s18  ;;  %s3493_s29 = scalar_lea.hbm %s3719_s27, 1024 }
  0x32   : > { %p3494_p13 = scmp.ne.s32.totalorder %s3719_s27, %s3493_s29  ;;  %p3495_p0 = pneg %p3721_p11 }
  0x33   : > { %s3498_s6 = scalar_lea.hbm %s3856_s0, 2048  ;;  %p3499_p7 = scmp.lt.u32.totalorder %s3719_s27, %s3856_s0 }
  0x34   : > { %p3496_p3 = pnand %p3495_p0, %p3494_p13  ;;  %p3500_p9 = scmp.lt.u32.totalorder %s3498_s6, %s3493_s29 }
  0x35   : > { %p3502_p2 = scmp.lt.u32.totalorder %s3493_s29, %s3719_s27 }
  0x36   : > { %p3497_p5 = pneg %p3496_p3  ;;  %p3501_p1 = por %p3500_p9, %p3499_p7 }
  0x38   : > { %p3503_p4 = por %p3502_p2, %p3501_p1 }
  0x3a   : > { %p3504_p6 = pnand %p3503_p4, %p3497_p5 }
  0x3c   : > { %3507 = shalt.err (!%p3504_p6)
}
  0x3d   : > { %s3508_s18 = scalar_lea.vmem %s3725_s22, 1024  ;;  %s3598_s24 = smov [#allocation3]  }
  0x3e   : > { %p3509_p8 = scmp.ne.s32.totalorder %s3725_s22, %s3508_s18  ;;  %s3513_s25 = sshll.u32 %s3598_s24, 4  ;;  %s3514_s25 = int_to_ptr.vmem [resolvable:$false] %s3513_s25 }
  0x3f   : > { %s3515_s26 = scalar_lea.vmem %s3514_s25, 2048  ;;  %p3516_p3 = scmp.lt.s32.totalorder %s3725_s22, %s3514_s25 }
  0x40   : > { %p3511_p10 = pnand %p3509_p8, %p3495_p0  ;;  %p3517_p7 = scmp.lt.s32.totalorder %s3515_s26, %s3508_s18 }
  0x42   : > { %p3512_p13 = pneg %p3511_p10  ;;  %p3518_p9 = por %p3517_p7, %p3516_p3 }
  0x44   : > { %p3519_p1 = pnand %p3518_p9, %p3512_p13 }
  0x46   : > { %3522 = shalt.err (!%p3519_p1)
}
  0x47   : > { %3412 = dma.hbm_to_vmem [thread:$0]  (!%p3721_p11), %s3719_s27, 1024, %s3725_s22, %s3727_s28, %s3596_s4, %s3596_s4, %s3597_s5  }
  0x48   : > { %p3869_p0 = scmp.ne.s32.totalorder %s3864_s17, 0 }
  0x49   : > { %s3761_s19 = sand.u32 (!%p3869_p0), 1, %s3585_s10   ;;  %p3870_p5 = scmp.ne.s32.totalorder (!%p3869_p0), %s3862_s15, 0 }
  0x4a   : > { %146 = sbr.rel (%p3869_p0) target bundleno = 793 (0x319), region = 28  ;;  %s2463_s29 = sshll.u32 (!%p3869_p0), %s3761_s19, 6 }
  0x4b   : > { %s149_s30 = scalar_lea.sflag (!%p3869_p0), [#allocation4], %s3761_s19  ;;  %s3765_s3 = scalar_lea.vmem (!%p3869_p0), [#allocation3], %s2463_s29 }
  0x51   : > { %3568 = dma.done.wait (%p3870_p5), %s149_s30, 1024  }
  0x52   : > { %3570 = vsyncadd (%p3870_p5), %s149_s30, 4294966272  ;;  %p3871_p11 = scmp.eq.s32.totalorder %s3637_s13, 0 }
  0x54   : > { %3572 = dma.done.wait (%p3871_p11), [#allocation7], 114688   ;;  %p3872_p2 = pmov %p3871_p11 }
  0x55   : > { %v3599_v0 = vmov 0.0   ;;  %v291_v1 = vld [vmem:[#allocation6 + $0x208] sm:$0xff]  ;;  %v293_v2 = vld [vmem:[#allocation6 + $0x218] sm:$0xff]  ;;  %v290_v6 = vld [vmem:[#allocation6 + $0x200] sm:$0xff]  ;;  %vm442_vm0 = vcmask 1042432   ;;  %vm358_vm1 = vcmask 1041408  }
  0x56   : > { %3574 = vsyncadd (%p3872_p2), [#allocation7], 4294852608  ;;  %201 = vst [vmem:[#allocation2 + $0x8] sm:$0xff] %v3599_v0  ;;  %v1288_v3 = vld [vmem:[#allocation6 + $0xe08] sm:$0xff]  ;;  %v2475_v4 = vpack.c.bf16 %v293_v2, %v291_v1  ;;  %v1290_v5 = vld [vmem:[#allocation6 + $0xe18] sm:$0xff]  ;;  %vm595_vm2 = vcmask 1040384  }
  0x57   : > { %200 = vst [vmem:[#allocation2] sm:$0xff] %v3599_v0  ;;  %204 = vst [vmem:[#allocation2 + $0x20] sm:$0xff] %v3599_v0  ;;  %v292_v7 = vld [vmem:[#allocation6 + $0x210] sm:$0xff]  ;;  %v2923_v8 = vpack.c.bf16 %v1290_v5, %v1288_v3  ;;  %v1287_v10 = vld [vmem:[#allocation6 + $0xe00] sm:$0xff]  ;;  %vm890_vm3 = vcmask 1046528   ;;  %vm1045_vm4 = vcmask 1045504  }
  0x58   : > { %205 = vst [vmem:[#allocation2 + $0x28] sm:$0xff] %v3599_v0  ;;  %206 = vst [vmem:[#allocation2 + $0x30] sm:$0xff] %v3599_v0  ;;  %v2477_v9 = vpack.c.bf16 %v292_v7, %v290_v6  ;;  %v1289_v11 = vld [vmem:[#allocation6 + $0xe10] sm:$0xff]  ;;  %v295_v12 = vld [vmem:[#allocation6 + $0x228] sm:$0xff]  ;;  %2476 = vmatprep.subr.bf16.mxu1 %v2475_v4  ;;  %vm1200_vm5 = vcmask 1044480   ;;  %s2465_s15 = sshll.u32 %s3761_s19, 4 }
  0x59   : > { %207 = vst [vmem:[#allocation2 + $0x38] sm:$0xff] %v3599_v0  ;;  %210 = vst [vmem:[#allocation2 + $0x50] sm:$0xff] %v3599_v0  ;;  %v2925_v13 = vpack.c.bf16 %v1289_v11, %v1287_v10  ;;  %v297_v14 = vld [vmem:[#allocation6 + $0x238] sm:$0xff]  ;;  %v1292_v15 = vld [vmem:[#allocation6 + $0xe28] sm:$0xff]  ;;  %2924 = vmatprep.subr.bf16.mxu0 %v2923_v8  ;;  %s2474_s17 = sshll.u32 %s3637_s13, 8  ;;  %s176_s4 = scalar_lea.vmem [#allocation8], %s2465_s15 }
  0x5a   : > { %211 = vst [vmem:[#allocation2 + $0x58] sm:$0xff] %v3599_v0  ;;  %v1294_v16 = vld [vmem:[#allocation6 + $0xe38] sm:$0xff]  ;;  %2478 = vmatpush1.bf16.msra.mxu1 %v2477_v9  ;;  %v2479_v17 = vpack.c.bf16 %v297_v14, %v295_v12  ;;  %v294_v19 = vld [vmem:[#allocation6 + $0x220] sm:$0xff]  ;;  %v296_v20 = vld [vmem:[#allocation6 + $0x230] sm:$0xff]  ;;  %s2375_s5 = sshll.u32 %s176_s4, 4  ;;  %s3812_s23 = scalar_lea.hbm %s3858_s2, %s2474_s17  ;;  %s3814_s5 = int_to_ptr.vmem [resolvable:$true] %s2375_s5 }
  0x5b   : > { %v2927_v18 = vpack.c.bf16 %v1294_v16, %v1292_v15  ;;  %v1291_v21 = vld [vmem:[#allocation6 + $0xe20] sm:$0xff]  ;;  %2926 = vmatpush1.bf16.msra.mxu0 %v2925_v13  ;;  %v2481_v22 = vpack.c.bf16 %v296_v20, %v294_v19  ;;  %v1293_v23 = vld [vmem:[#allocation6 + $0xe30] sm:$0xff]  ;;  %v299_v24 = vld [vmem:[#allocation6 + $0x248] sm:$0xff]  ;;  %s2361_s28 = scalar_lea.sflag [#allocation5], %s3761_s19  ;;  %s3523_s6 = scalar_lea.vmem %s3814_s5, 256 }
  0x5c   : > { %v301_v25 = vld [vmem:[#allocation6 + $0x258] sm:$0xff]  ;;  %2480 = vmatprep.subr.bf16.mxu1 %v2479_v17  ;;  %v2929_v26 = vpack.c.bf16 %v1293_v23, %v1291_v21  ;;  %v1296_v28 = vld [vmem:[#allocation6 + $0xe48] sm:$0xff]  ;;  %v298_v30 = vld [vmem:[#allocation6 + $0x240] sm:$0xff]  ;;  %p3524_p4 = scmp.ne.s32.totalorder %s3814_s5, %s3523_s6  ;;  %s3600_s13 = smov [#allocation8]  }
  0x5d   : > { %2928 = vmatprep.subr.bf16.mxu0 %v2927_v18  ;;  %v2483_v27 = vpack.c.bf16 %v301_v25, %v299_v24  ;;  %v1298_v29 = vld [vmem:[#allocation6 + $0xe58] sm:$0xff]  ;;  %v300_v32 = vld [vmem:[#allocation6 + $0x250] sm:$0xff]  ;;  %v1295_v33 = vld [vmem:[#allocation6 + $0xe40] sm:$0xff]  ;;  %s3527_s7 = sshll.u32 %s3600_s13, 4  ;;  %s3528_s7 = int_to_ptr.vmem [resolvable:$false] %s3527_s7 }
  0x5e   : > { %v2931_v31 = vpack.c.bf16 %v1298_v29, %v1296_v28  ;;  %v1297_v34 = vld [vmem:[#allocation6 + $0xe50] sm:$0xff]  ;;  %2482 = vmatpush1.bf16.msra.mxu1 %v2481_v22  ;;  %v2485_v35 = vpack.c.bf16 %v300_v32, %v298_v30  ;;  %v303_v36 = vld [vmem:[#allocation6 + $0x268] sm:$0xff]  ;;  %v305_v37 = vld [vmem:[#allocation6 + $0x278] sm:$0xff]  ;;  %p3525_p6 = pnand %p3524_p4, %p3710_p12  ;;  %s3529_s20 = scalar_lea.vmem %s3528_s7, 512 }
  0x5f   : > { %v1300_v38 = vld [vmem:[#allocation6 + $0xe68] sm:$0xff]  ;;  %2930 = vmatpush1.bf16.msra.mxu0 %v2929_v26  ;;  %2484 = vmatprep.subr.bf16.mxu1 %v2483_v27  ;;  %v2933_v39 = vpack.c.bf16 %v1297_v34, %v1295_v33  ;;  %v2487_v40 = vpack.c.bf16 %v305_v37, %v303_v36  ;;  %v1302_v41 = vld [vmem:[#allocation6 + $0xe78] sm:$0xff]  ;;  %v302_v42 = vld [vmem:[#allocation6 + $0x260] sm:$0xff]  ;;  %p3530_p10 = scmp.lt.s32.totalorder %s3814_s5, %s3528_s7  ;;  %p3531_p13 = scmp.lt.s32.totalorder %s3529_s20, %s3523_s6 }
  0x60   : > { %v304_v43 = vld [vmem:[#allocation6 + $0x270] sm:$0xff]  ;;  %2932 = vmatprep.subr.bf16.mxu0 %v2931_v31  ;;  %v2935_v44 = vpack.c.bf16 %v1302_v41, %v1300_v38  ;;  %v1299_v45 = vld [vmem:[#allocation6 + $0xe60] sm:$0xff]  ;;  %v307_v47 = vld [vmem:[#allocation6 + $0x288] sm:$0xff]  ;;  %p3526_p8 = pneg %p3525_p6 }
  0x61   : > { %v1301_v46 = vld [vmem:[#allocation6 + $0xe70] sm:$0xff]  ;;  %v309_v48 = vld [vmem:[#allocation6 + $0x298] sm:$0xff]  ;;  %v1304_v49 = vld [vmem:[#allocation6 + $0xe88] sm:$0xff]  ;;  %v2489_v51 = vpack.c.bf16 %v304_v43, %v302_v42  ;;  %p3532_p3 = por %p3531_p13, %p3530_p10 }
  0x62   : > { %v1306_v50 = vld [vmem:[#allocation6 + $0xe98] sm:$0xff]  ;;  %2486 = vmatpush1.bf16.msra.mxu1 %v2485_v35  ;;  %v2937_v52 = vpack.c.bf16 %v1301_v46, %v1299_v45  ;;  %v2491_v53 = vpack.c.bf16 %v309_v48, %v307_v47  ;;  %v306_v54 = vld [vmem:[#allocation6 + $0x280] sm:$0xff]  ;;  %v308_v55 = vld [vmem:[#allocation6 + $0x290] sm:$0xff] }
  0x63   : > { %2934 = vmatpush1.bf16.msra.mxu0 %v2933_v39  ;;  %2488 = vmatprep.subr.bf16.mxu1 %v2487_v40  ;;  %v1303_v56 = vld [vmem:[#allocation6 + $0xe80] sm:$0xff]  ;;  %v2939_v57 = vpack.c.bf16 %v1306_v50, %v1304_v49  ;;  %v1305_v58 = vld [vmem:[#allocation6 + $0xe90] sm:$0xff]  ;;  %v311_v59 = vld [vmem:[#allocation6 + $0x2a8] sm:$0xff]  ;;  %v2493_v63 = vpack.c.bf16 %v308_v55, %v306_v54  ;;  %p3533_p7 = pnand %p3532_p3, %p3526_p8 }
  0x64   : > { %2936 = vmatprep.subr.bf16.mxu0 %v2935_v44  ;;  %v313_v60 = vld [vmem:[#allocation6 + $0x2b8] sm:$0xff]  ;;  %v1308_v61 = vld [vmem:[#allocation6 + $0xea8] sm:$0xff]  ;;  %v2941_v0 = vpack.c.bf16 %v1305_v58, %v1303_v56  ;;  %v310_v2 = vld [vmem:[#allocation6 + $0x2a0] sm:$0xff] }
  0x65   : > { %v1310_v62 = vld [vmem:[#allocation6 + $0xeb8] sm:$0xff]  ;;  %v2495_v1 = vpack.c.bf16 %v313_v60, %v311_v59  ;;  %v312_v3 = vld [vmem:[#allocation6 + $0x2b0] sm:$0xff]  ;;  %v1307_v4 = vld [vmem:[#allocation6 + $0xea0] sm:$0xff] }
  0x66   : > { %2490 = vmatpush1.bf16.msra.mxu1 %v2489_v51  ;;  %v2943_v5 = vpack.c.bf16 %v1310_v62, %v1308_v61  ;;  %v1309_v6 = vld [vmem:[#allocation6 + $0xeb0] sm:$0xff]  ;;  %v315_v7 = vld [vmem:[#allocation6 + $0x2c8] sm:$0xff]  ;;  %v317_v8 = vld [vmem:[#allocation6 + $0x2d8] sm:$0xff]  ;;  %v2497_v11 = vpack.c.bf16 %v312_v3, %v310_v2 }
  0x67   : > { %2938 = vmatpush1.bf16.msra.mxu0 %v2937_v52  ;;  %2492 = vmatprep.subr.bf16.mxu1 %v2491_v53  ;;  %v1312_v9 = vld [vmem:[#allocation6 + $0xec8] sm:$0xff]  ;;  %v1314_v10 = vld [vmem:[#allocation6 + $0xed8] sm:$0xff]  ;;  %v2945_v12 = vpack.c.bf16 %v1309_v6, %v1307_v4  ;;  %v2499_v13 = vpack.c.bf16 %v317_v8, %v315_v7  ;;  %v314_v14 = vld [vmem:[#allocation6 + $0x2c0] sm:$0xff] }
  0x68   : > { %2940 = vmatprep.subr.bf16.mxu0 %v2939_v57  ;;  %v316_v15 = vld [vmem:[#allocation6 + $0x2d0] sm:$0xff]  ;;  %v1311_v16 = vld [vmem:[#allocation6 + $0xec0] sm:$0xff]  ;;  %v2947_v17 = vpack.c.bf16 %v1314_v10, %v1312_v9  ;;  %v319_v19 = vld [vmem:[#allocation6 + $0x2e8] sm:$0xff] }
  0x69   : > { %v1313_v18 = vld [vmem:[#allocation6 + $0xed0] sm:$0xff]  ;;  %v321_v20 = vld [vmem:[#allocation6 + $0x2f8] sm:$0xff]  ;;  %v1316_v21 = vld [vmem:[#allocation6 + $0xee8] sm:$0xff]  ;;  %v2501_v23 = vpack.c.bf16 %v316_v15, %v314_v14 }
  0x6a   : > { %2494 = vmatpush1.bf16.msra.mxu1 %v2493_v63  ;;  %v1318_v22 = vld [vmem:[#allocation6 + $0xef8] sm:$0xff]  ;;  %v2949_v24 = vpack.c.bf16 %v1313_v18, %v1311_v16  ;;  %v2503_v25 = vpack.c.bf16 %v321_v20, %v319_v19  ;;  %v318_v26 = vld [vmem:[#allocation6 + $0x2e0] sm:$0xff]  ;;  %v320_v27 = vld [vmem:[#allocation6 + $0x2f0] sm:$0xff] }
  0x6b   : > { %2942 = vmatpush1.bf16.msra.mxu0 %v2941_v0  ;;  %2496 = vmatprep.subr.bf16.mxu1 %v2495_v1  ;;  %v1315_v28 = vld [vmem:[#allocation6 + $0xee0] sm:$0xff]  ;;  %v2951_v29 = vpack.c.bf16 %v1318_v22, %v1316_v21  ;;  %v1317_v30 = vld [vmem:[#allocation6 + $0xef0] sm:$0xff]  ;;  %v323_v31 = vld [vmem:[#allocation6 + $0x308] sm:$0xff]  ;;  %v2505_v35 = vpack.c.bf16 %v320_v27, %v318_v26 }
  0x6c   : > { %2944 = vmatprep.subr.bf16.mxu0 %v2943_v5  ;;  %v325_v32 = vld [vmem:[#allocation6 + $0x318] sm:$0xff]  ;;  %v1320_v33 = vld [vmem:[#allocation6 + $0xf08] sm:$0xff]  ;;  %v2953_v36 = vpack.c.bf16 %v1317_v30, %v1315_v28  ;;  %v322_v38 = vld [vmem:[#allocation6 + $0x300] sm:$0xff] }
  0x6d   : > { %v1322_v34 = vld [vmem:[#allocation6 + $0xf18] sm:$0xff]  ;;  %v2507_v37 = vpack.c.bf16 %v325_v32, %v323_v31  ;;  %v324_v39 = vld [vmem:[#allocation6 + $0x310] sm:$0xff]  ;;  %v1319_v40 = vld [vmem:[#allocation6 + $0xf00] sm:$0xff] }
  0x6e   : > { %2498 = vmatpush1.bf16.msra.mxu1 %v2497_v11  ;;  %v2955_v41 = vpack.c.bf16 %v1322_v34, %v1320_v33  ;;  %v1321_v42 = vld [vmem:[#allocation6 + $0xf10] sm:$0xff]  ;;  %v327_v43 = vld [vmem:[#allocation6 + $0x328] sm:$0xff]  ;;  %v329_v44 = vld [vmem:[#allocation6 + $0x338] sm:$0xff]  ;;  %v2509_v47 = vpack.c.bf16 %v324_v39, %v322_v38 }
  0x6f   : > { %2946 = vmatpush1.bf16.msra.mxu0 %v2945_v12  ;;  %2500 = vmatprep.subr.bf16.mxu1 %v2499_v13  ;;  %v1324_v45 = vld [vmem:[#allocation6 + $0xf28] sm:$0xff]  ;;  %v1326_v46 = vld [vmem:[#allocation6 + $0xf38] sm:$0xff]  ;;  %v2957_v48 = vpack.c.bf16 %v1321_v42, %v1319_v40  ;;  %v2511_v49 = vpack.c.bf16 %v329_v44, %v327_v43  ;;  %v326_v50 = vld [vmem:[#allocation6 + $0x320] sm:$0xff] }
  0x70   : > { %2948 = vmatprep.subr.bf16.mxu0 %v2947_v17  ;;  %v328_v51 = vld [vmem:[#allocation6 + $0x330] sm:$0xff]  ;;  %v1323_v52 = vld [vmem:[#allocation6 + $0xf20] sm:$0xff]  ;;  %v2959_v53 = vpack.c.bf16 %v1326_v46, %v1324_v45  ;;  %v331_v55 = vld [vmem:[#allocation6 + $0x348] sm:$0xff] }
  0x71   : > { %v1325_v54 = vld [vmem:[#allocation6 + $0xf30] sm:$0xff]  ;;  %v333_v56 = vld [vmem:[#allocation6 + $0x358] sm:$0xff]  ;;  %v1328_v57 = vld [vmem:[#allocation6 + $0xf48] sm:$0xff]  ;;  %v2513_v59 = vpack.c.bf16 %v328_v51, %v326_v50 }
  0x72   : > { %2502 = vmatpush1.bf16.msra.mxu1 %v2501_v23  ;;  %v1330_v58 = vld [vmem:[#allocation6 + $0xf58] sm:$0xff]  ;;  %v2961_v60 = vpack.c.bf16 %v1325_v54, %v1323_v52  ;;  %v2515_v61 = vpack.c.bf16 %v333_v56, %v331_v55  ;;  %v330_v62 = vld [vmem:[#allocation6 + $0x340] sm:$0xff]  ;;  %v332_v63 = vld [vmem:[#allocation6 + $0x350] sm:$0xff] }
  0x73   : > { %2950 = vmatpush1.bf16.msra.mxu0 %v2949_v24  ;;  %2504 = vmatprep.subr.bf16.mxu1 %v2503_v25  ;;  %v1327_v0 = vld [vmem:[#allocation6 + $0xf40] sm:$0xff]  ;;  %v2963_v1 = vpack.c.bf16 %v1330_v58, %v1328_v57  ;;  %v1329_v2 = vld [vmem:[#allocation6 + $0xf50] sm:$0xff]  ;;  %v335_v3 = vld [vmem:[#allocation6 + $0x368] sm:$0xff]  ;;  %v2517_v7 = vpack.c.bf16 %v332_v63, %v330_v62 }
  0x74   : > { %2952 = vmatprep.subr.bf16.mxu0 %v2951_v29  ;;  %v337_v4 = vld [vmem:[#allocation6 + $0x378] sm:$0xff]  ;;  %v1332_v5 = vld [vmem:[#allocation6 + $0xf68] sm:$0xff]  ;;  %v334_v8 = vld [vmem:[#allocation6 + $0x360] sm:$0xff]  ;;  %v2965_v11 = vpack.c.bf16 %v1329_v2, %v1327_v0 }
  0x75   : > { %v1334_v6 = vld [vmem:[#allocation6 + $0xf78] sm:$0xff]  ;;  %v336_v9 = vld [vmem:[#allocation6 + $0x370] sm:$0xff]  ;;  %v1331_v10 = vld [vmem:[#allocation6 + $0xf60] sm:$0xff]  ;;  %v2519_v12 = vpack.c.bf16 %v337_v4, %v335_v3 }
  0x76   : > { %2506 = vmatpush1.bf16.msra.mxu1 %v2505_v35  ;;  %v1333_v13 = vld [vmem:[#allocation6 + $0xf70] sm:$0xff]  ;;  %v339_v14 = vld [vmem:[#allocation6 + $0x388] sm:$0xff]  ;;  %v341_v15 = vld [vmem:[#allocation6 + $0x398] sm:$0xff]  ;;  %v2967_v16 = vpack.c.bf16 %v1334_v6, %v1332_v5  ;;  %v2521_v23 = vpack.c.bf16 %v336_v9, %v334_v8 }
  0x77   : > { %2954 = vmatpush1.bf16.msra.mxu0 %v2953_v36  ;;  %2508 = vmatprep.subr.bf16.mxu1 %v2507_v37  ;;  %v1336_v17 = vld [vmem:[#allocation6 + $0xf88] sm:$0xff]  ;;  %v1338_v18 = vld [vmem:[#allocation6 + $0xf98] sm:$0xff]  ;;  %v338_v24 = vld [vmem:[#allocation6 + $0x380] sm:$0xff]  ;;  %v2969_v30 = vpack.c.bf16 %v1333_v13, %v1331_v10  ;;  %v2523_v31 = vpack.c.bf16 %v341_v15, %v339_v14 }
  0x78   : > { %2956 = vmatprep.subr.bf16.mxu0 %v2955_v41  ;;  %v178_v19 = vld [vmem:[%s3765_s3 + $0x8] sm:$0xff]  ;;  %v180_v20 = vld [vmem:[%s3765_s3 + $0x18] sm:$0xff]  ;;  %v340_v25 = vld [vmem:[#allocation6 + $0x390] sm:$0xff]  ;;  %v2971_v35 = vpack.c.bf16 %v1338_v18, %v1336_v17 }
  0x79   : > { %v182_v21 = vld [vmem:[%s3765_s3 + $0x28] sm:$0xff]  ;;  %v184_v22 = vld [vmem:[%s3765_s3 + $0x38] sm:$0xff]  ;;  %v1335_v26 = vld [vmem:[#allocation6 + $0xf80] sm:$0xff]  ;;  %v188_v27 = vadd.f32 %v180_v20, %v178_v19  ;;  %v2525_v46 = vpack.c.bf16 %v340_v25, %v338_v24 }
  0x7a   : > { %2510 = vmatpush1.bf16.msra.mxu1 %v2509_v47  ;;  %v197_v28 = vmax.f32 %v178_v19, %v182_v21  ;;  %v198_v29 = vmax.f32 %v180_v20, %v184_v22  ;;  %v1337_v32 = vld [vmem:[#allocation6 + $0xf90] sm:$0xff]  ;;  %v343_v33 = vld [vmem:[#allocation6 + $0x3a8] sm:$0xff]  ;;  %v345_v34 = vld [vmem:[#allocation6 + $0x3b8] sm:$0xff] }
  0x7b   : > { %2958 = vmatpush1.bf16.msra.mxu0 %v2957_v48  ;;  %2512 = vmatprep.subr.bf16.mxu1 %v2511_v49  ;;  %v189_v36 = vadd.f32 %v188_v27, %v182_v21  ;;  %v177_v38 = vld [vmem:[%s3765_s3] sm:$0xff]  ;;  %v179_v39 = vld [vmem:[%s3765_s3 + $0x10] sm:$0xff]  ;;  %v1340_v41 = vld [vmem:[#allocation6 + $0xfa8] sm:$0xff]  ;;  %v2973_v49 = vpack.c.bf16 %v1337_v32, %v1335_v26  ;;  %v2527_v50 = vpack.c.bf16 %v345_v34, %v343_v33 }
  0x7c   : > { %2960 = vmatprep.subr.bf16.mxu0 %v2959_v53  ;;  %v199_v37 = vmax.f32 %v197_v28, %v198_v29  ;;  %v181_v40 = vld [vmem:[%s3765_s3 + $0x20] sm:$0xff]  ;;  %v1342_v42 = vld [vmem:[#allocation6 + $0xfb8] sm:$0xff]  ;;  %v183_v43 = vld [vmem:[%s3765_s3 + $0x30] sm:$0xff]  ;;  %v185_v44 = vadd.f32 %v179_v39, %v177_v38 }
  0x7d   : > { %v194_v45 = vmax.f32 %v177_v38, %v181_v40  ;;  %v190_v47 = vadd.f32 %v189_v36, %v184_v22  ;;  %v195_v48 = vmax.f32 %v179_v39, %v183_v43  ;;  %v342_v51 = vld [vmem:[#allocation6 + $0x3a0] sm:$0xff]  ;;  %v344_v52 = vld [vmem:[#allocation6 + $0x3b0] sm:$0xff]  ;;  %v2975_v55 = vpack.c.bf16 %v1342_v42, %v1340_v41  ;;  %v347_v57 = vld [vmem:[#allocation6 + $0x3c8] sm:$0xff] }
  0x7e   : > { %2514 = vmatpush1.bf16.msra.mxu1 %v2513_v59  ;;  %216 = vst [vmem:[#allocation2 + $0x48] sm:$0xff] %v199_v37  ;;  %v1339_v53 = vld [vmem:[#allocation6 + $0xfa0] sm:$0xff]  ;;  %v186_v54 = vadd.f32 %v185_v44, %v181_v40  ;;  %v1341_v56 = vld [vmem:[#allocation6 + $0xfb0] sm:$0xff]  ;;  %v349_v58 = vld [vmem:[#allocation6 + $0x3d8] sm:$0xff] }
  0x7f   : > { %2962 = vmatpush1.bf16.msra.mxu0 %v2961_v60  ;;  %2516 = vmatprep.subr.bf16.mxu1 %v2515_v61  ;;  %v193_v59 = vmul.f32 0.25, %v190_v47  ;;  %v196_v60 = vmax.f32 %v194_v45, %v195_v48  ;;  %v1344_v61 = vld [vmem:[#allocation6 + $0xfc8] sm:$0xff]  ;;  %v1346_v62 = vld [vmem:[#allocation6 + $0xfd8] sm:$0xff]  ;;  %v346_v2 = vld [vmem:[#allocation6 + $0x3c0] sm:$0xff]  ;;  %v2977_v3 = vpack.c.bf16 %v1341_v56, %v1339_v53  ;;  %v2531_v4 = vpack.c.bf16 %v349_v58, %v347_v57 }
  0x80   : > { %2964 = vmatprep.subr.bf16.mxu0 %v2963_v1  ;;  %v1283_v63 = vld [vmem:[#allocation2 + $0x38] sm:$0xe0]  ;;  %v187_v0 = vadd.f32 %v186_v54, %v183_v43  ;;  %v2529_v1 = vpack.c.bf16 %v344_v52, %v342_v51  ;;  %v348_v5 = vld [vmem:[#allocation6 + $0x3d0] sm:$0xff]  ;;  %v1343_v6 = vld [vmem:[#allocation6 + $0xfc0] sm:$0xff]  ;;  %v2979_v9 = vpack.c.bf16 %v1346_v62, %v1344_v61 }
  0x81   : > { %213 = vst [vmem:[#allocation2 + $0x18] sm:$0xff] %v193_v59  ;;  %215 = vst [vmem:[#allocation2 + $0x40] sm:$0xff] %v196_v60  ;;  %v351_v10 = vld [vmem:[#allocation6 + $0x3e8] sm:$0xff]  ;;  %v1358_v13 = vrot.slane %v1283_v63, 5  ;;  %v1350_v14 = vld [vmem:[#allocation6 + $0xff8] sm:$0xff]  ;;  %v2533_v17 = vpack.c.bf16 %v348_v5, %v346_v2 }
  0x82   : > { %2518 = vmatpush1.bf16.msra.mxu1 %v2517_v7  ;;  %v1345_v7 = vld [vmem:[#allocation6 + $0xfd0] sm:$0xff]  ;;  %v192_v8 = vmul.f32 0.25, %v187_v0  ;;  %v286_v15 = vld [vmem:[#allocation2 + $0x8] sm:$0xc0]  ;;  %v350_v18 = vld [vmem:[#allocation6 + $0x3e0] sm:$0xff] }
  0x83   : > { %2966 = vmatpush1.bf16.msra.mxu0 %v2965_v11  ;;  %2520 = vmatprep.subr.bf16.mxu1 %v2519_v12  ;;  %v353_v11 = vld [vmem:[#allocation6 + $0x3f8] sm:$0xff]  ;;  %v1348_v12 = vld [vmem:[#allocation6 + $0xfe8] sm:$0xff]  ;;  %v352_v19 = vld [vmem:[#allocation6 + $0x3f0] sm:$0xff]  ;;  %v2981_v22 = vpack.c.bf16 %v1345_v7, %v1343_v6  ;;  %v362_v28 = vrot.slane %v286_v15, 6 }
  0x84   : > { %2968 = vmatprep.subr.bf16.mxu0 %v2967_v16  ;;  %212 = vst [vmem:[#allocation2 + $0x10] sm:$0xff] %v192_v8  ;;  %v1347_v20 = vld [vmem:[#allocation6 + $0xfe0] sm:$0xff]  ;;  %v1349_v24 = vld [vmem:[#allocation6 + $0xff0] sm:$0xff]  ;;  %v222_v25 = vld [vmem:[#allocation6 + $0x8] sm:$0xff]  ;;  %v2983_v27 = vpack.c.bf16 %v1350_v14, %v1348_v12  ;;  %v2537_v36 = vpack.c.bf16 %v352_v19, %v350_v18 }
  0x85   : > { %v1285_v16 = vld [vmem:[#allocation2 + $0x48] sm:$0x1f]  ;;  %v224_v26 = vld [vmem:[#allocation6 + $0x18] sm:$0xff]  ;;  %v1282_v32 = vld [vmem:[#allocation2 + $0x30] sm:$0xe0]  ;;  %v2985_v37 = vpack.c.bf16 %v1349_v24, %v1347_v20 }
  0x86   : > { %2522 = vmatpush1.bf16.msra.mxu1 %v2521_v23  ;;  %v1359_v21 = vrot.slane %v1285_v16, 5  ;;  %v2535_v23 = vpack.c.bf16 %v353_v11, %v351_v10  ;;  %v1444_v34 = vld [vmem:[#allocation6 + $0x1018] sm:$0xff]  ;;  %v221_v39 = vld [vmem:[#allocation6] sm:$0xff]  ;;  %v2539_v40 = vpack.c.bf16 %v224_v26, %v222_v25  ;;  %v223_v42 = vld [vmem:[#allocation6 + $0x10] sm:$0xff]  ;;  %v1355_v43 = vrot.slane %v1282_v32, 5 }
  0x87   : > { %2970 = vmatpush1.bf16.msra.mxu0 %v2969_v30  ;;  %2524 = vmatprep.subr.bf16.mxu1 %v2523_v31  ;;  %v1442_v30 = vld [vmem:[#allocation6 + $0x1008] sm:$0xff]  ;;  %v285_v31 = vld [vmem:[#allocation2] sm:$0xc0]  ;;  %v228_v51 = vld [vmem:[#allocation6 + $0x38] sm:$0xff] }
  0x88   : > { %2972 = vmatprep.subr.bf16.mxu0 %v2971_v35  ;;  %v1360_v29 = vsel %vm442_vm0, %v1358_v13, %v1359_v21  ;;  %v288_v33 = vld [vmem:[#allocation2 + $0x18] sm:$0x3f]  ;;  %v1284_v35 = vld [vmem:[#allocation2 + $0x40] sm:$0x1f]  ;;  %v359_v41 = vrot.slane %v285_v31, 6  ;;  %v2987_v48 = vpack.c.bf16 %v1444_v34, %v1442_v30  ;;  %v1446_v53 = vld [vmem:[#allocation6 + $0x1028] sm:$0xff] }
  0x89   : > { %1427 = vmatprep.mubr.f32.mxu0 %v1360_v29  ;;  %v363_v38 = vrot.slane %v288_v33, 6  ;;  %v1356_v44 = vrot.slane %v1284_v35, 5  ;;  %v1441_v45 = vld [vmem:[#allocation6 + $0x1000] sm:$0xff]  ;;  %v1448_v54 = vld [vmem:[#allocation6 + $0x1038] sm:$0xff]  ;;  %v227_v61 = vld [vmem:[#allocation6 + $0x30] sm:$0xff] }
  0x8a   : > { %2526 = vmatpush1.bf16.msra.mxu1 %v2525_v46  ;;  %v1443_v46 = vld [vmem:[#allocation6 + $0x1010] sm:$0xff]  ;;  %v225_v60 = vld [vmem:[#allocation6 + $0x20] sm:$0xff]  ;;  %v2991_v63 = vpack.c.bf16 %v1448_v54, %v1446_v53  ;;  %v232_v2 = vld [vmem:[#allocation6 + $0x58] sm:$0xff] }
  0x8b   : > { %2974 = vmatpush1.bf16.msra.mxu0 %v2973_v49  ;;  %2528 = vmatprep.subr.bf16.mxu1 %v2527_v50  ;;  %v364_v47 = vsel %vm358_vm1, %v362_v28, %v363_v38  ;;  %v287_v49 = vld [vmem:[#allocation2 + $0x10] sm:$0x3f]  ;;  %v226_v50 = vld [vmem:[#allocation6 + $0x28] sm:$0xff]  ;;  %v2989_v56 = vpack.c.bf16 %v1443_v46, %v1441_v45  ;;  %v1357_v58 = vsel %vm442_vm0, %v1355_v43, %v1356_v44  ;;  %v1445_v62 = vld [vmem:[#allocation6 + $0x1020] sm:$0xff] }
  0x8c   : > { %2976 = vmatprep.subr.bf16.mxu0 %v2975_v55  ;;  %431 = vmatprep.mubr.f32.mxu1 %v364_v47  ;;  %v360_v52 = vrot.slane %v287_v49, 6  ;;  %v2541_v55 = vpack.c.bf16 %v223_v42, %v221_v39  ;;  %v2543_v59 = vpack.c.bf16 %v228_v51, %v226_v50  ;;  %v1447_v0 = vld [vmem:[#allocation6 + $0x1030] sm:$0xff]  ;;  %v2545_v5 = vpack.c.bf16 %v227_v61, %v225_v60  ;;  %v229_v8 = vld [vmem:[#allocation6 + $0x40] sm:$0xff]  ;;  %v234_v13 = vld [vmem:[#allocation6 + $0x68] sm:$0xff] }
  0x8d   : > { %v2993_v6 = vpack.c.bf16 %v1447_v0, %v1445_v62  ;;  %v1449_v10 = vld [vmem:[#allocation6 + $0x1040] sm:$0xff]  ;;  %v1451_v12 = vld [vmem:[#allocation6 + $0x1050] sm:$0xff]  ;;  %v236_v14 = vld [vmem:[#allocation6 + $0x78] sm:$0xff] }
  0x8e   : > { %2530 = vmatpush1.bf16.msra.mxu1 %v2529_v1  ;;  %v361_v57 = vsel %vm358_vm1, %v359_v41, %v360_v52  ;;  %v230_v1 = vld [vmem:[#allocation6 + $0x48] sm:$0xff]  ;;  %v1456_v16 = vld [vmem:[#allocation6 + $0x1078] sm:$0xff]  ;;  %v2997_v18 = vpack.c.bf16 %v1451_v12, %v1449_v10  ;;  %v2551_v19 = vpack.c.bf16 %v236_v14, %v234_v13  ;;  %v233_v20 = vld [vmem:[#allocation6 + $0x60] sm:$0xff] }
  0x8f   : > { %2978 = vmatpush1.bf16.msra.mxu0 %v2977_v3  ;;  %2532 = vmatprep.subr.bf16.mxu1 %v2531_v4  ;;  %v1450_v3 = vld [vmem:[#allocation6 + $0x1048] sm:$0xff]  ;;  %v1452_v4 = vld [vmem:[#allocation6 + $0x1058] sm:$0xff]  ;;  %v2547_v7 = vpack.c.bf16 %v232_v2, %v230_v1  ;;  %v235_v21 = vld [vmem:[#allocation6 + $0x70] sm:$0xff] }
  0x90   : > { %2980 = vmatprep.subr.bf16.mxu0 %v2979_v9  ;;  %v231_v9 = vld [vmem:[#allocation6 + $0x50] sm:$0xff]  ;;  %v2995_v11 = vpack.c.bf16 %v1452_v4, %v1450_v3  ;;  %v1454_v15 = vld [vmem:[#allocation6 + $0x1068] sm:$0xff]  ;;  %v240_v26 = vld [vmem:[#allocation6 + $0x98] sm:$0xff]  ;;  %v2553_v29 = vpack.c.bf16 %v235_v21, %v233_v20 }
  0x91   : > { %v1455_v24 = vld [vmem:[#allocation6 + $0x1070] sm:$0xff]  ;;  %v238_v25 = vld [vmem:[#allocation6 + $0x88] sm:$0xff]  ;;  %v1460_v28 = vld [vmem:[#allocation6 + $0x1098] sm:$0xff] }
  0x92   : > { %2534 = vmatpush1.bf16.msra.mxu1 %v2533_v17  ;;  %v2549_v17 = vpack.c.bf16 %v231_v9, %v229_v8  ;;  %v2555_v31 = vpack.c.bf16 %v240_v26, %v238_v25  ;;  %v237_v32 = vld [vmem:[#allocation6 + $0x80] sm:$0xff]  ;;  %v239_v33 = vld [vmem:[#allocation6 + $0x90] sm:$0xff]  ;;  %v244_v38 = vld [vmem:[#allocation6 + $0xb8] sm:$0xff] }
  0x93   : > { %2982 = vmatpush1.bf16.msra.mxu0 %v2981_v22  ;;  %2536 = vmatprep.subr.bf16.mxu1 %v2535_v23  ;;  %v1453_v22 = vld [vmem:[#allocation6 + $0x1060] sm:$0xff]  ;;  %v2999_v23 = vpack.c.bf16 %v1456_v16, %v1454_v15  ;;  %v1462_v39 = vld [vmem:[#allocation6 + $0x10a8] sm:$0xff]  ;;  %v2557_v41 = vpack.c.bf16 %v239_v33, %v237_v32  ;;  %v243_v45 = vld [vmem:[#allocation6 + $0xb0] sm:$0xff] }
  0x94   : > { %2984 = vmatprep.subr.bf16.mxu0 %v2983_v27  ;;  %v1458_v27 = vld [vmem:[#allocation6 + $0x1088] sm:$0xff]  ;;  %v3001_v30 = vpack.c.bf16 %v1455_v24, %v1453_v22  ;;  %v1457_v34 = vld [vmem:[#allocation6 + $0x1080] sm:$0xff]  ;;  %v248_v50 = vld [vmem:[#allocation6 + $0xd8] sm:$0xff] }
  0x95   : > { %v3003_v35 = vpack.c.bf16 %v1460_v28, %v1458_v27  ;;  %v241_v44 = vld [vmem:[#allocation6 + $0xa0] sm:$0xff]  ;;  %v246_v49 = vld [vmem:[#allocation6 + $0xc8] sm:$0xff]  ;;  %v1468_v52 = vld [vmem:[#allocation6 + $0x10d8] sm:$0xff] }
  0x96   : > { %2538 = vmatpush1.bf16.msra.mxu1 %v2537_v36  ;;  %v1459_v36 = vld [vmem:[#allocation6 + $0x1090] sm:$0xff]  ;;  %v1461_v46 = vld [vmem:[#allocation6 + $0x10a0] sm:$0xff]  ;;  %v1466_v51 = vld [vmem:[#allocation6 + $0x10c8] sm:$0xff]  ;;  %v2561_v53 = vpack.c.bf16 %v243_v45, %v241_v44 }
  0x97   : > { %2986 = vmatpush1.bf16.msra.mxu0 %v2985_v37  ;;  %2540 = vmatprep.subr.bf16.mxu1 %v2539_v40  ;;  %v242_v37 = vld [vmem:[#allocation6 + $0xa8] sm:$0xff]  ;;  %v1464_v40 = vld [vmem:[#allocation6 + $0x10b8] sm:$0xff]  ;;  %v3005_v42 = vpack.c.bf16 %v1459_v36, %v1457_v34  ;;  %v1467_v60 = vld [vmem:[#allocation6 + $0x10d0] sm:$0xff] }
  0x98   : > { %2988 = vmatprep.subr.bf16.mxu0 %v2987_v48  ;;  %v2559_v43 = vpack.c.bf16 %v244_v38, %v242_v37  ;;  %v3007_v47 = vpack.c.bf16 %v1464_v40, %v1462_v39  ;;  %v1463_v48 = vld [vmem:[#allocation6 + $0x10b0] sm:$0xff]  ;;  %v250_v61 = vld [vmem:[#allocation6 + $0xe8] sm:$0xff]  ;;  %v252_v62 = vld [vmem:[#allocation6 + $0xf8] sm:$0xff] }
  0x99   : > { %432 = vmatmul.mubr.f32.vlgmr.msra.gmra.mrb[0].mxu1 %v361_v57  ;;  %v3009_v54 = vpack.c.bf16 %v1463_v48, %v1461_v46  ;;  %v247_v57 = vld [vmem:[#allocation6 + $0xd0] sm:$0xff]  ;;  %v1472_v0 = vld [vmem:[#allocation6 + $0x10f8] sm:$0xff]  ;;  %v249_v2 = vld [vmem:[#allocation6 + $0xe0] sm:$0xff]  ;;  %v2567_v4 = vpack.c.bf16 %v252_v62, %v250_v61 }
  0x9a   : > { %2542 = vmatpush1.bf16.msra.mxu1 %v2541_v55  ;;  %1428 = vmatmul.mubr.f32.vlgmr.msra.gmra.mrb[0].mxu0 %v1357_v58  ;;  %v2563_v55 = vpack.c.bf16 %v248_v50, %v246_v49  ;;  %v1465_v58 = vld [vmem:[#allocation6 + $0x10c0] sm:$0xff]  ;;  %v254_v9 = vld [vmem:[#allocation6 + $0x108] sm:$0xff]  ;;  %v256_v10 = vld [vmem:[#allocation6 + $0x118] sm:$0xff] }
  0x9b   : > { %2990 = vmatpush1.bf16.msra.mxu0 %v2989_v56  ;;  %2544 = vmatprep.subr.bf16.mxu1 %v2543_v59  ;;  %v245_v56 = vld [vmem:[#allocation6 + $0xc0] sm:$0xff]  ;;  %v3011_v59 = vpack.c.bf16 %v1468_v52, %v1466_v51  ;;  %v3013_v3 = vpack.c.bf16 %v1467_v60, %v1465_v58  ;;  %v1474_v12 = vld [vmem:[#allocation6 + $0x1108] sm:$0xff]  ;;  %v1476_v13 = vld [vmem:[#allocation6 + $0x1118] sm:$0xff]  ;;  %v2571_v21 = vpack.c.bf16 %v256_v10, %v254_v9 }
  0x9c   : > { %2992 = vmatprep.subr.bf16.mxu0 %v2991_v63  ;;  %v1470_v63 = vld [vmem:[#allocation6 + $0x10e8] sm:$0xff]  ;;  %v2565_v1 = vpack.c.bf16 %v247_v57, %v245_v56  ;;  %v220_v14 = vld [vmem:[#allocation2 + $0x18] sm:$0x1f]  ;;  %v253_v22 = vld [vmem:[#allocation6 + $0x100] sm:$0xff]  ;;  %v3019_v27 = vpack.c.bf16 %v1476_v13, %v1474_v12 }
  0x9d   : > { %v3015_v8 = vpack.c.bf16 %v1472_v0, %v1470_v63  ;;  %v1473_v24 = vld [vmem:[#allocation6 + $0x1100] sm:$0xff]  ;;  %v1475_v28 = vld [vmem:[#allocation6 + $0x1110] sm:$0xff]  ;;  %v1478_v32 = vld [vmem:[#allocation6 + $0x1128] sm:$0xff] }
  0x9e   : > { %2546 = vmatpush1.bf16.msra.mxu1 %v2545_v5  ;;  %v251_v5 = vld [vmem:[#allocation6 + $0xf0] sm:$0xff]  ;;  %v1480_v33 = vld [vmem:[#allocation6 + $0x1138] sm:$0xff]  ;;  %v3021_v36 = vpack.c.bf16 %v1475_v28, %v1473_v24  ;;  %v257_v38 = vld [vmem:[#allocation6 + $0x120] sm:$0xff] }
  0x9f   : > { %2994 = vmatpush1.bf16.msra.mxu0 %v2993_v6  ;;  %2548 = vmatprep.subr.bf16.mxu1 %v2547_v7  ;;  %v1469_v6 = vld [vmem:[#allocation6 + $0x10e0] sm:$0xff]  ;;  %v1471_v7 = vld [vmem:[#allocation6 + $0x10f0] sm:$0xff]  ;;  %v2569_v16 = vpack.c.bf16 %v251_v5, %v249_v2  ;;  %v264_v44 = vld [vmem:[#allocation6 + $0x158] sm:$0xff] }
  0xa0   : > { %2996 = vmatprep.subr.bf16.mxu0 %v2995_v11  ;;  %v218_v11 = vld [vmem:[#allocation2 + $0x8] sm:$0xe0]  ;;  %v3017_v20 = vpack.c.bf16 %v1471_v7, %v1469_v6  ;;  %v259_v39 = vld [vmem:[#allocation6 + $0x130] sm:$0xff]  ;;  %v1477_v40 = vld [vmem:[#allocation6 + $0x1120] sm:$0xff] }
  0xa1   : > { %v446_v15 = vrot.slane %v218_v11, 5  ;;  %v1482_v45 = vld [vmem:[#allocation6 + $0x1148] sm:$0xff]  ;;  %v1484_v46 = vld [vmem:[#allocation6 + $0x1158] sm:$0xff]  ;;  %v261_v50 = vld [vmem:[#allocation6 + $0x140] sm:$0xff] }
  0xa2   : > { %2550 = vmatpush1.bf16.msra.mxu1 %v2549_v17  ;;  %v447_v17 = vrot.slane %v220_v14, 5  ;;  %v263_v51 = vld [vmem:[#allocation6 + $0x150] sm:$0xff]  ;;  %v1481_v52 = vld [vmem:[#allocation6 + $0x1140] sm:$0xff]  ;;  %v268_v56 = vld [vmem:[#allocation6 + $0x178] sm:$0xff] }
  0xa3   : > { %2998 = vmatpush1.bf16.msra.mxu0 %v2997_v18  ;;  %2552 = vmatprep.subr.bf16.mxu1 %v2551_v19  ;;  %v1437_v18 = vld [vmem:[#allocation2 + $0x38] sm:$0xc0]  ;;  %v1439_v19 = vld [vmem:[#allocation2 + $0x48] sm:$0x3f]  ;;  %v265_v62 = vld [vmem:[#allocation6 + $0x160] sm:$0xff] }
  0xa4   : > { %3000 = vmatprep.subr.bf16.mxu0 %v2999_v23  ;;  %v255_v23 = vld [vmem:[#allocation6 + $0x110] sm:$0xff]  ;;  %v1512_v25 = vrot.slane %v1437_v18, 6  ;;  %v1513_v26 = vrot.slane %v1439_v19, 6  ;;  %v1486_v57 = vld [vmem:[#allocation6 + $0x1168] sm:$0xff]  ;;  %v1488_v58 = vld [vmem:[#allocation6 + $0x1178] sm:$0xff] }
  0xa5   : > { %v267_v63 = vld [vmem:[#allocation6 + $0x170] sm:$0xff]  ;;  %v1485_v0 = vld [vmem:[#allocation6 + $0x1160] sm:$0xff]  ;;  %v1490_v5 = vld [vmem:[#allocation6 + $0x1188] sm:$0xff] }
  0xa6   : > { %2554 = vmatpush1.bf16.msra.mxu1 %v2553_v29  ;;  %v258_v29 = vld [vmem:[#allocation6 + $0x128] sm:$0xff]  ;;  %v1514_v34 = vsel %vm358_vm1, %v1512_v25, %v1513_v26  ;;  %v1487_v2 = vld [vmem:[#allocation6 + $0x1170] sm:$0xff]  ;;  %v1492_v6 = vld [vmem:[#allocation6 + $0x1198] sm:$0xff]  ;;  %v2585_v7 = vpack.c.bf16 %v267_v63, %v265_v62 }
  0xa7   : > { %3002 = vmatpush1.bf16.msra.mxu0 %v3001_v30  ;;  %2556 = vmatprep.subr.bf16.mxu1 %v2555_v31  ;;  %v260_v30 = vld [vmem:[#allocation6 + $0x138] sm:$0xff]  ;;  %v448_v31 = vsel %vm442_vm0, %v446_v15, %v447_v17  ;;  %v269_v10 = vld [vmem:[#allocation6 + $0x180] sm:$0xff]  ;;  %v271_v11 = vld [vmem:[#allocation6 + $0x190] sm:$0xff]  ;;  %v3035_v13 = vpack.c.bf16 %v1492_v6, %v1490_v5 }
  0xa8   : > { %3004 = vmatprep.subr.bf16.mxu0 %v3003_v35  ;;  %515 = vmatprep.mubr.f32.mxu1 %v448_v31  ;;  %v2573_v35 = vpack.c.bf16 %v255_v23, %v253_v22  ;;  %v2575_v37 = vpack.c.bf16 %v260_v30, %v258_v29  ;;  %v1489_v12 = vld [vmem:[#allocation6 + $0x1180] sm:$0xff]  ;;  %v1491_v14 = vld [vmem:[#allocation6 + $0x1190] sm:$0xff]  ;;  %v274_v15 = vld [vmem:[#allocation6 + $0x1a8] sm:$0xff]  ;;  %v2589_v19 = vpack.c.bf16 %v271_v11, %v269_v10 }
  0xa9   : > { %1581 = vmatprep.mubr.f32.mxu0 %v1514_v34  ;;  %v1494_v17 = vld [vmem:[#allocation6 + $0x11a8] sm:$0xff]  ;;  %v1496_v18 = vld [vmem:[#allocation6 + $0x11b8] sm:$0xff]  ;;  %v273_v22 = vld [vmem:[#allocation6 + $0x1a0] sm:$0xff] }
  0xaa   : > { %2558 = vmatpush1.bf16.msra.mxu1 %v2557_v41  ;;  %v3023_v41 = vpack.c.bf16 %v1480_v33, %v1478_v32  ;;  %v275_v23 = vld [vmem:[#allocation6 + $0x1b0] sm:$0xff]  ;;  %v1493_v24 = vld [vmem:[#allocation6 + $0x11a0] sm:$0xff]  ;;  %v3039_v25 = vpack.c.bf16 %v1496_v18, %v1494_v17  ;;  %v280_v28 = vld [vmem:[#allocation6 + $0x1d8] sm:$0xff] }
  0xab   : > { %3006 = vmatpush1.bf16.msra.mxu0 %v3005_v42  ;;  %2560 = vmatprep.subr.bf16.mxu1 %v2559_v43  ;;  %v1479_v42 = vld [vmem:[#allocation6 + $0x1130] sm:$0xff]  ;;  %v262_v43 = vld [vmem:[#allocation6 + $0x148] sm:$0xff]  ;;  %v1500_v30 = vld [vmem:[#allocation6 + $0x11d8] sm:$0xff]  ;;  %v2593_v31 = vpack.c.bf16 %v275_v23, %v273_v22 }
  0xac   : > { %3008 = vmatprep.subr.bf16.mxu0 %v3007_v47  ;;  %v2577_v47 = vpack.c.bf16 %v259_v39, %v257_v38  ;;  %v3025_v48 = vpack.c.bf16 %v1479_v42, %v1477_v40  ;;  %v2579_v49 = vpack.c.bf16 %v264_v44, %v262_v43  ;;  %v1495_v26 = vld [vmem:[#allocation6 + $0x11b0] sm:$0xff]  ;;  %v1498_v29 = vld [vmem:[#allocation6 + $0x11c8] sm:$0xff]  ;;  %v277_v34 = vld [vmem:[#allocation6 + $0x1c0] sm:$0xff] }
  0xad   : > { %v3041_v32 = vpack.c.bf16 %v1495_v26, %v1493_v24  ;;  %v1499_v38 = vld [vmem:[#allocation6 + $0x11d0] sm:$0xff]  ;;  %v282_v39 = vld [vmem:[#allocation6 + $0x1e8] sm:$0xff]  ;;  %v284_v40 = vld [vmem:[#allocation6 + $0x1f8] sm:$0xff] }
  0xae   : > { %2562 = vmatpush1.bf16.msra.mxu1 %v2561_v53  ;;  %v3027_v53 = vpack.c.bf16 %v1484_v46, %v1482_v45  ;;  %v1504_v42 = vld [vmem:[#allocation6 + $0x11f8] sm:$0xff]  ;;  %v281_v43 = vld [vmem:[#allocation6 + $0x1e0] sm:$0xff]  ;;  %v283_v45 = vld [vmem:[#allocation6 + $0x1f0] sm:$0xff] }
  0xaf   : > { %3010 = vmatpush1.bf16.msra.mxu0 %v3009_v54  ;;  %2564 = vmatprep.subr.bf16.mxu1 %v2563_v55  ;;  %v1483_v54 = vld [vmem:[#allocation6 + $0x1150] sm:$0xff]  ;;  %v266_v55 = vld [vmem:[#allocation6 + $0x168] sm:$0xff]  ;;  %v1501_v46 = vld [vmem:[#allocation6 + $0x11e0] sm:$0xff] }
  0xb0   : > { %3012 = vmatprep.subr.bf16.mxu0 %v3011_v59  ;;  %v2581_v59 = vpack.c.bf16 %v263_v51, %v261_v50  ;;  %v3029_v60 = vpack.c.bf16 %v1483_v54, %v1481_v52  ;;  %v2583_v61 = vpack.c.bf16 %v268_v56, %v266_v55  ;;  %v528_v50 = vld [vmem:[#allocation6 + $0x408] sm:$0xff]  ;;  %v217_v51 = vld [vmem:[#allocation2] sm:$0xe0]  ;;  %v219_v52 = vld [vmem:[#allocation2 + $0x10] sm:$0x1f] }
  0xb1   : > { %v530_v54 = vld [vmem:[#allocation6 + $0x418] sm:$0xff]  ;;  %v1436_v55 = vld [vmem:[#allocation2 + $0x30] sm:$0xc0]  ;;  %v1438_v56 = vld [vmem:[#allocation2 + $0x40] sm:$0x3f] }
  0xb2   : > { %2566 = vmatpush1.bf16.msra.mxu1 %v2565_v1  ;;  %v3031_v1 = vpack.c.bf16 %v1488_v58, %v1486_v57  ;;  %v1596_v57 = vld [vmem:[#allocation6 + $0x1208] sm:$0xff]  ;;  %v1598_v58 = vld [vmem:[#allocation6 + $0x1218] sm:$0xff]  ;;  %v2603_v63 = vpack.c.bf16 %v530_v54, %v528_v50  ;;  %v1597_v6 = vld [vmem:[#allocation6 + $0x1210] sm:$0xff] }
  0xb3   : > { %3014 = vmatpush1.bf16.msra.mxu0 %v3013_v3  ;;  %2568 = vmatprep.subr.bf16.mxu1 %v2567_v4  ;;  %v270_v3 = vld [vmem:[#allocation6 + $0x188] sm:$0xff]  ;;  %v272_v4 = vld [vmem:[#allocation6 + $0x198] sm:$0xff]  ;;  %v3051_v5 = vpack.c.bf16 %v1598_v58, %v1596_v57  ;;  %v533_v17 = vld [vmem:[#allocation6 + $0x430] sm:$0xff] }
  0xb4   : > { %3016 = vmatprep.subr.bf16.mxu0 %v3015_v8  ;;  %v3033_v8 = vpack.c.bf16 %v1487_v2, %v1485_v0  ;;  %v2587_v9 = vpack.c.bf16 %v272_v4, %v270_v3  ;;  %v527_v0 = vld [vmem:[#allocation6 + $0x400] sm:$0xff]  ;;  %v1509_v2 = vrot.slane %v1436_v55, 6  ;;  %v1510_v3 = vrot.slane %v1438_v56, 6  ;;  %v1602_v10 = vld [vmem:[#allocation6 + $0x1238] sm:$0xff]  ;;  %v1604_v23 = vld [vmem:[#allocation6 + $0x1248] sm:$0xff] }
  0xb5   : > { %v1595_v4 = vld [vmem:[#allocation6 + $0x1200] sm:$0xff]  ;;  %v538_v22 = vld [vmem:[#allocation6 + $0x458] sm:$0xff]  ;;  %v544_v50 = vld [vmem:[#allocation6 + $0x488] sm:$0xff] }
  0xb6   : > { %2570 = vmatpush1.bf16.msra.mxu1 %v2569_v16  ;;  %v276_v16 = vld [vmem:[#allocation6 + $0x1b8] sm:$0xff]  ;;  %v1599_v18 = vld [vmem:[#allocation6 + $0x1220] sm:$0xff]  ;;  %v1612_v54 = vld [vmem:[#allocation6 + $0x1288] sm:$0xff] }
  0xb7   : > { %3018 = vmatpush1.bf16.msra.mxu0 %v3017_v20  ;;  %2572 = vmatprep.subr.bf16.mxu1 %v2571_v21  ;;  %v3037_v20 = vpack.c.bf16 %v1491_v14, %v1489_v12  ;;  %v2591_v21 = vpack.c.bf16 %v276_v16, %v274_v15  ;;  %v3053_v14 = vpack.c.bf16 %v1597_v6, %v1595_v4  ;;  %v531_v16 = vld [vmem:[#allocation6 + $0x420] sm:$0xff]  ;;  %v1606_v24 = vld [vmem:[#allocation6 + $0x1258] sm:$0xff] }
  0xb8   : > { %3020 = vmatprep.subr.bf16.mxu0 %v3019_v27  ;;  %v278_v27 = vld [vmem:[#allocation6 + $0x1c8] sm:$0xff]  ;;  %v1614_v55 = vld [vmem:[#allocation6 + $0x1298] sm:$0xff] }
  0xb9   : > { %v2595_v33 = vpack.c.bf16 %v280_v28, %v278_v27  ;;  %v535_v28 = vld [vmem:[#allocation6 + $0x440] sm:$0xff]  ;;  %v550_v4 = vld [vmem:[#allocation6 + $0x4b8] sm:$0xff] }
  0xba   : > { %2574 = vmatpush1.bf16.msra.mxu1 %v2573_v35  ;;  %v279_v35 = vld [vmem:[#allocation6 + $0x1d0] sm:$0xff]  ;;  %v1618_v6 = vld [vmem:[#allocation6 + $0x12b8] sm:$0xff] }
  0xbb   : > { %3022 = vmatpush1.bf16.msra.mxu0 %v3021_v36  ;;  %2576 = vmatprep.subr.bf16.mxu1 %v2575_v37  ;;  %v1497_v36 = vld [vmem:[#allocation6 + $0x11c0] sm:$0xff]  ;;  %v3043_v37 = vpack.c.bf16 %v1500_v30, %v1498_v29  ;;  %v2597_v44 = vpack.c.bf16 %v279_v35, %v277_v34  ;;  %v537_v29 = vld [vmem:[#allocation6 + $0x450] sm:$0xff]  ;;  %v542_v34 = vld [vmem:[#allocation6 + $0x478] sm:$0xff] }
  0xbc   : > { %3024 = vmatprep.subr.bf16.mxu0 %v3023_v41  ;;  %v1502_v41 = vld [vmem:[#allocation6 + $0x11e8] sm:$0xff]  ;;  %v1603_v30 = vld [vmem:[#allocation6 + $0x1240] sm:$0xff] }
  0xbd   : > { %v1608_v35 = vld [vmem:[#allocation6 + $0x1268] sm:$0xff] }
  0xbe   : > { %2578 = vmatpush1.bf16.msra.mxu1 %v2577_v47  ;;  %v1503_v47 = vld [vmem:[#allocation6 + $0x11f0] sm:$0xff] }
  0xbf   : > { %3026 = vmatpush1.bf16.msra.mxu0 %v3025_v48  ;;  %2580 = vmatprep.subr.bf16.mxu1 %v2579_v49  ;;  %v3045_v48 = vpack.c.bf16 %v1499_v38, %v1497_v36  ;;  %v2599_v49 = vpack.c.bf16 %v284_v40, %v282_v39  ;;  %v3049_v62 = vpack.c.bf16 %v1503_v47, %v1501_v46  ;;  %v1610_v36 = vld [vmem:[#allocation6 + $0x1278] sm:$0xff]  ;;  %v541_v39 = vld [vmem:[#allocation6 + $0x470] sm:$0xff]  ;;  %v523_v40 = vld [vmem:[#allocation2 + $0x8] sm:$0x80] }
  0xc0   : > { %3028 = vmatprep.subr.bf16.mxu0 %v3027_v53  ;;  %v3047_v53 = vpack.c.bf16 %v1504_v42, %v1502_v41  ;;  %v2613_v38 = vpack.c.bf16 %v537_v29, %v535_v28  ;;  %v525_v41 = vld [vmem:[#allocation2 + $0x18] sm:$0x7f]  ;;  %v599_v46 = vrot.slane %v523_v40, 7  ;;  %v1624_v29 = vld [vmem:[#allocation6 + $0x12e8] sm:$0xff] }
  0xc1   : > { %v600_v47 = vrot.slane %v525_v41, 7  ;;  %v558_v28 = vld [vmem:[#allocation6 + $0x4f8] sm:$0xff]  ;;  %v1628_v41 = vld [vmem:[#allocation6 + $0x1308] sm:$0xff] }
  0xc2   : > { %2582 = vmatpush1.bf16.msra.mxu1 %v2581_v59  ;;  %v2601_v59 = vpack.c.bf16 %v283_v45, %v281_v43  ;;  %v1609_v45 = vld [vmem:[#allocation6 + $0x1270] sm:$0xff]  ;;  %v562_v40 = vld [vmem:[#allocation6 + $0x518] sm:$0xff] }
  0xc3   : > { %3030 = vmatpush1.bf16.msra.mxu0 %v3029_v60  ;;  %2584 = vmatprep.subr.bf16.mxu1 %v2583_v61  ;;  %v443_v60 = vrot.slane %v217_v51, 5  ;;  %v444_v61 = vrot.slane %v219_v52, 5  ;;  %v546_v51 = vld [vmem:[#allocation6 + $0x498] sm:$0xff]  ;;  %v1593_v52 = vld [vmem:[#allocation2 + $0x48] sm:$0x7f]  ;;  %v601_v56 = vsel %vm595_vm2, %v599_v46, %v600_v47  ;;  %v559_v46 = vld [vmem:[#allocation6 + $0x500] sm:$0xff] }
  0xc4   : > { %3032 = vmatprep.subr.bf16.mxu0 %v3031_v1  ;;  %v529_v1 = vld [vmem:[#allocation6 + $0x410] sm:$0xff]  ;;  %v1667_v57 = vrot.slane %v1593_v52, 7  ;;  %v566_v52 = vld [vmem:[#allocation6 + $0x538] sm:$0xff] }
  0xc5   : > { %v445_v11 = vsel %vm442_vm0, %v443_v60, %v444_v61  ;;  %v2605_v12 = vpack.c.bf16 %v529_v1, %v527_v0  ;;  %v2619_v60 = vpack.c.bf16 %v546_v51, %v544_v50  ;;  %v543_v61 = vld [vmem:[#allocation6 + $0x480] sm:$0xff]  ;;  %v3067_v1 = vpack.c.bf16 %v1614_v55, %v1612_v54  ;;  %v561_v47 = vld [vmem:[#allocation6 + $0x510] sm:$0xff]  ;;  %v564_v51 = vld [vmem:[#allocation6 + $0x528] sm:$0xff] }
  0xc6   : > { %2586 = vmatpush1.bf16.msra.mxu1 %v2585_v7  ;;  %v532_v7 = vld [vmem:[#allocation6 + $0x428] sm:$0xff]  ;;  %v1629_v50 = vld [vmem:[#allocation6 + $0x1310] sm:$0xff]  ;;  %v1634_v54 = vld [vmem:[#allocation6 + $0x1338] sm:$0xff]  ;;  %v2637_v55 = vpack.c.bf16 %v561_v47, %v559_v46 }
  0xc7   : > { %3034 = vmatpush1.bf16.msra.mxu0 %v3033_v8  ;;  %2588 = vmatprep.subr.bf16.mxu1 %v2587_v9  ;;  %v534_v8 = vld [vmem:[#allocation6 + $0x438] sm:$0xff]  ;;  %v1600_v9 = vld [vmem:[#allocation6 + $0x1228] sm:$0xff]  ;;  %v1649_v46 = vld [vmem:[#allocation6 + $0x13b0] sm:$0xff] }
  0xc8   : > { %3036 = vmatprep.subr.bf16.mxu0 %v3035_v13  ;;  %v1511_v13 = vsel %vm358_vm1, %v1509_v2, %v1510_v3  ;;  %v2607_v15 = vpack.c.bf16 %v534_v8, %v532_v7  ;;  %v1613_v2 = vld [vmem:[#allocation6 + $0x1290] sm:$0xff]  ;;  %v548_v3 = vld [vmem:[#allocation6 + $0x4a8] sm:$0xff] }
  0xc9   : > { %v584_v47 = vld [vmem:[#allocation6 + $0x5c8] sm:$0xff] }
  0xca   : > { %2590 = vmatpush1.bf16.msra.mxu1 %v2589_v19  ;;  %v3055_v19 = vpack.c.bf16 %v1602_v10, %v1600_v9  ;;  %v2623_v9 = vpack.c.bf16 %v550_v4, %v548_v3  ;;  %v547_v10 = vld [vmem:[#allocation6 + $0x4a0] sm:$0xff] }
  0xcb   : > { %3038 = vmatpush1.bf16.msra.mxu0 %v3037_v20  ;;  %2592 = vmatprep.subr.bf16.mxu1 %v2591_v21  ;;  %v1601_v20 = vld [vmem:[#allocation6 + $0x1230] sm:$0xff]  ;;  %v536_v21 = vld [vmem:[#allocation6 + $0x448] sm:$0xff] }
  0xcc   : > { %3040 = vmatprep.subr.bf16.mxu0 %v3039_v25  ;;  %v2609_v25 = vpack.c.bf16 %v533_v17, %v531_v16  ;;  %v3057_v26 = vpack.c.bf16 %v1601_v20, %v1599_v18  ;;  %v2611_v27 = vpack.c.bf16 %v538_v22, %v536_v21  ;;  %v554_v16 = vld [vmem:[#allocation6 + $0x4d8] sm:$0xff]  ;;  %v1620_v17 = vld [vmem:[#allocation6 + $0x12c8] sm:$0xff]  ;;  %v551_v22 = vld [vmem:[#allocation6 + $0x4c0] sm:$0xff] }
  0xcd   : > { %v1622_v18 = vld [vmem:[#allocation6 + $0x12d8] sm:$0xff] }
  0xce   : > { %2594 = vmatpush1.bf16.msra.mxu1 %v2593_v31  ;;  %v3059_v31 = vpack.c.bf16 %v1606_v24, %v1604_v23  ;;  %v553_v23 = vld [vmem:[#allocation6 + $0x4d0] sm:$0xff]  ;;  %v1619_v24 = vld [vmem:[#allocation6 + $0x12c0] sm:$0xff] }
  0xcf   : > { %3042 = vmatpush1.bf16.msra.mxu0 %v3041_v32  ;;  %2596 = vmatprep.subr.bf16.mxu1 %v2595_v33  ;;  %v1605_v32 = vld [vmem:[#allocation6 + $0x1250] sm:$0xff]  ;;  %v540_v33 = vld [vmem:[#allocation6 + $0x468] sm:$0xff] }
  0xd0   : > { %3044 = vmatprep.subr.bf16.mxu0 %v3043_v37  ;;  %v539_v37 = vld [vmem:[#allocation6 + $0x460] sm:$0xff]  ;;  %v3061_v42 = vpack.c.bf16 %v1605_v32, %v1603_v30  ;;  %v2615_v43 = vpack.c.bf16 %v542_v34, %v540_v33  ;;  %v1626_v30 = vld [vmem:[#allocation6 + $0x12f8] sm:$0xff] }
  0xd1   : > { %v2617_v58 = vpack.c.bf16 %v541_v39, %v539_v37  ;;  %v555_v34 = vld [vmem:[#allocation6 + $0x4e0] sm:$0xff]  ;;  %v3079_v37 = vpack.c.bf16 %v1626_v30, %v1624_v29  ;;  %v560_v39 = vld [vmem:[#allocation6 + $0x508] sm:$0xff] }
  0xd2   : > { %2598 = vmatpush1.bf16.msra.mxu1 %v2597_v44  ;;  %v1607_v44 = vld [vmem:[#allocation6 + $0x1260] sm:$0xff] }
  0xd3   : > { %3046 = vmatpush1.bf16.msra.mxu0 %v3045_v48  ;;  %2600 = vmatprep.subr.bf16.mxu1 %v2599_v49  ;;  %v1591_v48 = vld [vmem:[#allocation2 + $0x38] sm:$0x80]  ;;  %v3063_v49 = vpack.c.bf16 %v1610_v36, %v1608_v35  ;;  %v557_v35 = vld [vmem:[#allocation6 + $0x4f0] sm:$0xff]  ;;  %v1623_v36 = vld [vmem:[#allocation6 + $0x12e0] sm:$0xff] }
  0xd4   : > { %3048 = vmatprep.subr.bf16.mxu0 %v3047_v53  ;;  %v1666_v53 = vrot.slane %v1591_v48, 7  ;;  %v1627_v48 = vld [vmem:[#allocation6 + $0x1300] sm:$0xff] }
  0xd5   : > { %v575_v30 = vld [vmem:[#allocation6 + $0x580] sm:$0xff] }
  0xd6   : > { %2602 = vmatpush1.bf16.msra.mxu1 %v2601_v59  ;;  %v3065_v59 = vpack.c.bf16 %v1609_v45, %v1607_v44  ;;  %v1668_v0 = vsel %vm595_vm2, %v1666_v53, %v1667_v57  ;;  %v2635_v45 = vpack.c.bf16 %v562_v40, %v560_v39  ;;  %v1632_v53 = vld [vmem:[#allocation6 + $0x1328] sm:$0xff]  ;;  %v2639_v57 = vpack.c.bf16 %v566_v52, %v564_v51 }
  0xd7   : > { %3050 = vmatpush1.bf16.msra.mxu0 %v3049_v62  ;;  %2604 = vmatprep.subr.bf16.mxu1 %v2603_v63  ;;  %v545_v62 = vld [vmem:[#allocation6 + $0x490] sm:$0xff]  ;;  %v1611_v63 = vld [vmem:[#allocation6 + $0x1280] sm:$0xff] }
  0xd8   : > { %3052 = vmatprep.subr.bf16.mxu0 %v3051_v5  ;;  %v1616_v5 = vld [vmem:[#allocation6 + $0x12a8] sm:$0xff]  ;;  %v2621_v7 = vpack.c.bf16 %v545_v62, %v543_v61  ;;  %v3069_v8 = vpack.c.bf16 %v1613_v2, %v1611_v63  ;;  %v3087_v61 = vpack.c.bf16 %v1634_v54, %v1632_v53  ;;  %v1633_v62 = vld [vmem:[#allocation6 + $0x1330] sm:$0xff]  ;;  %v1638_v2 = vld [vmem:[#allocation6 + $0x1358] sm:$0xff] }
  0xd9   : > { %516 = vmatmul.mubr.f32.vlgmr.msra.gmra.mrb[0].mxu1 %v445_v11  ;;  %v549_v11 = vld [vmem:[#allocation6 + $0x4b0] sm:$0xff]  ;;  %v568_v63 = vld [vmem:[#allocation6 + $0x548] sm:$0xff]  ;;  %v583_v54 = vld [vmem:[#allocation6 + $0x5c0] sm:$0xff] }
  0xda   : > { %2606 = vmatpush1.bf16.msra.mxu1 %v2605_v12  ;;  %1582 = vmatmul.mubr.f32.vlgmr.msra.gmra.mrb[0].mxu0 %v1511_v13  ;;  %v1615_v12 = vld [vmem:[#allocation6 + $0x12a0] sm:$0xff]  ;;  %v3071_v13 = vpack.c.bf16 %v1618_v6, %v1616_v5 }
  0xdb   : > { %3054 = vmatpush1.bf16.msra.mxu0 %v3053_v14  ;;  %2608 = vmatprep.subr.bf16.mxu1 %v2607_v15  ;;  %v1617_v14 = vld [vmem:[#allocation6 + $0x12b0] sm:$0xff]  ;;  %v552_v15 = vld [vmem:[#allocation6 + $0x4c8] sm:$0xff]  ;;  %v567_v6 = vld [vmem:[#allocation6 + $0x540] sm:$0xff] }
  0xdc   : > { %3056 = vmatprep.subr.bf16.mxu0 %v3055_v19  ;;  %668 = vmatprep.mubr.f32.mxu1 %v601_v56  ;;  %v2625_v19 = vpack.c.bf16 %v549_v11, %v547_v10  ;;  %v3073_v20 = vpack.c.bf16 %v1617_v14, %v1615_v12  ;;  %v2627_v21 = vpack.c.bf16 %v554_v16, %v552_v15  ;;  %v1637_v10 = vld [vmem:[#allocation6 + $0x1350] sm:$0xff]  ;;  %v572_v11 = vld [vmem:[#allocation6 + $0x568] sm:$0xff]  ;;  %v574_v12 = vld [vmem:[#allocation6 + $0x578] sm:$0xff] }
  0xdd   : > { %1735 = vmatprep.mubr.f32.mxu0 %v1668_v0  ;;  %v3085_v56 = vpack.c.bf16 %v1629_v50, %v1627_v48  ;;  %v570_v0 = vld [vmem:[#allocation6 + $0x558] sm:$0xff] }
  0xde   : > { %2610 = vmatpush1.bf16.msra.mxu1 %v2609_v25  ;;  %v3075_v25 = vpack.c.bf16 %v1622_v18, %v1620_v17  ;;  %v2643_v5 = vpack.c.bf16 %v570_v0, %v568_v63  ;;  %v1642_v14 = vld [vmem:[#allocation6 + $0x1378] sm:$0xff]  ;;  %v2647_v17 = vpack.c.bf16 %v574_v12, %v572_v11  ;;  %v571_v18 = vld [vmem:[#allocation6 + $0x560] sm:$0xff]  ;;  %v1590_v11 = vld [vmem:[#allocation2 + $0x30] sm:$0x80] }
  0xdf   : > { %3058 = vmatpush1.bf16.msra.mxu0 %v3057_v26  ;;  %2612 = vmatprep.subr.bf16.mxu1 %v2611_v27  ;;  %v1621_v26 = vld [vmem:[#allocation6 + $0x12d0] sm:$0xff]  ;;  %v556_v27 = vld [vmem:[#allocation6 + $0x4e8] sm:$0xff]  ;;  %v586_v48 = vld [vmem:[#allocation6 + $0x5d8] sm:$0xff] }
  0xe0   : > { %3060 = vmatprep.subr.bf16.mxu0 %v3059_v31  ;;  %v2629_v31 = vpack.c.bf16 %v553_v23, %v551_v22  ;;  %v3077_v32 = vpack.c.bf16 %v1621_v26, %v1619_v24  ;;  %v2631_v33 = vpack.c.bf16 %v558_v28, %v556_v27  ;;  %v1641_v22 = vld [vmem:[#allocation6 + $0x1370] sm:$0xff]  ;;  %v576_v23 = vld [vmem:[#allocation6 + $0x588] sm:$0xff]  ;;  %v578_v24 = vld [vmem:[#allocation6 + $0x598] sm:$0xff]  ;;  %v2659_v53 = vpack.c.bf16 %v586_v48, %v584_v47 }
  0xe1   : > { %v1646_v26 = vld [vmem:[#allocation6 + $0x1398] sm:$0xff]  ;;  %v2651_v29 = vpack.c.bf16 %v578_v24, %v576_v23  ;;  %v587_v63 = vld [vmem:[#allocation6 + $0x5e0] sm:$0xff]  ;;  %v1745_v47 = vld [vmem:[#allocation2 + $0x48] sm:$0xff] }
  0xe2   : > { %2614 = vmatpush1.bf16.msra.mxu1 %v2613_v38  ;;  %v1625_v38 = vld [vmem:[#allocation6 + $0x12f0] sm:$0xff]  ;;  %v1654_v50 = vld [vmem:[#allocation6 + $0x13d8] sm:$0xff]  ;;  %v1592_v12 = vld [vmem:[#allocation2 + $0x40] sm:$0x7f] }
  0xe3   : > { %3062 = vmatpush1.bf16.msra.mxu0 %v3061_v42  ;;  %2616 = vmatprep.subr.bf16.mxu1 %v2615_v43  ;;  %v1630_v42 = vld [vmem:[#allocation6 + $0x1318] sm:$0xff]  ;;  %v2633_v43 = vpack.c.bf16 %v557_v35, %v555_v34  ;;  %v3081_v44 = vpack.c.bf16 %v1625_v38, %v1623_v36  ;;  %v1645_v34 = vld [vmem:[#allocation6 + $0x1390] sm:$0xff]  ;;  %v580_v35 = vld [vmem:[#allocation6 + $0x5a8] sm:$0xff]  ;;  %v1664_v23 = vrot.slane %v1592_v12, 7 }
  0xe4   : > { %3064 = vmatprep.subr.bf16.mxu0 %v3063_v49  ;;  %v3083_v49 = vpack.c.bf16 %v1630_v42, %v1628_v41  ;;  %v582_v36 = vld [vmem:[#allocation6 + $0x5b8] sm:$0xff]  ;;  %v579_v42 = vld [vmem:[#allocation6 + $0x5a0] sm:$0xff] }
  0xe5   : > { %v1650_v38 = vld [vmem:[#allocation6 + $0x13b8] sm:$0xff]  ;;  %v2655_v41 = vpack.c.bf16 %v582_v36, %v580_v35  ;;  %v1747_v24 = vld [vmem:[#allocation6 + $0x1400] sm:$0xff] }
  0xe6   : > { %2618 = vmatpush1.bf16.msra.mxu1 %v2617_v58  ;;  %v563_v58 = vld [vmem:[#allocation6 + $0x520] sm:$0xff] }
  0xe7   : > { %3066 = vmatpush1.bf16.msra.mxu0 %v3065_v59  ;;  %2620 = vmatprep.subr.bf16.mxu1 %v2619_v60  ;;  %v565_v59 = vld [vmem:[#allocation6 + $0x530] sm:$0xff]  ;;  %v1631_v60 = vld [vmem:[#allocation6 + $0x1320] sm:$0xff] }
  0xe8   : > { %3068 = vmatprep.subr.bf16.mxu0 %v3067_v1  ;;  %v1636_v1 = vld [vmem:[#allocation6 + $0x1348] sm:$0xff]  ;;  %v2641_v3 = vpack.c.bf16 %v565_v59, %v563_v58  ;;  %v3089_v4 = vpack.c.bf16 %v1633_v62, %v1631_v60  ;;  %v1653_v58 = vld [vmem:[#allocation6 + $0x13d0] sm:$0xff]  ;;  %v590_v60 = vld [vmem:[#allocation6 + $0x5f8] sm:$0xff] }
  0xe9   : > { %v588_v59 = vld [vmem:[#allocation6 + $0x5e8] sm:$0xff]  ;;  %v1658_v62 = vld [vmem:[#allocation6 + $0x13f8] sm:$0xff]  ;;  %v684_v36 = vld [vmem:[#allocation6 + $0x620] sm:$0xff] }
  0xea   : > { %2622 = vmatpush1.bf16.msra.mxu1 %v2621_v7  ;;  %v569_v7 = vld [vmem:[#allocation6 + $0x550] sm:$0xff]  ;;  %v1763_v12 = vld [vmem:[#allocation6 + $0x1480] sm:$0xff] }
  0xeb   : > { %3070 = vmatpush1.bf16.msra.mxu0 %v3069_v8  ;;  %2624 = vmatprep.subr.bf16.mxu1 %v2623_v9  ;;  %v1635_v8 = vld [vmem:[#allocation6 + $0x1340] sm:$0xff]  ;;  %v3091_v9 = vpack.c.bf16 %v1638_v2, %v1636_v1  ;;  %v2645_v15 = vpack.c.bf16 %v569_v7, %v567_v6  ;;  %v589_v1 = vld [vmem:[#allocation6 + $0x5f0] sm:$0xff]  ;;  %v681_v6 = vld [vmem:[#allocation6 + $0x608] sm:$0xff] }
  0xec   : > { %3072 = vmatprep.subr.bf16.mxu0 %v3071_v13  ;;  %v1640_v13 = vld [vmem:[#allocation6 + $0x1368] sm:$0xff]  ;;  %v3093_v16 = vpack.c.bf16 %v1637_v10, %v1635_v8  ;;  %v1655_v2 = vld [vmem:[#allocation6 + $0x13e0] sm:$0xff]  ;;  %v524_v8 = vld [vmem:[#allocation2 + $0x10] sm:$0x7f] }
  0xed   : > { %v522_v7 = vld [vmem:[#allocation2] sm:$0x80]  ;;  %v683_v10 = vld [vmem:[#allocation6 + $0x618] sm:$0xff] }
  0xee   : > { %2626 = vmatpush1.bf16.msra.mxu1 %v2625_v19  ;;  %v573_v19 = vld [vmem:[#allocation6 + $0x570] sm:$0xff] }
  0xef   : > { %3074 = vmatpush1.bf16.msra.mxu0 %v3073_v20  ;;  %2628 = vmatprep.subr.bf16.mxu1 %v2627_v21  ;;  %v1639_v20 = vld [vmem:[#allocation6 + $0x1360] sm:$0xff]  ;;  %v3095_v21 = vpack.c.bf16 %v1642_v14, %v1640_v13  ;;  %v2649_v27 = vpack.c.bf16 %v573_v19, %v571_v18  ;;  %v1748_v13 = vld [vmem:[#allocation6 + $0x1408] sm:$0xff]  ;;  %v1750_v14 = vld [vmem:[#allocation6 + $0x1418] sm:$0xff]  ;;  %v2667_v19 = vpack.c.bf16 %v683_v10, %v681_v6 }
  0xf0   : > { %3076 = vmatprep.subr.bf16.mxu0 %v3075_v25  ;;  %v1644_v25 = vld [vmem:[#allocation6 + $0x1388] sm:$0xff]  ;;  %v3097_v28 = vpack.c.bf16 %v1641_v22, %v1639_v20  ;;  %v680_v20 = vld [vmem:[#allocation6 + $0x600] sm:$0xff]  ;;  %v1663_v22 = vrot.slane %v1590_v11, 7  ;;  %v1766_v6 = vld [vmem:[#allocation6 + $0x1498] sm:$0xff] }
  0xf1   : > { %v696_v10 = vld [vmem:[#allocation6 + $0x680] sm:$0xff]  ;;  %v698_v11 = vld [vmem:[#allocation6 + $0x690] sm:$0xff] }
  0xf2   : > { %2630 = vmatpush1.bf16.msra.mxu1 %v2629_v31  ;;  %v577_v31 = vld [vmem:[#allocation6 + $0x590] sm:$0xff] }
  0xf3   : > { %3078 = vmatpush1.bf16.msra.mxu0 %v3077_v32  ;;  %2632 = vmatprep.subr.bf16.mxu1 %v2631_v33  ;;  %v1643_v32 = vld [vmem:[#allocation6 + $0x1380] sm:$0xff]  ;;  %v3099_v33 = vpack.c.bf16 %v1646_v26, %v1644_v25  ;;  %v2653_v39 = vpack.c.bf16 %v577_v31, %v575_v30  ;;  %v3115_v25 = vpack.c.bf16 %v1750_v14, %v1748_v13  ;;  %v1749_v26 = vld [vmem:[#allocation6 + $0x1410] sm:$0xff]  ;;  %v1754_v30 = vld [vmem:[#allocation6 + $0x1438] sm:$0xff] }
  0xf4   : > { %3080 = vmatprep.subr.bf16.mxu0 %v3079_v37  ;;  %v1648_v37 = vld [vmem:[#allocation6 + $0x13a8] sm:$0xff]  ;;  %v3101_v40 = vpack.c.bf16 %v1645_v34, %v1643_v32  ;;  %v3117_v34 = vpack.c.bf16 %v1749_v26, %v1747_v24  ;;  %v1765_v14 = vld [vmem:[#allocation6 + $0x1490] sm:$0xff]  ;;  %v1767_v24 = vld [vmem:[#allocation6 + $0x14a0] sm:$0xff] }
  0xf5   : > { %v1769_v26 = vld [vmem:[#allocation6 + $0x14b0] sm:$0xff] }
  0xf6   : > { %2634 = vmatpush1.bf16.msra.mxu1 %v2633_v43  ;;  %v581_v43 = vld [vmem:[#allocation6 + $0x5b0] sm:$0xff] }
  0xf7   : > { %3082 = vmatpush1.bf16.msra.mxu0 %v3081_v44  ;;  %2636 = vmatprep.subr.bf16.mxu1 %v2635_v45  ;;  %v1647_v44 = vld [vmem:[#allocation6 + $0x13a0] sm:$0xff]  ;;  %v3103_v45 = vpack.c.bf16 %v1650_v38, %v1648_v37  ;;  %v2657_v51 = vpack.c.bf16 %v581_v43, %v579_v42  ;;  %v686_v37 = vld [vmem:[#allocation6 + $0x630] sm:$0xff]  ;;  %v691_v42 = vld [vmem:[#allocation6 + $0x658] sm:$0xff] }
  0xf8   : > { %3084 = vmatprep.subr.bf16.mxu0 %v3083_v49  ;;  %v1652_v49 = vld [vmem:[#allocation6 + $0x13c8] sm:$0xff]  ;;  %v3105_v52 = vpack.c.bf16 %v1649_v46, %v1647_v44  ;;  %v1751_v38 = vld [vmem:[#allocation6 + $0x1420] sm:$0xff]  ;;  %v1758_v44 = vld [vmem:[#allocation6 + $0x1458] sm:$0xff]  ;;  %v2673_v46 = vpack.c.bf16 %v686_v37, %v684_v36 }
  0xf9   : > { %v1756_v43 = vld [vmem:[#allocation6 + $0x1448] sm:$0xff]  ;;  %v1771_v36 = vld [vmem:[#allocation6 + $0x14c0] sm:$0xff] }
  0xfa   : > { %2638 = vmatpush1.bf16.msra.mxu1 %v2637_v55  ;;  %v585_v55 = vld [vmem:[#allocation6 + $0x5d0] sm:$0xff] }
  0xfb   : > { %3086 = vmatpush1.bf16.msra.mxu0 %v3085_v56  ;;  %2640 = vmatprep.subr.bf16.mxu1 %v2639_v57  ;;  %v1651_v56 = vld [vmem:[#allocation6 + $0x13c0] sm:$0xff]  ;;  %v3107_v57 = vpack.c.bf16 %v1654_v50, %v1652_v49  ;;  %v2661_v0 = vpack.c.bf16 %v585_v55, %v583_v54  ;;  %v1757_v54 = vld [vmem:[#allocation6 + $0x1450] sm:$0xff]  ;;  %v693_v55 = vld [vmem:[#allocation6 + $0x668] sm:$0xff] }
  0xfc   : > { %3088 = vmatprep.subr.bf16.mxu0 %v3087_v61  ;;  %v1656_v61 = vld [vmem:[#allocation6 + $0x13e8] sm:$0xff]  ;;  %v688_v50 = vld [vmem:[#allocation6 + $0x640] sm:$0xff] }
  0xfe   : > { %2642 = vmatpush1.bf16.msra.mxu1 %v2641_v3  ;;  %v1657_v3 = vld [vmem:[#allocation6 + $0x13f0] sm:$0xff] }
  0xff   : > { %3090 = vmatpush1.bf16.msra.mxu0 %v3089_v4  ;;  %2644 = vmatprep.subr.bf16.mxu1 %v2643_v5  ;;  %v3109_v4 = vpack.c.bf16 %v1653_v58, %v1651_v56  ;;  %v2663_v5 = vpack.c.bf16 %v590_v60, %v588_v59  ;;  %v3113_v18 = vpack.c.bf16 %v1657_v3, %v1655_v2  ;;  %v695_v56 = vld [vmem:[#allocation6 + $0x678] sm:$0xff]  ;;  %v1761_v2 = vld [vmem:[#allocation6 + $0x1470] sm:$0xff]  ;;  %v697_v3 = vld [vmem:[#allocation6 + $0x688] sm:$0xff] }
 0x100   : > { %3092 = vmatprep.subr.bf16.mxu0 %v3091_v9  ;;  %v3111_v9 = vpack.c.bf16 %v1658_v62, %v1656_v61  ;;  %v1762_v58 = vld [vmem:[#allocation6 + $0x1478] sm:$0xff]  ;;  %v2679_v61 = vpack.c.bf16 %v695_v56, %v693_v55  ;;  %v692_v62 = vld [vmem:[#allocation6 + $0x660] sm:$0xff] }
 0x102   : > { %2646 = vmatpush1.bf16.msra.mxu1 %v2645_v15  ;;  %v2665_v15 = vpack.c.bf16 %v589_v1, %v587_v63  ;;  %v694_v63 = vld [vmem:[#allocation6 + $0x670] sm:$0xff] }
 0x103   : > { %3094 = vmatpush1.bf16.msra.mxu0 %v3093_v16  ;;  %2648 = vmatprep.subr.bf16.mxu1 %v2647_v17  ;;  %v596_v16 = vrot.slane %v522_v7, 7  ;;  %v597_v17 = vrot.slane %v524_v8, 7  ;;  %v2681_v7 = vpack.c.bf16 %v694_v63, %v692_v62  ;;  %v1781_v62 = vld [vmem:[#allocation6 + $0x1510] sm:$0xff]  ;;  %v717_v63 = vld [vmem:[#allocation6 + $0x728] sm:$0xff] }
 0x104   : > { %3096 = vmatprep.subr.bf16.mxu0 %v3095_v21  ;;  %v682_v21 = vld [vmem:[#allocation6 + $0x610] sm:$0xff] }
 0x105   : > { %v598_v31 = vsel %vm595_vm2, %v596_v16, %v597_v17  ;;  %v2669_v32 = vpack.c.bf16 %v682_v21, %v680_v20  ;;  %v703_v16 = vld [vmem:[#allocation6 + $0x6b8] sm:$0xff]  ;;  %v1768_v17 = vld [vmem:[#allocation6 + $0x14a8] sm:$0xff]  ;;  %v3133_v20 = vpack.c.bf16 %v1765_v14, %v1763_v12 }
 0x106   : > { %2650 = vmatpush1.bf16.msra.mxu1 %v2649_v27  ;;  %v685_v27 = vld [vmem:[#allocation6 + $0x628] sm:$0xff]  ;;  %v723_v12 = vld [vmem:[#allocation6 + $0x758] sm:$0xff] }
 0x107   : > { %3098 = vmatpush1.bf16.msra.mxu0 %v3097_v28  ;;  %2652 = vmatprep.subr.bf16.mxu1 %v2651_v29  ;;  %v687_v28 = vld [vmem:[#allocation6 + $0x638] sm:$0xff]  ;;  %v1752_v29 = vld [vmem:[#allocation6 + $0x1428] sm:$0xff] }
 0x108   : > { %3100 = vmatprep.subr.bf16.mxu0 %v3099_v33  ;;  %v1665_v33 = vsel %vm595_vm2, %v1663_v22, %v1664_v23  ;;  %v2671_v35 = vpack.c.bf16 %v687_v28, %v685_v27  ;;  %v700_v22 = vld [vmem:[#allocation6 + $0x6a0] sm:$0xff]  ;;  %v702_v23 = vld [vmem:[#allocation6 + $0x6b0] sm:$0xff]  ;;  %v705_v27 = vld [vmem:[#allocation6 + $0x6c8] sm:$0xff] }
 0x109   : > { %v707_v28 = vld [vmem:[#allocation6 + $0x6d8] sm:$0xff] }
 0x10a   : > { %2654 = vmatpush1.bf16.msra.mxu1 %v2653_v39  ;;  %v3119_v39 = vpack.c.bf16 %v1754_v30, %v1752_v29  ;;  %v1772_v29 = vld [vmem:[#allocation6 + $0x14c8] sm:$0xff]  ;;  %v1774_v30 = vld [vmem:[#allocation6 + $0x14d8] sm:$0xff] }
 0x10b   : > { %3102 = vmatpush1.bf16.msra.mxu0 %v3101_v40  ;;  %2656 = vmatprep.subr.bf16.mxu1 %v2655_v41  ;;  %v1753_v40 = vld [vmem:[#allocation6 + $0x1430] sm:$0xff]  ;;  %v689_v41 = vld [vmem:[#allocation6 + $0x648] sm:$0xff]  ;;  %v3139_v37 = vpack.c.bf16 %v1774_v30, %v1772_v29  ;;  %v1790_v14 = vld [vmem:[#allocation6 + $0x1558] sm:$0xff] }
 0x10c   : > { %3104 = vmatprep.subr.bf16.mxu0 %v3103_v45  ;;  %v678_v45 = vld [vmem:[#allocation2 + $0x18] sm:$0xff]  ;;  %v3121_v48 = vpack.c.bf16 %v1753_v40, %v1751_v38  ;;  %v2675_v49 = vpack.c.bf16 %v691_v42, %v689_v41  ;;  %v1773_v38 = vld [vmem:[#allocation6 + $0x14d0] sm:$0xff]  ;;  %v1776_v41 = vld [vmem:[#allocation6 + $0x14e8] sm:$0xff] }
 0x10d   : > { %v711_v40 = vld [vmem:[#allocation6 + $0x6f8] sm:$0xff]  ;;  %v724_v30 = vld [vmem:[#allocation6 + $0x760] sm:$0xff] }
 0x10e   : > { %2658 = vmatpush1.bf16.msra.mxu1 %v2657_v51  ;;  %v690_v51 = vld [vmem:[#allocation6 + $0x650] sm:$0xff]  ;;  %v1778_v42 = vld [vmem:[#allocation6 + $0x14f8] sm:$0xff] }
 0x10f   : > { %3106 = vmatpush1.bf16.msra.mxu0 %v3105_v52  ;;  %2660 = vmatprep.subr.bf16.mxu1 %v2659_v53  ;;  %v1755_v52 = vld [vmem:[#allocation6 + $0x1440] sm:$0xff]  ;;  %v3123_v53 = vpack.c.bf16 %v1758_v44, %v1756_v43  ;;  %v2677_v59 = vpack.c.bf16 %v690_v51, %v688_v50  ;;  %v3141_v44 = vpack.c.bf16 %v1773_v38, %v1771_v36  ;;  %v1777_v50 = vld [vmem:[#allocation6 + $0x14f0] sm:$0xff]  ;;  %v713_v51 = vld [vmem:[#allocation6 + $0x708] sm:$0xff] }
 0x110   : > { %3108 = vmatprep.subr.bf16.mxu0 %v3107_v57  ;;  %v1760_v57 = vld [vmem:[#allocation6 + $0x1468] sm:$0xff]  ;;  %v3125_v60 = vpack.c.bf16 %v1757_v54, %v1755_v52  ;;  %v715_v52 = vld [vmem:[#allocation6 + $0x718] sm:$0xff] }
 0x111   : > { %v3127_v1 = vpack.c.bf16 %v1762_v58, %v1760_v57  ;;  %v1782_v54 = vld [vmem:[#allocation6 + $0x1518] sm:$0xff]  ;;  %v2699_v57 = vpack.c.bf16 %v715_v52, %v713_v51  ;;  %v712_v58 = vld [vmem:[#allocation6 + $0x700] sm:$0xff] }
 0x112   : > { %2662 = vmatpush1.bf16.msra.mxu1 %v2661_v0  ;;  %v1759_v0 = vld [vmem:[#allocation6 + $0x1460] sm:$0xff]  ;;  %v731_v36 = vld [vmem:[#allocation6 + $0x798] sm:$0xff] }
 0x113   : > { %3110 = vmatpush1.bf16.msra.mxu0 %v3109_v4  ;;  %2664 = vmatprep.subr.bf16.mxu1 %v2663_v5  ;;  %v699_v4 = vld [vmem:[#allocation6 + $0x698] sm:$0xff]  ;;  %v1764_v5 = vld [vmem:[#allocation6 + $0x1488] sm:$0xff]  ;;  %v3129_v8 = vpack.c.bf16 %v1761_v2, %v1759_v0 }
 0x114   : > { %3112 = vmatprep.subr.bf16.mxu0 %v3111_v9  ;;  %v2683_v9 = vpack.c.bf16 %v699_v4, %v697_v3  ;;  %v3131_v13 = vpack.c.bf16 %v1766_v6, %v1764_v5  ;;  %v719_v0 = vld [vmem:[#allocation6 + $0x738] sm:$0xff]  ;;  %v716_v6 = vld [vmem:[#allocation6 + $0x720] sm:$0xff] }
 0x115   : > { %v1786_v2 = vld [vmem:[#allocation6 + $0x1538] sm:$0xff]  ;;  %v2703_v5 = vpack.c.bf16 %v719_v0, %v717_v63 }
 0x116   : > { %2666 = vmatpush1.bf16.msra.mxu1 %v2665_v15  ;;  %v701_v15 = vld [vmem:[#allocation6 + $0x6a8] sm:$0xff]  ;;  %v1798_v38 = vld [vmem:[#allocation6 + $0x1598] sm:$0xff] }
 0x117   : > { %3114 = vmatpush1.bf16.msra.mxu0 %v3113_v18  ;;  %2668 = vmatprep.subr.bf16.mxu1 %v2667_v19  ;;  %v1770_v18 = vld [vmem:[#allocation6 + $0x14b8] sm:$0xff]  ;;  %v2685_v19 = vpack.c.bf16 %v698_v11, %v696_v10  ;;  %v2687_v21 = vpack.c.bf16 %v703_v16, %v701_v15  ;;  %v1785_v10 = vld [vmem:[#allocation6 + $0x1530] sm:$0xff]  ;;  %v721_v11 = vld [vmem:[#allocation6 + $0x748] sm:$0xff] }
 0x118   : > { %3116 = vmatprep.subr.bf16.mxu0 %v3115_v25  ;;  %v3135_v25 = vpack.c.bf16 %v1770_v18, %v1768_v17  ;;  %v2707_v17 = vpack.c.bf16 %v723_v12, %v721_v11  ;;  %v720_v18 = vld [vmem:[#allocation6 + $0x740] sm:$0xff] }
 0x119   : > { %669 = vmatmul.mubr.f32.vlgmr.msra.gmra.mrb[0].mxu1 %v598_v31  ;;  %v2689_v31 = vpack.c.bf16 %v702_v23, %v700_v22  ;;  %v1789_v22 = vld [vmem:[#allocation6 + $0x1550] sm:$0xff]  ;;  %v725_v23 = vld [vmem:[#allocation6 + $0x768] sm:$0xff] }
 0x11a   : > { %2670 = vmatpush1.bf16.msra.mxu1 %v2669_v32  ;;  %1736 = vmatmul.mubr.f32.vlgmr.msra.gmra.mrb[0].mxu0 %v1665_v33  ;;  %v3137_v32 = vpack.c.bf16 %v1769_v26, %v1767_v24  ;;  %v2691_v33 = vpack.c.bf16 %v707_v28, %v705_v27  ;;  %v727_v24 = vld [vmem:[#allocation6 + $0x778] sm:$0xff] }
 0x11b   : > { %3118 = vmatpush1.bf16.msra.mxu0 %v3117_v34  ;;  %2672 = vmatprep.subr.bf16.mxu1 %v2671_v35  ;;  %v704_v34 = vld [vmem:[#allocation6 + $0x6c0] sm:$0xff]  ;;  %v706_v35 = vld [vmem:[#allocation6 + $0x6d0] sm:$0xff]  ;;  %v1794_v26 = vld [vmem:[#allocation6 + $0x1578] sm:$0xff]  ;;  %v2711_v29 = vpack.c.bf16 %v727_v24, %v725_v23 }
 0x11c   : > { %3120 = vmatprep.subr.bf16.mxu0 %v3119_v39  ;;  %808 = vmatprep.mubr.f32.mxu1 %v678_v45  ;;  %v709_v39 = vld [vmem:[#allocation6 + $0x6e8] sm:$0xff]  ;;  %v2693_v43 = vpack.c.bf16 %v706_v35, %v704_v34  ;;  %v1793_v34 = vld [vmem:[#allocation6 + $0x1570] sm:$0xff]  ;;  %v822_v23 = vld [vmem:[#allocation6 + $0x800] sm:$0xff] }
 0x11d   : > { %1875 = vmatprep.mubr.f32.mxu0 %v1745_v47  ;;  %v2695_v45 = vpack.c.bf16 %v711_v40, %v709_v39  ;;  %v710_v47 = vld [vmem:[#allocation6 + $0x6f0] sm:$0xff]  ;;  %v729_v35 = vld [vmem:[#allocation6 + $0x788] sm:$0xff] }
 0x11e   : > { %2674 = vmatpush1.bf16.msra.mxu1 %v2673_v46  ;;  %v708_v46 = vld [vmem:[#allocation6 + $0x6e0] sm:$0xff] }
 0x11f   : > { %3122 = vmatpush1.bf16.msra.mxu0 %v3121_v48  ;;  %2676 = vmatprep.subr.bf16.mxu1 %v2675_v49  ;;  %v1775_v48 = vld [vmem:[#allocation6 + $0x14e0] sm:$0xff]  ;;  %v3143_v49 = vpack.c.bf16 %v1778_v42, %v1776_v41  ;;  %v2697_v55 = vpack.c.bf16 %v710_v47, %v708_v46  ;;  %v2715_v41 = vpack.c.bf16 %v731_v36, %v729_v35  ;;  %v1797_v46 = vld [vmem:[#allocation6 + $0x1590] sm:$0xff]  ;;  %v733_v47 = vld [vmem:[#allocation6 + $0x7a8] sm:$0xff] }
 0x120   : > { %3124 = vmatprep.subr.bf16.mxu0 %v3123_v53  ;;  %v1780_v53 = vld [vmem:[#allocation6 + $0x1508] sm:$0xff]  ;;  %v3145_v56 = vpack.c.bf16 %v1777_v50, %v1775_v48  ;;  %v728_v42 = vld [vmem:[#allocation6 + $0x780] sm:$0xff]  ;;  %v735_v48 = vld [vmem:[#allocation6 + $0x7b8] sm:$0xff] }
 0x121   : > { %v1802_v50 = vld [vmem:[#allocation6 + $0x15b8] sm:$0xff]  ;;  %v827_v35 = vld [vmem:[#allocation6 + $0x828] sm:$0xff] }
 0x122   : > { %2678 = vmatpush1.bf16.msra.mxu1 %v2677_v59  ;;  %v714_v59 = vld [vmem:[#allocation6 + $0x710] sm:$0xff]  ;;  %v829_v36 = vld [vmem:[#allocation6 + $0x838] sm:$0xff] }
 0x123   : > { %3126 = vmatpush1.bf16.msra.mxu0 %v3125_v60  ;;  %2680 = vmatprep.subr.bf16.mxu1 %v2679_v61  ;;  %v1779_v60 = vld [vmem:[#allocation6 + $0x1500] sm:$0xff]  ;;  %v3147_v61 = vpack.c.bf16 %v1782_v54, %v1780_v53  ;;  %v2701_v3 = vpack.c.bf16 %v714_v59, %v712_v58  ;;  %v2719_v53 = vpack.c.bf16 %v735_v48, %v733_v47  ;;  %v1801_v58 = vld [vmem:[#allocation6 + $0x15b0] sm:$0xff]  ;;  %v737_v59 = vld [vmem:[#allocation6 + $0x7c8] sm:$0xff] }
 0x124   : > { %3128 = vmatprep.subr.bf16.mxu0 %v3127_v1  ;;  %v1784_v1 = vld [vmem:[#allocation6 + $0x1528] sm:$0xff]  ;;  %v3149_v4 = vpack.c.bf16 %v1781_v62, %v1779_v60  ;;  %v732_v54 = vld [vmem:[#allocation6 + $0x7a0] sm:$0xff]  ;;  %v739_v60 = vld [vmem:[#allocation6 + $0x7d8] sm:$0xff]  ;;  %v2735_v47 = vpack.c.bf16 %v829_v36, %v827_v35 }
 0x125   : > { %v1806_v62 = vld [vmem:[#allocation6 + $0x15d8] sm:$0xff]  ;;  %v826_v48 = vld [vmem:[#allocation6 + $0x820] sm:$0xff]  ;;  %v844_v35 = vld [vmem:[#allocation6 + $0x8b0] sm:$0xff] }
 0x126   : > { %2682 = vmatpush1.bf16.msra.mxu1 %v2681_v7  ;;  %v718_v7 = vld [vmem:[#allocation6 + $0x730] sm:$0xff]  ;;  %v1909_v36 = vld [vmem:[#allocation6 + $0x16a0] sm:$0xff] }
 0x127   : > { %3130 = vmatpush1.bf16.msra.mxu0 %v3129_v8  ;;  %2684 = vmatprep.subr.bf16.mxu1 %v2683_v9  ;;  %v1783_v8 = vld [vmem:[#allocation6 + $0x1520] sm:$0xff]  ;;  %v3151_v9 = vpack.c.bf16 %v1786_v2, %v1784_v1  ;;  %v2705_v15 = vpack.c.bf16 %v718_v7, %v716_v6  ;;  %v2723_v1 = vpack.c.bf16 %v739_v60, %v737_v59  ;;  %v1805_v6 = vld [vmem:[#allocation6 + $0x15d0] sm:$0xff]  ;;  %v741_v7 = vld [vmem:[#allocation6 + $0x7e8] sm:$0xff] }
 0x128   : > { %3132 = vmatprep.subr.bf16.mxu0 %v3131_v13  ;;  %v1788_v13 = vld [vmem:[#allocation6 + $0x1548] sm:$0xff]  ;;  %v3153_v16 = vpack.c.bf16 %v1785_v10, %v1783_v8  ;;  %v736_v2 = vld [vmem:[#allocation6 + $0x7c0] sm:$0xff]  ;;  %v743_v8 = vld [vmem:[#allocation6 + $0x7f8] sm:$0xff] }
 0x129   : > { %v1810_v10 = vld [vmem:[#allocation6 + $0x15f8] sm:$0xff] }
 0x12a   : > { %2686 = vmatpush1.bf16.msra.mxu1 %v2685_v19  ;;  %v722_v19 = vld [vmem:[#allocation6 + $0x750] sm:$0xff] }
 0x12b   : > { %3134 = vmatpush1.bf16.msra.mxu0 %v3133_v20  ;;  %2688 = vmatprep.subr.bf16.mxu1 %v2687_v21  ;;  %v1787_v20 = vld [vmem:[#allocation6 + $0x1540] sm:$0xff]  ;;  %v3155_v21 = vpack.c.bf16 %v1790_v14, %v1788_v13  ;;  %v2709_v27 = vpack.c.bf16 %v722_v19, %v720_v18  ;;  %v2727_v13 = vpack.c.bf16 %v743_v8, %v741_v7  ;;  %v1809_v18 = vld [vmem:[#allocation6 + $0x15f0] sm:$0xff]  ;;  %v823_v19 = vld [vmem:[#allocation6 + $0x808] sm:$0xff] }
 0x12c   : > { %3136 = vmatprep.subr.bf16.mxu0 %v3135_v25  ;;  %v1792_v25 = vld [vmem:[#allocation6 + $0x1568] sm:$0xff]  ;;  %v3157_v28 = vpack.c.bf16 %v1789_v22, %v1787_v20  ;;  %v740_v14 = vld [vmem:[#allocation6 + $0x7e0] sm:$0xff]  ;;  %v825_v20 = vld [vmem:[#allocation6 + $0x818] sm:$0xff] }
 0x12d   : > { %v1892_v22 = vld [vmem:[#allocation6 + $0x1618] sm:$0xff] }
 0x12e   : > { %2690 = vmatpush1.bf16.msra.mxu1 %v2689_v31  ;;  %v726_v31 = vld [vmem:[#allocation6 + $0x770] sm:$0xff] }
 0x12f   : > { %3138 = vmatpush1.bf16.msra.mxu0 %v3137_v32  ;;  %2692 = vmatprep.subr.bf16.mxu1 %v2691_v33  ;;  %v1791_v32 = vld [vmem:[#allocation6 + $0x1560] sm:$0xff]  ;;  %v3159_v33 = vpack.c.bf16 %v1794_v26, %v1792_v25  ;;  %v2713_v39 = vpack.c.bf16 %v726_v31, %v724_v30  ;;  %v824_v25 = vld [vmem:[#allocation6 + $0x810] sm:$0xff]  ;;  %v818_v26 = vld [vmem:[#allocation2 + $0x18] sm:$0xfe] }
 0x130   : > { %3140 = vmatprep.subr.bf16.mxu0 %v3139_v37  ;;  %v1796_v37 = vld [vmem:[#allocation6 + $0x1588] sm:$0xff]  ;;  %v3161_v40 = vpack.c.bf16 %v1793_v34, %v1791_v32  ;;  %v1889_v30 = vld [vmem:[#allocation6 + $0x1600] sm:$0xff]  ;;  %v1887_v32 = vld [vmem:[#allocation2 + $0x58] sm:$0x1] }
 0x131   : > { %v1885_v31 = vld [vmem:[#allocation2 + $0x48] sm:$0xfe]  ;;  %v1891_v34 = vld [vmem:[#allocation6 + $0x1610] sm:$0xff] }
 0x132   : > { %2694 = vmatpush1.bf16.msra.mxu1 %v2693_v43  ;;  %v730_v43 = vld [vmem:[#allocation6 + $0x790] sm:$0xff] }
 0x133   : > { %3142 = vmatpush1.bf16.msra.mxu0 %v3141_v44  ;;  %2696 = vmatprep.subr.bf16.mxu1 %v2695_v45  ;;  %v1795_v44 = vld [vmem:[#allocation6 + $0x1580] sm:$0xff]  ;;  %v3163_v45 = vpack.c.bf16 %v1798_v38, %v1796_v37  ;;  %v2717_v51 = vpack.c.bf16 %v730_v43, %v728_v42  ;;  %v1894_v37 = vld [vmem:[#allocation6 + $0x1628] sm:$0xff]  ;;  %v1896_v38 = vld [vmem:[#allocation6 + $0x1638] sm:$0xff]  ;;  %v2733_v42 = vpack.c.bf16 %v824_v25, %v822_v23 }
 0x134   : > { %3144 = vmatprep.subr.bf16.mxu0 %v3143_v49  ;;  %v1800_v49 = vld [vmem:[#allocation6 + $0x15a8] sm:$0xff]  ;;  %v3165_v52 = vpack.c.bf16 %v1797_v46, %v1795_v44  ;;  %v1744_v43 = vld [vmem:[#allocation2 + $0x40] sm:$0xff]  ;;  %v1960_v44 = vrot.slane %v1885_v31, 1  ;;  %v3181_v46 = vpack.c.bf16 %v1891_v34, %v1889_v30  ;;  %v840_v23 = vld [vmem:[#allocation6 + $0x890] sm:$0xff] }
 0x135   : > { %v1912_v30 = vld [vmem:[#allocation6 + $0x16b8] sm:$0xff]  ;;  %v842_v34 = vld [vmem:[#allocation6 + $0x8a0] sm:$0xff] }
 0x136   : > { %2698 = vmatpush1.bf16.msra.mxu1 %v2697_v55  ;;  %v734_v55 = vld [vmem:[#allocation6 + $0x7b0] sm:$0xff] }
 0x137   : > { %3146 = vmatpush1.bf16.msra.mxu0 %v3145_v56  ;;  %2700 = vmatprep.subr.bf16.mxu1 %v2699_v57  ;;  %v1799_v56 = vld [vmem:[#allocation6 + $0x15a0] sm:$0xff]  ;;  %v3167_v57 = vpack.c.bf16 %v1802_v50, %v1800_v49  ;;  %v2721_v63 = vpack.c.bf16 %v734_v55, %v732_v54  ;;  %v828_v49 = vld [vmem:[#allocation6 + $0x830] sm:$0xff]  ;;  %v833_v54 = vld [vmem:[#allocation6 + $0x858] sm:$0xff] }
 0x138   : > { %3148 = vmatprep.subr.bf16.mxu0 %v3147_v61  ;;  %v1804_v61 = vld [vmem:[#allocation6 + $0x15c8] sm:$0xff]  ;;  %v3169_v0 = vpack.c.bf16 %v1801_v58, %v1799_v56  ;;  %v1893_v50 = vld [vmem:[#allocation6 + $0x1620] sm:$0xff]  ;;  %v1900_v56 = vld [vmem:[#allocation6 + $0x1658] sm:$0xff]  ;;  %v2737_v58 = vpack.c.bf16 %v828_v49, %v826_v48 }
 0x139   : > { %v1898_v55 = vld [vmem:[#allocation6 + $0x1648] sm:$0xff]  ;;  %v1913_v48 = vld [vmem:[#allocation6 + $0x16c0] sm:$0xff] }
 0x13a   : > { %2702 = vmatpush1.bf16.msra.mxu1 %v2701_v3  ;;  %v738_v3 = vld [vmem:[#allocation6 + $0x7d0] sm:$0xff] }
 0x13b   : > { %3150 = vmatpush1.bf16.msra.mxu0 %v3149_v4  ;;  %2704 = vmatprep.subr.bf16.mxu1 %v2703_v5  ;;  %v1803_v4 = vld [vmem:[#allocation6 + $0x15c0] sm:$0xff]  ;;  %v3171_v5 = vpack.c.bf16 %v1806_v62, %v1804_v61  ;;  %v2725_v11 = vpack.c.bf16 %v738_v3, %v736_v2  ;;  %v1899_v2 = vld [vmem:[#allocation6 + $0x1650] sm:$0xff]  ;;  %v835_v3 = vld [vmem:[#allocation6 + $0x868] sm:$0xff] }
 0x13c   : > { %3152 = vmatprep.subr.bf16.mxu0 %v3151_v9  ;;  %v1808_v9 = vld [vmem:[#allocation6 + $0x15e8] sm:$0xff]  ;;  %v3173_v12 = vpack.c.bf16 %v1805_v6, %v1803_v4  ;;  %v830_v62 = vld [vmem:[#allocation6 + $0x840] sm:$0xff]  ;;  %v837_v4 = vld [vmem:[#allocation6 + $0x878] sm:$0xff] }
 0x13d   : > { %v1904_v6 = vld [vmem:[#allocation6 + $0x1678] sm:$0xff] }
 0x13e   : > { %2706 = vmatpush1.bf16.msra.mxu1 %v2705_v15  ;;  %v742_v15 = vld [vmem:[#allocation6 + $0x7f0] sm:$0xff] }
 0x13f   : > { %3154 = vmatpush1.bf16.msra.mxu0 %v3153_v16  ;;  %2708 = vmatprep.subr.bf16.mxu1 %v2707_v17  ;;  %v1807_v16 = vld [vmem:[#allocation6 + $0x15e0] sm:$0xff]  ;;  %v3175_v17 = vpack.c.bf16 %v1810_v10, %v1808_v9  ;;  %v2729_v24 = vpack.c.bf16 %v742_v15, %v740_v14  ;;  %v2743_v9 = vpack.c.bf16 %v837_v4, %v835_v3  ;;  %v1903_v14 = vld [vmem:[#allocation6 + $0x1670] sm:$0xff]  ;;  %v839_v15 = vld [vmem:[#allocation6 + $0x888] sm:$0xff] }
 0x140   : > { %3156 = vmatprep.subr.bf16.mxu0 %v3155_v21  ;;  %v1890_v21 = vld [vmem:[#allocation6 + $0x1608] sm:$0xff]  ;;  %v834_v10 = vld [vmem:[#allocation6 + $0x860] sm:$0xff] }
 0x142   : > { %2710 = vmatpush1.bf16.msra.mxu1 %v2709_v27  ;;  %v820_v27 = vld [vmem:[#allocation2 + $0x28] sm:$0x1] }
 0x143   : > { %3158 = vmatpush1.bf16.msra.mxu0 %v3157_v28  ;;  %2712 = vmatprep.subr.bf16.mxu1 %v2711_v29  ;;  %v3177_v28 = vpack.c.bf16 %v1809_v18, %v1807_v16  ;;  %v2731_v29 = vpack.c.bf16 %v825_v20, %v823_v19  ;;  %v841_v16 = vld [vmem:[#allocation6 + $0x898] sm:$0xff] }
 0x144   : > { %3160 = vmatprep.subr.bf16.mxu0 %v3159_v33  ;;  %v3179_v33 = vpack.c.bf16 %v1892_v22, %v1890_v21  ;;  %v1908_v18 = vld [vmem:[#allocation6 + $0x1698] sm:$0xff]  ;;  %v2747_v21 = vpack.c.bf16 %v841_v16, %v839_v15  ;;  %v838_v22 = vld [vmem:[#allocation6 + $0x880] sm:$0xff] }
 0x145   : > { %v2749_v31 = vpack.c.bf16 %v840_v23, %v838_v22  ;;  %v1927_v22 = vld [vmem:[#allocation6 + $0x1730] sm:$0xff]  ;;  %v863_v23 = vld [vmem:[#allocation6 + $0x948] sm:$0xff] }
 0x146   : > { %2714 = vmatpush1.bf16.msra.mxu1 %v2713_v39  ;;  %v894_v39 = vrot.slane %v818_v26, 1  ;;  %v1907_v26 = vld [vmem:[#allocation6 + $0x1690] sm:$0xff] }
 0x147   : > { %3162 = vmatpush1.bf16.msra.mxu0 %v3161_v40  ;;  %2716 = vmatprep.subr.bf16.mxu1 %v2715_v41  ;;  %v895_v40 = vrot.slane %v820_v27, 1  ;;  %v677_v41 = vld [vmem:[#allocation2 + $0x10] sm:$0xff]  ;;  %v843_v27 = vld [vmem:[#allocation6 + $0x8a8] sm:$0xff] }
 0x148   : > { %3164 = vmatprep.subr.bf16.mxu0 %v3163_v45  ;;  %v1961_v45 = vrot.slane %v1887_v32, 1 }
 0x14a   : > { %2718 = vmatpush1.bf16.msra.mxu1 %v2717_v51  ;;  %v3183_v51 = vpack.c.bf16 %v1896_v38, %v1894_v37  ;;  %v1962_v59 = vsel %vm890_vm3, %v1960_v44, %v1961_v45  ;;  %v1911_v38 = vld [vmem:[#allocation6 + $0x16b0] sm:$0xff] }
 0x14b   : > { %3166 = vmatpush1.bf16.msra.mxu0 %v3165_v52  ;;  %2720 = vmatprep.subr.bf16.mxu1 %v2719_v53  ;;  %v1895_v52 = vld [vmem:[#allocation6 + $0x1630] sm:$0xff]  ;;  %v831_v53 = vld [vmem:[#allocation6 + $0x848] sm:$0xff]  ;;  %v3201_v44 = vpack.c.bf16 %v1911_v38, %v1909_v36  ;;  %v869_v36 = vld [vmem:[#allocation6 + $0x978] sm:$0xff] }
 0x14c   : > { %3168 = vmatprep.subr.bf16.mxu0 %v3167_v57  ;;  %v896_v57 = vsel %vm890_vm3, %v894_v39, %v895_v40  ;;  %v3185_v60 = vpack.c.bf16 %v1895_v52, %v1893_v50  ;;  %v2739_v61 = vpack.c.bf16 %v833_v54, %v831_v53  ;;  %v847_v39 = vld [vmem:[#allocation6 + $0x8c8] sm:$0xff]  ;;  %v849_v40 = vld [vmem:[#allocation6 + $0x8d8] sm:$0xff]  ;;  %v1915_v50 = vld [vmem:[#allocation6 + $0x16d0] sm:$0xff] }
 0x14d   : > { %v2755_v45 = vpack.c.bf16 %v849_v40, %v847_v39  ;;  %v853_v52 = vld [vmem:[#allocation6 + $0x8f8] sm:$0xff]  ;;  %v1918_v53 = vld [vmem:[#allocation6 + $0x16e8] sm:$0xff] }
 0x14e   : > { %2722 = vmatpush1.bf16.msra.mxu1 %v2721_v63  ;;  %v832_v63 = vld [vmem:[#allocation6 + $0x850] sm:$0xff]  ;;  %v1920_v54 = vld [vmem:[#allocation6 + $0x16f8] sm:$0xff] }
 0x14f   : > { %3170 = vmatpush1.bf16.msra.mxu0 %v3169_v0  ;;  %2724 = vmatprep.subr.bf16.mxu1 %v2723_v1  ;;  %v1897_v0 = vld [vmem:[#allocation6 + $0x1640] sm:$0xff]  ;;  %v3187_v1 = vpack.c.bf16 %v1900_v56, %v1898_v55  ;;  %v2741_v7 = vpack.c.bf16 %v832_v63, %v830_v62  ;;  %v3205_v56 = vpack.c.bf16 %v1915_v50, %v1913_v48  ;;  %v1919_v62 = vld [vmem:[#allocation6 + $0x16f0] sm:$0xff]  ;;  %v855_v63 = vld [vmem:[#allocation6 + $0x908] sm:$0xff] }
 0x150   : > { %3172 = vmatprep.subr.bf16.mxu0 %v3171_v5  ;;  %v1902_v5 = vld [vmem:[#allocation6 + $0x1668] sm:$0xff]  ;;  %v3189_v8 = vpack.c.bf16 %v1899_v2, %v1897_v0  ;;  %v857_v0 = vld [vmem:[#allocation6 + $0x918] sm:$0xff] }
 0x151   : > { %v1924_v2 = vld [vmem:[#allocation6 + $0x1718] sm:$0xff] }
 0x152   : > { %2726 = vmatpush1.bf16.msra.mxu1 %v2725_v11  ;;  %v836_v11 = vld [vmem:[#allocation6 + $0x870] sm:$0xff]  ;;  %v1936_v38 = vld [vmem:[#allocation6 + $0x1778] sm:$0xff] }
 0x153   : > { %3174 = vmatpush1.bf16.msra.mxu0 %v3173_v12  ;;  %2728 = vmatprep.subr.bf16.mxu1 %v2727_v13  ;;  %v1901_v12 = vld [vmem:[#allocation6 + $0x1660] sm:$0xff]  ;;  %v3191_v13 = vpack.c.bf16 %v1904_v6, %v1902_v5  ;;  %v2745_v19 = vpack.c.bf16 %v836_v11, %v834_v10  ;;  %v2763_v5 = vpack.c.bf16 %v857_v0, %v855_v63  ;;  %v1923_v10 = vld [vmem:[#allocation6 + $0x1710] sm:$0xff]  ;;  %v859_v11 = vld [vmem:[#allocation6 + $0x928] sm:$0xff] }
 0x154   : > { %3176 = vmatprep.subr.bf16.mxu0 %v3175_v17  ;;  %v1906_v17 = vld [vmem:[#allocation6 + $0x1688] sm:$0xff]  ;;  %v3193_v20 = vpack.c.bf16 %v1903_v14, %v1901_v12  ;;  %v854_v6 = vld [vmem:[#allocation6 + $0x900] sm:$0xff]  ;;  %v861_v12 = vld [vmem:[#allocation6 + $0x938] sm:$0xff] }
 0x155   : > { %v3195_v25 = vpack.c.bf16 %v1908_v18, %v1906_v17  ;;  %v1928_v14 = vld [vmem:[#allocation6 + $0x1738] sm:$0xff]  ;;  %v2767_v17 = vpack.c.bf16 %v861_v12, %v859_v11  ;;  %v858_v18 = vld [vmem:[#allocation6 + $0x920] sm:$0xff] }
 0x156   : > { %2730 = vmatpush1.bf16.msra.mxu1 %v2729_v24  ;;  %v1905_v24 = vld [vmem:[#allocation6 + $0x1680] sm:$0xff]  ;;  %v873_v48 = vld [vmem:[#allocation6 + $0x998] sm:$0xff] }
 0x157   : > { %3178 = vmatpush1.bf16.msra.mxu0 %v3177_v28  ;;  %2732 = vmatprep.subr.bf16.mxu1 %v2731_v29  ;;  %v845_v28 = vld [vmem:[#allocation6 + $0x8b8] sm:$0xff]  ;;  %v1910_v29 = vld [vmem:[#allocation6 + $0x16a8] sm:$0xff]  ;;  %v3197_v32 = vpack.c.bf16 %v1907_v26, %v1905_v24  ;;  %v878_v12 = vld [vmem:[#allocation6 + $0x9c0] sm:$0xff] }
 0x158   : > { %3180 = vmatprep.subr.bf16.mxu0 %v3179_v33  ;;  %v2751_v33 = vpack.c.bf16 %v845_v28, %v843_v27  ;;  %v3199_v37 = vpack.c.bf16 %v1912_v30, %v1910_v29  ;;  %v865_v24 = vld [vmem:[#allocation6 + $0x958] sm:$0xff]  ;;  %v862_v30 = vld [vmem:[#allocation6 + $0x940] sm:$0xff] }
 0x159   : > { %809 = vmatmul.mubr.f32.vlgmr.msra.gmra.mrb[0].mxu1 %v677_v41  ;;  %v1914_v41 = vld [vmem:[#allocation6 + $0x16c8] sm:$0xff]  ;;  %v1932_v26 = vld [vmem:[#allocation6 + $0x1758] sm:$0xff]  ;;  %v2771_v29 = vpack.c.bf16 %v865_v24, %v863_v23  ;;  %v882_v23 = vld [vmem:[#allocation6 + $0x9e0] sm:$0xff] }
 0x15a   : > { %2734 = vmatpush1.bf16.msra.mxu1 %v2733_v42  ;;  %1876 = vmatmul.mubr.f32.vlgmr.msra.gmra.mrb[0].mxu0 %v1744_v43  ;;  %v1916_v42 = vld [vmem:[#allocation6 + $0x16d8] sm:$0xff]  ;;  %v2753_v43 = vpack.c.bf16 %v844_v35, %v842_v34  ;;  %v1931_v34 = vld [vmem:[#allocation6 + $0x1750] sm:$0xff]  ;;  %v867_v35 = vld [vmem:[#allocation6 + $0x968] sm:$0xff] }
 0x15b   : > { %3182 = vmatpush1.bf16.msra.mxu0 %v3181_v46  ;;  %2736 = vmatprep.subr.bf16.mxu1 %v2735_v47  ;;  %v846_v46 = vld [vmem:[#allocation6 + $0x8c0] sm:$0xff]  ;;  %v848_v47 = vld [vmem:[#allocation6 + $0x8d0] sm:$0xff]  ;;  %v3203_v49 = vpack.c.bf16 %v1916_v42, %v1914_v41  ;;  %v2775_v41 = vpack.c.bf16 %v869_v36, %v867_v35  ;;  %v1940_v50 = vld [vmem:[#allocation6 + $0x1798] sm:$0xff] }
 0x15c   : > { %3184 = vmatprep.subr.bf16.mxu0 %v3183_v51  ;;  %963 = vmatprep.mubr.f32.mxu1 %v896_v57  ;;  %v851_v51 = vld [vmem:[#allocation6 + $0x8e8] sm:$0xff]  ;;  %v2757_v55 = vpack.c.bf16 %v848_v47, %v846_v46  ;;  %v866_v42 = vld [vmem:[#allocation6 + $0x960] sm:$0xff]  ;;  %v1935_v46 = vld [vmem:[#allocation6 + $0x1770] sm:$0xff] }
 0x15d   : > { %2029 = vmatprep.mubr.f32.mxu0 %v1962_v59  ;;  %v2759_v57 = vpack.c.bf16 %v853_v52, %v851_v51  ;;  %v852_v59 = vld [vmem:[#allocation6 + $0x8f0] sm:$0xff]  ;;  %v871_v47 = vld [vmem:[#allocation6 + $0x988] sm:$0xff]  ;;  %v1884_v36 = vld [vmem:[#allocation2 + $0x40] sm:$0xfe] }
 0x15e   : > { %2738 = vmatpush1.bf16.msra.mxu1 %v2737_v58  ;;  %v850_v58 = vld [vmem:[#allocation6 + $0x8e0] sm:$0xff]  ;;  %v884_v24 = vld [vmem:[#allocation6 + $0x9f0] sm:$0xff]  ;;  %v2044_v35 = vld [vmem:[#allocation6 + $0x1808] sm:$0xff] }
 0x15f   : > { %3186 = vmatpush1.bf16.msra.mxu0 %v3185_v60  ;;  %2740 = vmatprep.subr.bf16.mxu1 %v2739_v61  ;;  %v1917_v60 = vld [vmem:[#allocation6 + $0x16e0] sm:$0xff]  ;;  %v3207_v61 = vpack.c.bf16 %v1920_v54, %v1918_v53  ;;  %v2761_v3 = vpack.c.bf16 %v852_v59, %v850_v58  ;;  %v2779_v53 = vpack.c.bf16 %v873_v48, %v871_v47  ;;  %v1939_v58 = vld [vmem:[#allocation6 + $0x1790] sm:$0xff]  ;;  %v875_v59 = vld [vmem:[#allocation6 + $0x9a8] sm:$0xff] }
 0x160   : > { %3188 = vmatprep.subr.bf16.mxu0 %v3187_v1  ;;  %v1922_v1 = vld [vmem:[#allocation6 + $0x1708] sm:$0xff]  ;;  %v3209_v4 = vpack.c.bf16 %v1919_v62, %v1917_v60  ;;  %v870_v54 = vld [vmem:[#allocation6 + $0x980] sm:$0xff]  ;;  %v877_v60 = vld [vmem:[#allocation6 + $0x9b8] sm:$0xff] }
 0x161   : > { %v1944_v62 = vld [vmem:[#allocation6 + $0x17b8] sm:$0xff] }
 0x162   : > { %2742 = vmatpush1.bf16.msra.mxu1 %v2741_v7  ;;  %v856_v7 = vld [vmem:[#allocation6 + $0x910] sm:$0xff] }
 0x163   : > { %3190 = vmatpush1.bf16.msra.mxu0 %v3189_v8  ;;  %2744 = vmatprep.subr.bf16.mxu1 %v2743_v9  ;;  %v1921_v8 = vld [vmem:[#allocation6 + $0x1700] sm:$0xff]  ;;  %v3211_v9 = vpack.c.bf16 %v1924_v2, %v1922_v1  ;;  %v2765_v15 = vpack.c.bf16 %v856_v7, %v854_v6  ;;  %v2783_v1 = vpack.c.bf16 %v877_v60, %v875_v59  ;;  %v1943_v6 = vld [vmem:[#allocation6 + $0x17b0] sm:$0xff]  ;;  %v879_v7 = vld [vmem:[#allocation6 + $0x9c8] sm:$0xff] }
 0x164   : > { %3192 = vmatprep.subr.bf16.mxu0 %v3191_v13  ;;  %v1926_v13 = vld [vmem:[#allocation6 + $0x1728] sm:$0xff]  ;;  %v3213_v16 = vpack.c.bf16 %v1923_v10, %v1921_v8  ;;  %v874_v2 = vld [vmem:[#allocation6 + $0x9a0] sm:$0xff]  ;;  %v881_v8 = vld [vmem:[#allocation6 + $0x9d8] sm:$0xff] }
 0x165   : > { %v1948_v10 = vld [vmem:[#allocation6 + $0x17d8] sm:$0xff] }
 0x166   : > { %2746 = vmatpush1.bf16.msra.mxu1 %v2745_v19  ;;  %v860_v19 = vld [vmem:[#allocation6 + $0x930] sm:$0xff]  ;;  %v2050_v59 = vld [vmem:[#allocation6 + $0x1838] sm:$0xff] }
 0x167   : > { %3194 = vmatpush1.bf16.msra.mxu0 %v3193_v20  ;;  %2748 = vmatprep.subr.bf16.mxu1 %v2747_v21  ;;  %v1925_v20 = vld [vmem:[#allocation6 + $0x1720] sm:$0xff]  ;;  %v3215_v21 = vpack.c.bf16 %v1928_v14, %v1926_v13  ;;  %v2769_v27 = vpack.c.bf16 %v860_v19, %v858_v18  ;;  %v2787_v14 = vpack.c.bf16 %v881_v8, %v879_v7  ;;  %v883_v19 = vld [vmem:[#allocation6 + $0x9e8] sm:$0xff]  ;;  %v2049_v8 = vld [vmem:[#allocation6 + $0x1830] sm:$0xff] }
 0x168   : > { %3196 = vmatprep.subr.bf16.mxu0 %v3195_v25  ;;  %v1930_v25 = vld [vmem:[#allocation6 + $0x1748] sm:$0xff]  ;;  %v3217_v28 = vpack.c.bf16 %v1927_v22, %v1925_v20  ;;  %v885_v20 = vld [vmem:[#allocation6 + $0x9f8] sm:$0xff] }
 0x169   : > { %v1952_v22 = vld [vmem:[#allocation6 + $0x17f8] sm:$0xff] }
 0x16a   : > { %2750 = vmatpush1.bf16.msra.mxu1 %v2749_v31  ;;  %v864_v31 = vld [vmem:[#allocation6 + $0x950] sm:$0xff] }
 0x16b   : > { %3198 = vmatpush1.bf16.msra.mxu0 %v3197_v32  ;;  %2752 = vmatprep.subr.bf16.mxu1 %v2751_v33  ;;  %v1929_v32 = vld [vmem:[#allocation6 + $0x1740] sm:$0xff]  ;;  %v3219_v33 = vpack.c.bf16 %v1932_v26, %v1930_v25  ;;  %v2773_v39 = vpack.c.bf16 %v864_v31, %v862_v30  ;;  %v2791_v30 = vpack.c.bf16 %v885_v20, %v883_v19  ;;  %v978_v31 = vld [vmem:[#allocation6 + $0xa08] sm:$0xff]  ;;  %v987_v19 = vld [vmem:[#allocation6 + $0xa50] sm:$0xff] }
 0x16c   : > { %3200 = vmatprep.subr.bf16.mxu0 %v3199_v37  ;;  %v1934_v37 = vld [vmem:[#allocation6 + $0x1768] sm:$0xff]  ;;  %v3221_v40 = vpack.c.bf16 %v1931_v34, %v1929_v32  ;;  %v1949_v26 = vld [vmem:[#allocation6 + $0x17e0] sm:$0xff]  ;;  %v980_v32 = vld [vmem:[#allocation6 + $0xa18] sm:$0xff] }
 0x16d   : > { %v2795_v48 = vpack.c.bf16 %v980_v32, %v978_v31  ;;  %v2051_v20 = vld [vmem:[#allocation6 + $0x1840] sm:$0xff]  ;;  %v991_v31 = vld [vmem:[#allocation6 + $0xa70] sm:$0xff] }
 0x16e   : > { %2754 = vmatpush1.bf16.msra.mxu1 %v2753_v43  ;;  %v868_v43 = vld [vmem:[#allocation6 + $0x970] sm:$0xff]  ;;  %v2055_v32 = vld [vmem:[#allocation6 + $0x1860] sm:$0xff] }
 0x16f   : > { %3202 = vmatpush1.bf16.msra.mxu0 %v3201_v44  ;;  %2756 = vmatprep.subr.bf16.mxu1 %v2755_v45  ;;  %v1933_v44 = vld [vmem:[#allocation6 + $0x1760] sm:$0xff]  ;;  %v3223_v45 = vpack.c.bf16 %v1936_v38, %v1934_v37  ;;  %v2777_v51 = vpack.c.bf16 %v868_v43, %v866_v42  ;;  %v1886_v37 = vld [vmem:[#allocation2 + $0x50] sm:$0x1]  ;;  %v2046_v38 = vld [vmem:[#allocation6 + $0x1818] sm:$0xff]  ;;  %v2793_v42 = vpack.c.bf16 %v884_v24, %v882_v23 }
 0x170   : > { %3204 = vmatprep.subr.bf16.mxu0 %v3203_v49  ;;  %v1938_v49 = vld [vmem:[#allocation6 + $0x1788] sm:$0xff]  ;;  %v3225_v52 = vpack.c.bf16 %v1935_v46, %v1933_v44  ;;  %v2043_v44 = vld [vmem:[#allocation6 + $0x1800] sm:$0xff]  ;;  %v992_v24 = vld [vmem:[#allocation6 + $0xa78] sm:$0xff] }
 0x171   : > { %v975_v46 = vld [vmem:[#allocation2 + $0x28] sm:$0x3] }
 0x172   : > { %2758 = vmatpush1.bf16.msra.mxu1 %v2757_v55  ;;  %v872_v55 = vld [vmem:[#allocation6 + $0x990] sm:$0xff]  ;;  %v990_v23 = vld [vmem:[#allocation6 + $0xa68] sm:$0xff] }
 0x173   : > { %3206 = vmatpush1.bf16.msra.mxu0 %v3205_v56  ;;  %2760 = vmatprep.subr.bf16.mxu1 %v2759_v57  ;;  %v1937_v56 = vld [vmem:[#allocation6 + $0x1780] sm:$0xff]  ;;  %v3227_v57 = vpack.c.bf16 %v1940_v50, %v1938_v49  ;;  %v2781_v63 = vpack.c.bf16 %v872_v55, %v870_v54  ;;  %v1957_v49 = vrot.slane %v1884_v36, 1  ;;  %v1958_v50 = vrot.slane %v1886_v37, 1  ;;  %v2045_v54 = vld [vmem:[#allocation6 + $0x1810] sm:$0xff]  ;;  %v982_v55 = vld [vmem:[#allocation6 + $0xa28] sm:$0xff] }
 0x174   : > { %3208 = vmatprep.subr.bf16.mxu0 %v3207_v61  ;;  %v1942_v61 = vld [vmem:[#allocation6 + $0x17a8] sm:$0xff]  ;;  %v3229_v0 = vpack.c.bf16 %v1939_v58, %v1937_v56  ;;  %v984_v56 = vld [vmem:[#allocation6 + $0xa38] sm:$0xff] }
 0x175   : > { %v2048_v58 = vld [vmem:[#allocation6 + $0x1828] sm:$0xff]  ;;  %v996_v36 = vld [vmem:[#allocation6 + $0xa98] sm:$0xff] }
 0x176   : > { %2762 = vmatpush1.bf16.msra.mxu1 %v2761_v3  ;;  %v876_v3 = vld [vmem:[#allocation6 + $0x9b0] sm:$0xff]  ;;  %v3247_v7 = vpack.c.bf16 %v2050_v59, %v2048_v58  ;;  %v2060_v37 = vld [vmem:[#allocation6 + $0x1888] sm:$0xff] }
 0x177   : > { %3210 = vmatpush1.bf16.msra.mxu0 %v3209_v4  ;;  %2764 = vmatprep.subr.bf16.mxu1 %v2763_v5  ;;  %v1941_v4 = vld [vmem:[#allocation6 + $0x17a0] sm:$0xff]  ;;  %v3231_v5 = vpack.c.bf16 %v1944_v62, %v1942_v61  ;;  %v2785_v11 = vpack.c.bf16 %v876_v3, %v874_v2  ;;  %v1050_v61 = vrot.slane %v975_v46, 2  ;;  %v3245_v2 = vpack.c.bf16 %v2045_v54, %v2043_v44  ;;  %v2061_v46 = vld [vmem:[#allocation6 + $0x1890] sm:$0xff]  ;;  %v1002_v59 = vld [vmem:[#allocation6 + $0xac8] sm:$0xff] }
 0x178   : > { %3212 = vmatprep.subr.bf16.mxu0 %v3211_v9  ;;  %v1946_v9 = vld [vmem:[#allocation6 + $0x17c8] sm:$0xff]  ;;  %v3233_v13 = vpack.c.bf16 %v1943_v6, %v1941_v4  ;;  %v2799_v3 = vpack.c.bf16 %v984_v56, %v982_v55  ;;  %v981_v4 = vld [vmem:[#allocation6 + $0xa20] sm:$0xff]  ;;  %v999_v55 = vld [vmem:[#allocation6 + $0xab0] sm:$0xff] }
 0x179   : > { %v3235_v18 = vpack.c.bf16 %v1948_v10, %v1946_v9  ;;  %v2047_v6 = vld [vmem:[#allocation6 + $0x1820] sm:$0xff]  ;;  %v986_v9 = vld [vmem:[#allocation6 + $0xa48] sm:$0xff]  ;;  %v988_v10 = vld [vmem:[#allocation6 + $0xa58] sm:$0xff] }
 0x17a   : > { %2766 = vmatpush1.bf16.msra.mxu1 %v2765_v15  ;;  %v880_v15 = vld [vmem:[#allocation6 + $0x9d0] sm:$0xff]  ;;  %v2059_v44 = vld [vmem:[#allocation6 + $0x1880] sm:$0xff] }
 0x17b   : > { %3214 = vmatpush1.bf16.msra.mxu0 %v3213_v16  ;;  %2768 = vmatprep.subr.bf16.mxu1 %v2767_v17  ;;  %v1945_v16 = vld [vmem:[#allocation6 + $0x17c0] sm:$0xff]  ;;  %v1947_v17 = vld [vmem:[#allocation6 + $0x17d0] sm:$0xff]  ;;  %v2789_v25 = vpack.c.bf16 %v880_v15, %v878_v12  ;;  %v2054_v12 = vld [vmem:[#allocation6 + $0x1858] sm:$0xff] }
 0x17c   : > { %3216 = vmatprep.subr.bf16.mxu0 %v3215_v21  ;;  %v1950_v21 = vld [vmem:[#allocation6 + $0x17e8] sm:$0xff]  ;;  %v997_v54 = vld [vmem:[#allocation6 + $0xaa0] sm:$0xff]  ;;  %v2065_v58 = vld [vmem:[#allocation6 + $0x18b0] sm:$0xff] }
 0x17d   : > { %v3239_v34 = vpack.c.bf16 %v1952_v22, %v1950_v21  ;;  %v2053_v22 = vld [vmem:[#allocation6 + $0x1850] sm:$0xff]  ;;  %v2063_v56 = vld [vmem:[#allocation6 + $0x18a0] sm:$0xff] }
 0x17e   : > { %2770 = vmatpush1.bf16.msra.mxu1 %v2769_v27  ;;  %v1951_v27 = vld [vmem:[#allocation6 + $0x17f0] sm:$0xff] }
 0x17f   : > { %3218 = vmatpush1.bf16.msra.mxu0 %v3217_v28  ;;  %2772 = vmatprep.subr.bf16.mxu1 %v2771_v29  ;;  %v817_v28 = vld [vmem:[#allocation2 + $0x10] sm:$0xfe]  ;;  %v3237_v29 = vpack.c.bf16 %v1947_v17, %v1945_v16  ;;  %v3241_v47 = vpack.c.bf16 %v1951_v27, %v1949_v26  ;;  %v3249_v16 = vpack.c.bf16 %v2049_v8, %v2047_v6  ;;  %v2058_v26 = vld [vmem:[#allocation6 + $0x1878] sm:$0xff] }
 0x180   : > { %3220 = vmatprep.subr.bf16.mxu0 %v3219_v33  ;;  %v819_v33 = vld [vmem:[#allocation2 + $0x20] sm:$0x1]  ;;  %v2803_v17 = vpack.c.bf16 %v988_v10, %v986_v9  ;;  %v2069_v6 = vld [vmem:[#allocation6 + $0x18d0] sm:$0xff]  ;;  %v1008_v8 = vld [vmem:[#allocation6 + $0xaf8] sm:$0xff] }
 0x181   : > { %v892_v43 = vrot.slane %v819_v33, 1  ;;  %v2072_v9 = vld [vmem:[#allocation6 + $0x18e8] sm:$0xff]  ;;  %v2074_v10 = vld [vmem:[#allocation6 + $0x18f8] sm:$0xff] }
 0x182   : > { %2774 = vmatpush1.bf16.msra.mxu1 %v2773_v39  ;;  %v891_v39 = vrot.slane %v817_v28, 1  ;;  %v3253_v28 = vpack.c.bf16 %v2053_v22, %v2051_v20  ;;  %v1012_v20 = vld [vmem:[#allocation6 + $0xb18] sm:$0xff] }
 0x183   : > { %3222 = vmatpush1.bf16.msra.mxu0 %v3221_v40  ;;  %2776 = vmatprep.subr.bf16.mxu1 %v2775_v41  ;;  %v977_v40 = vld [vmem:[#allocation6 + $0xa00] sm:$0xff]  ;;  %v979_v41 = vld [vmem:[#allocation6 + $0xa10] sm:$0xff]  ;;  %v2078_v22 = vld [vmem:[#allocation6 + $0x1918] sm:$0xff] }
 0x184   : > { %3224 = vmatprep.subr.bf16.mxu0 %v3223_v45  ;;  %v973_v45 = vld [vmem:[#allocation2 + $0x18] sm:$0xfc]  ;;  %v893_v62 = vsel %vm890_vm3, %v891_v39, %v892_v43  ;;  %v995_v43 = vld [vmem:[#allocation6 + $0xa90] sm:$0xff] }
 0x185   : > { %v1049_v60 = vrot.slane %v973_v45, 2 }
 0x186   : > { %2778 = vmatpush1.bf16.msra.mxu1 %v2777_v51  ;;  %v2039_v51 = vld [vmem:[#allocation2 + $0x48] sm:$0xfc] }
 0x187   : > { %3226 = vmatpush1.bf16.msra.mxu0 %v3225_v52  ;;  %2780 = vmatprep.subr.bf16.mxu1 %v2779_v53  ;;  %v2041_v52 = vld [vmem:[#allocation2 + $0x58] sm:$0x3]  ;;  %v3243_v53 = vpack.c.bf16 %v2046_v38, %v2044_v35  ;;  %v994_v35 = vld [vmem:[#allocation6 + $0xa88] sm:$0xff] }
 0x188   : > { %3228 = vmatprep.subr.bf16.mxu0 %v3227_v57  ;;  %v2797_v57 = vpack.c.bf16 %v979_v41, %v977_v40  ;;  %v2062_v38 = vld [vmem:[#allocation6 + $0x1898] sm:$0xff]  ;;  %v2811_v41 = vpack.c.bf16 %v996_v36, %v994_v35 }
 0x189   : > { %v3259_v45 = vpack.c.bf16 %v2062_v38, %v2060_v37  ;;  %v1013_v38 = vld [vmem:[#allocation6 + $0xb20] sm:$0xff] }
 0x18a   : > { %2782 = vmatpush1.bf16.msra.mxu1 %v2781_v63  ;;  %v2114_v63 = vrot.slane %v2039_v51, 2 }
 0x18b   : > { %3230 = vmatpush1.bf16.msra.mxu0 %v3229_v0  ;;  %2784 = vmatprep.subr.bf16.mxu1 %v2783_v1  ;;  %v2115_v0 = vrot.slane %v2041_v52, 2  ;;  %v1959_v1 = vsel %vm890_vm3, %v1957_v49, %v1958_v50  ;;  %v2064_v49 = vld [vmem:[#allocation6 + $0x18a8] sm:$0xff]  ;;  %v2066_v50 = vld [vmem:[#allocation6 + $0x18b8] sm:$0xff]  ;;  %v3261_v52 = vpack.c.bf16 %v2061_v46, %v2059_v44 }
 0x18c   : > { %3232 = vmatprep.subr.bf16.mxu0 %v3231_v5  ;;  %v983_v5 = vld [vmem:[#allocation6 + $0xa30] sm:$0xff]  ;;  %v1020_v44 = vld [vmem:[#allocation6 + $0xb58] sm:$0xff] }
 0x18d   : > { %v2116_v15 = vsel %vm1045_vm4, %v2114_v63, %v2115_v0  ;;  %v2817_v63 = vpack.c.bf16 %v999_v55, %v997_v54  ;;  %v3265_v0 = vpack.c.bf16 %v2065_v58, %v2063_v56  ;;  %v2086_v46 = vld [vmem:[#allocation6 + $0x1958] sm:$0xff]  ;;  %v2085_v54 = vld [vmem:[#allocation6 + $0x1950] sm:$0xff]  ;;  %v1022_v55 = vld [vmem:[#allocation6 + $0xb68] sm:$0xff] }
 0x18e   : > { %2786 = vmatpush1.bf16.msra.mxu1 %v2785_v11  ;;  %v2052_v11 = vld [vmem:[#allocation6 + $0x1848] sm:$0xff]  ;;  %v1024_v56 = vld [vmem:[#allocation6 + $0xb78] sm:$0xff] }
 0x18f   : > { %3234 = vmatpush1.bf16.msra.mxu0 %v3233_v13  ;;  %2788 = vmatprep.subr.bf16.mxu1 %v2787_v14  ;;  %v1051_v13 = vsel %vm1045_vm4, %v1049_v60, %v1050_v61  ;;  %v2801_v14 = vpack.c.bf16 %v983_v5, %v981_v4  ;;  %v3251_v21 = vpack.c.bf16 %v2054_v12, %v2052_v11  ;;  %v1004_v60 = vld [vmem:[#allocation6 + $0xad8] sm:$0xff]  ;;  %v2068_v61 = vld [vmem:[#allocation6 + $0x18c8] sm:$0xff]  ;;  %v2067_v4 = vld [vmem:[#allocation6 + $0x18c0] sm:$0xff] }
 0x190   : > { %3236 = vmatprep.subr.bf16.mxu0 %v3235_v18  ;;  %v985_v18 = vld [vmem:[#allocation6 + $0xa40] sm:$0xff]  ;;  %v3269_v12 = vpack.c.bf16 %v2069_v6, %v2067_v4  ;;  %v2090_v58 = vld [vmem:[#allocation6 + $0x1978] sm:$0xff] }
 0x191   : > { %v2805_v27 = vpack.c.bf16 %v987_v19, %v985_v18  ;;  %v2073_v18 = vld [vmem:[#allocation6 + $0x18f0] sm:$0xff]  ;;  %v1010_v19 = vld [vmem:[#allocation6 + $0xb08] sm:$0xff]  ;;  %v1028_v4 = vld [vmem:[#allocation6 + $0xb98] sm:$0xff] }
 0x192   : > { %2790 = vmatpush1.bf16.msra.mxu1 %v2789_v25  ;;  %v2056_v25 = vld [vmem:[#allocation6 + $0x1868] sm:$0xff]  ;;  %v2094_v6 = vld [vmem:[#allocation6 + $0x1998] sm:$0xff] }
 0x193   : > { %3238 = vmatpush1.bf16.msra.mxu0 %v3237_v29  ;;  %2792 = vmatprep.subr.bf16.mxu1 %v2791_v30  ;;  %v2807_v29 = vpack.c.bf16 %v992_v24, %v990_v23  ;;  %v989_v30 = vld [vmem:[#allocation6 + $0xa60] sm:$0xff]  ;;  %v3255_v33 = vpack.c.bf16 %v2058_v26, %v2056_v25  ;;  %v2827_v25 = vpack.c.bf16 %v1012_v20, %v1010_v19 }
 0x194   : > { %3240 = vmatprep.subr.bf16.mxu0 %v3239_v34  ;;  %v2057_v34 = vld [vmem:[#allocation6 + $0x1870] sm:$0xff]  ;;  %v2809_v39 = vpack.c.bf16 %v991_v31, %v989_v30  ;;  %v1009_v26 = vld [vmem:[#allocation6 + $0xb00] sm:$0xff]  ;;  %v1014_v31 = vld [vmem:[#allocation6 + $0xb28] sm:$0xff] }
 0x195   : > { %v3257_v40 = vpack.c.bf16 %v2057_v34, %v2055_v32  ;;  %v2077_v30 = vld [vmem:[#allocation6 + $0x1910] sm:$0xff]  ;;  %v1016_v32 = vld [vmem:[#allocation6 + $0xb38] sm:$0xff] }
 0x196   : > { %2794 = vmatpush1.bf16.msra.mxu1 %v2793_v42  ;;  %v993_v42 = vld [vmem:[#allocation6 + $0xa80] sm:$0xff]  ;;  %v2082_v34 = vld [vmem:[#allocation6 + $0x1938] sm:$0xff]  ;;  %v2831_v37 = vpack.c.bf16 %v1016_v32, %v1014_v31 }
 0x197   : > { %3242 = vmatpush1.bf16.msra.mxu0 %v3241_v47  ;;  %2796 = vmatprep.subr.bf16.mxu1 %v2795_v48  ;;  %v998_v47 = vld [vmem:[#allocation6 + $0xaa8] sm:$0xff]  ;;  %v1000_v48 = vld [vmem:[#allocation6 + $0xab8] sm:$0xff]  ;;  %v2813_v51 = vpack.c.bf16 %v995_v43, %v993_v42  ;;  %v2081_v42 = vld [vmem:[#allocation6 + $0x1930] sm:$0xff] }
 0x198   : > { %3244 = vmatprep.subr.bf16.mxu0 %v3243_v53  ;;  %v2815_v53 = vpack.c.bf16 %v1000_v48, %v998_v47  ;;  %v1018_v43 = vld [vmem:[#allocation6 + $0xb48] sm:$0xff]  ;;  %v1033_v32 = vld [vmem:[#allocation6 + $0xbc0] sm:$0xff] }
 0x199   : > { %964 = vmatmul.mubr.f32.vlgmr.msra.gmra.mrb[0].mxu1 %v893_v62  ;;  %v2070_v62 = vld [vmem:[#allocation6 + $0x18d8] sm:$0xff] }
 0x19a   : > { %2798 = vmatpush1.bf16.msra.mxu1 %v2797_v57  ;;  %2030 = vmatmul.mubr.f32.vlgmr.msra.gmra.mrb[0].mxu0 %v1959_v1  ;;  %v3263_v57 = vpack.c.bf16 %v2066_v50, %v2064_v49  ;;  %v2819_v1 = vpack.c.bf16 %v1004_v60, %v1002_v59  ;;  %v3267_v5 = vpack.c.bf16 %v2070_v62, %v2068_v61  ;;  %v1017_v50 = vld [vmem:[#allocation6 + $0xb40] sm:$0xff] }
 0x19b   : > { %3246 = vmatpush1.bf16.msra.mxu0 %v3245_v2  ;;  %2800 = vmatprep.subr.bf16.mxu1 %v2799_v3  ;;  %v1001_v2 = vld [vmem:[#allocation6 + $0xac0] sm:$0xff]  ;;  %v1003_v3 = vld [vmem:[#allocation6 + $0xad0] sm:$0xff]  ;;  %v2835_v49 = vpack.c.bf16 %v1020_v44, %v1018_v43  ;;  %v2839_v61 = vpack.c.bf16 %v1024_v56, %v1022_v55  ;;  %v1135_v55 = vld [vmem:[#allocation6 + $0xc18] sm:$0xff] }
 0x19c   : > { %3248 = vmatprep.subr.bf16.mxu0 %v3247_v7  ;;  %1118 = vmatprep.mubr.f32.mxu1 %v1051_v13  ;;  %v1006_v7 = vld [vmem:[#allocation6 + $0xae8] sm:$0xff]  ;;  %v2821_v11 = vpack.c.bf16 %v1003_v3, %v1001_v2  ;;  %v1021_v62 = vld [vmem:[#allocation6 + $0xb60] sm:$0xff]  ;;  %v2089_v2 = vld [vmem:[#allocation6 + $0x1970] sm:$0xff] }
 0x19d   : > { %2183 = vmatprep.mubr.f32.mxu0 %v2116_v15  ;;  %v2823_v13 = vpack.c.bf16 %v1008_v8, %v1006_v7  ;;  %v1007_v15 = vld [vmem:[#allocation6 + $0xaf0] sm:$0xff]  ;;  %v1026_v3 = vld [vmem:[#allocation6 + $0xb88] sm:$0xff]  ;;  %v1037_v43 = vld [vmem:[#allocation6 + $0xbe0] sm:$0xff] }
 0x19e   : > { %2802 = vmatpush1.bf16.msra.mxu1 %v2801_v14  ;;  %v1005_v14 = vld [vmem:[#allocation6 + $0xae0] sm:$0xff]  ;;  %v1039_v44 = vld [vmem:[#allocation6 + $0xbf0] sm:$0xff]  ;;  %v2198_v56 = vld [vmem:[#allocation6 + $0x1a08] sm:$0xff] }
 0x19f   : > { %3250 = vmatpush1.bf16.msra.mxu0 %v3249_v16  ;;  %2804 = vmatprep.subr.bf16.mxu1 %v2803_v17  ;;  %v2071_v16 = vld [vmem:[#allocation6 + $0x18e0] sm:$0xff]  ;;  %v3271_v17 = vpack.c.bf16 %v2074_v10, %v2072_v9  ;;  %v2825_v23 = vpack.c.bf16 %v1007_v15, %v1005_v14  ;;  %v2843_v9 = vpack.c.bf16 %v1028_v4, %v1026_v3  ;;  %v2093_v14 = vld [vmem:[#allocation6 + $0x1990] sm:$0xff]  ;;  %v1030_v15 = vld [vmem:[#allocation6 + $0xba8] sm:$0xff] }
 0x1a0   : > { %3252 = vmatprep.subr.bf16.mxu0 %v3251_v21  ;;  %v2076_v21 = vld [vmem:[#allocation6 + $0x1908] sm:$0xff]  ;;  %v3273_v24 = vpack.c.bf16 %v2073_v18, %v2071_v16  ;;  %v1025_v10 = vld [vmem:[#allocation6 + $0xb80] sm:$0xff]  ;;  %v1032_v16 = vld [vmem:[#allocation6 + $0xbb8] sm:$0xff] }
 0x1a1   : > { %v2098_v18 = vld [vmem:[#allocation6 + $0x19b8] sm:$0xff] }
 0x1a2   : > { %2806 = vmatpush1.bf16.msra.mxu1 %v2805_v27  ;;  %v1011_v27 = vld [vmem:[#allocation6 + $0xb10] sm:$0xff] }
 0x1a3   : > { %3254 = vmatpush1.bf16.msra.mxu0 %v3253_v28  ;;  %2808 = vmatprep.subr.bf16.mxu1 %v2807_v29  ;;  %v2075_v28 = vld [vmem:[#allocation6 + $0x1900] sm:$0xff]  ;;  %v3275_v29 = vpack.c.bf16 %v2078_v22, %v2076_v21  ;;  %v2829_v35 = vpack.c.bf16 %v1011_v27, %v1009_v26  ;;  %v2847_v21 = vpack.c.bf16 %v1032_v16, %v1030_v15  ;;  %v2097_v26 = vld [vmem:[#allocation6 + $0x19b0] sm:$0xff]  ;;  %v1034_v27 = vld [vmem:[#allocation6 + $0xbc8] sm:$0xff] }
 0x1a4   : > { %3256 = vmatprep.subr.bf16.mxu0 %v3255_v33  ;;  %v2080_v33 = vld [vmem:[#allocation6 + $0x1928] sm:$0xff]  ;;  %v3277_v36 = vpack.c.bf16 %v2077_v30, %v2075_v28  ;;  %v1029_v22 = vld [vmem:[#allocation6 + $0xba0] sm:$0xff]  ;;  %v1036_v28 = vld [vmem:[#allocation6 + $0xbd8] sm:$0xff] }
 0x1a5   : > { %v2102_v30 = vld [vmem:[#allocation6 + $0x19d8] sm:$0xff] }
 0x1a6   : > { %2810 = vmatpush1.bf16.msra.mxu1 %v2809_v39  ;;  %v1015_v39 = vld [vmem:[#allocation6 + $0xb30] sm:$0xff]  ;;  %v2204_v15 = vld [vmem:[#allocation6 + $0x1a38] sm:$0xff] }
 0x1a7   : > { %3258 = vmatpush1.bf16.msra.mxu0 %v3257_v40  ;;  %2812 = vmatprep.subr.bf16.mxu1 %v2811_v41  ;;  %v2079_v40 = vld [vmem:[#allocation6 + $0x1920] sm:$0xff]  ;;  %v3279_v41 = vpack.c.bf16 %v2082_v34, %v2080_v33  ;;  %v2833_v47 = vpack.c.bf16 %v1015_v39, %v1013_v38  ;;  %v2851_v34 = vpack.c.bf16 %v1036_v28, %v1034_v27  ;;  %v1038_v39 = vld [vmem:[#allocation6 + $0xbe8] sm:$0xff]  ;;  %v2203_v28 = vld [vmem:[#allocation6 + $0x1a30] sm:$0xff] }
 0x1a8   : > { %3260 = vmatprep.subr.bf16.mxu0 %v3259_v45  ;;  %v2084_v45 = vld [vmem:[#allocation6 + $0x1948] sm:$0xff]  ;;  %v3281_v48 = vpack.c.bf16 %v2081_v42, %v2079_v40  ;;  %v1040_v40 = vld [vmem:[#allocation6 + $0xbf8] sm:$0xff] }
 0x1a9   : > { %v2106_v42 = vld [vmem:[#allocation6 + $0x19f8] sm:$0xff] }
 0x1aa   : > { %2814 = vmatpush1.bf16.msra.mxu1 %v2813_v51  ;;  %v1019_v51 = vld [vmem:[#allocation6 + $0xb50] sm:$0xff] }
 0x1ab   : > { %3262 = vmatpush1.bf16.msra.mxu0 %v3261_v52  ;;  %2816 = vmatprep.subr.bf16.mxu1 %v2815_v53  ;;  %v2083_v52 = vld [vmem:[#allocation6 + $0x1940] sm:$0xff]  ;;  %v3283_v53 = vpack.c.bf16 %v2086_v46, %v2084_v45  ;;  %v2837_v59 = vpack.c.bf16 %v1019_v51, %v1017_v50  ;;  %v2855_v50 = vpack.c.bf16 %v1040_v40, %v1038_v39  ;;  %v1133_v51 = vld [vmem:[#allocation6 + $0xc08] sm:$0xff]  ;;  %v1142_v39 = vld [vmem:[#allocation6 + $0xc50] sm:$0xff] }
 0x1ac   : > { %3264 = vmatprep.subr.bf16.mxu0 %v3263_v57  ;;  %v2088_v57 = vld [vmem:[#allocation6 + $0x1968] sm:$0xff]  ;;  %v3285_v60 = vpack.c.bf16 %v2085_v54, %v2083_v52  ;;  %v2103_v46 = vld [vmem:[#allocation6 + $0x19e0] sm:$0xff]  ;;  %v2859_v4 = vpack.c.bf16 %v1135_v55, %v1133_v51  ;;  %v1146_v51 = vld [vmem:[#allocation6 + $0xc70] sm:$0xff] }
 0x1ad   : > { %v974_v52 = vld [vmem:[#allocation2 + $0x20] sm:$0x3]  ;;  %v1149_v55 = vld [vmem:[#allocation6 + $0xc88] sm:$0xff] }
 0x1ae   : > { %2818 = vmatpush1.bf16.msra.mxu1 %v2817_v63  ;;  %v1023_v63 = vld [vmem:[#allocation6 + $0xb70] sm:$0xff]  ;;  %v2205_v40 = vld [vmem:[#allocation6 + $0x1a40] sm:$0xff] }
 0x1af   : > { %3266 = vmatpush1.bf16.msra.mxu0 %v3265_v0  ;;  %2820 = vmatprep.subr.bf16.mxu1 %v2819_v1  ;;  %v2087_v0 = vld [vmem:[#allocation6 + $0x1960] sm:$0xff]  ;;  %v3287_v1 = vpack.c.bf16 %v2090_v58, %v2088_v57  ;;  %v2841_v7 = vpack.c.bf16 %v1023_v63, %v1021_v62  ;;  %v2040_v57 = vld [vmem:[#allocation2 + $0x50] sm:$0x3]  ;;  %v2200_v58 = vld [vmem:[#allocation6 + $0x1a18] sm:$0xff]  ;;  %v2857_v62 = vpack.c.bf16 %v1039_v44, %v1037_v43  ;;  %v1047_v63 = vrot.slane %v974_v52, 2 }
 0x1b0   : > { %3268 = vmatprep.subr.bf16.mxu0 %v3267_v5  ;;  %v2092_v5 = vld [vmem:[#allocation6 + $0x1988] sm:$0xff]  ;;  %v3289_v8 = vpack.c.bf16 %v2089_v2, %v2087_v0  ;;  %v1147_v44 = vld [vmem:[#allocation6 + $0xc78] sm:$0xff]  ;;  %v2209_v52 = vld [vmem:[#allocation6 + $0x1a60] sm:$0xff] }
 0x1b1   : > { %v1130_v2 = vld [vmem:[#allocation2 + $0x28] sm:$0x7] }
 0x1b2   : > { %2822 = vmatpush1.bf16.msra.mxu1 %v2821_v11  ;;  %v1027_v11 = vld [vmem:[#allocation6 + $0xb90] sm:$0xff]  ;;  %v1145_v43 = vld [vmem:[#allocation6 + $0xc68] sm:$0xff] }
 0x1b3   : > { %3270 = vmatpush1.bf16.msra.mxu0 %v3269_v12  ;;  %2824 = vmatprep.subr.bf16.mxu1 %v2823_v13  ;;  %v2091_v12 = vld [vmem:[#allocation6 + $0x1980] sm:$0xff]  ;;  %v3291_v13 = vpack.c.bf16 %v2094_v6, %v2092_v5  ;;  %v2845_v19 = vpack.c.bf16 %v1027_v11, %v1025_v10  ;;  %v2112_v5 = vrot.slane %v2040_v57, 2  ;;  %v2199_v10 = vld [vmem:[#allocation6 + $0x1a10] sm:$0xff]  ;;  %v1137_v11 = vld [vmem:[#allocation6 + $0xc28] sm:$0xff] }
 0x1b4   : > { %3272 = vmatprep.subr.bf16.mxu0 %v3271_v17  ;;  %v2096_v17 = vld [vmem:[#allocation6 + $0x19a8] sm:$0xff]  ;;  %v3293_v20 = vpack.c.bf16 %v2093_v14, %v2091_v12  ;;  %v2197_v6 = vld [vmem:[#allocation6 + $0x1a00] sm:$0xff]  ;;  %v1139_v12 = vld [vmem:[#allocation6 + $0xc38] sm:$0xff] }
 0x1b5   : > { %v2202_v14 = vld [vmem:[#allocation6 + $0x1a28] sm:$0xff] }
 0x1b6   : > { %2826 = vmatpush1.bf16.msra.mxu1 %v2825_v23  ;;  %v1031_v23 = vld [vmem:[#allocation6 + $0xbb0] sm:$0xff]  ;;  %v3311_v27 = vpack.c.bf16 %v2204_v15, %v2202_v14  ;;  %v2214_v57 = vld [vmem:[#allocation6 + $0x1a88] sm:$0xff] }
 0x1b7   : > { %3274 = vmatpush1.bf16.msra.mxu0 %v3273_v24  ;;  %2828 = vmatprep.subr.bf16.mxu1 %v2827_v25  ;;  %v2095_v24 = vld [vmem:[#allocation6 + $0x19a0] sm:$0xff]  ;;  %v3295_v25 = vpack.c.bf16 %v2098_v18, %v2096_v17  ;;  %v2849_v31 = vpack.c.bf16 %v1031_v23, %v1029_v22  ;;  %v1205_v17 = vrot.slane %v1130_v2, 3  ;;  %v3309_v22 = vpack.c.bf16 %v2199_v10, %v2197_v6  ;;  %v2215_v2 = vld [vmem:[#allocation6 + $0x1a90] sm:$0xff]  ;;  %v2220_v6 = vld [vmem:[#allocation6 + $0x1ab8] sm:$0xff] }
 0x1b8   : > { %3276 = vmatprep.subr.bf16.mxu0 %v3275_v29  ;;  %v2100_v29 = vld [vmem:[#allocation6 + $0x19c8] sm:$0xff]  ;;  %v3297_v33 = vpack.c.bf16 %v2097_v26, %v2095_v24  ;;  %v2863_v23 = vpack.c.bf16 %v1139_v12, %v1137_v11  ;;  %v1136_v24 = vld [vmem:[#allocation6 + $0xc20] sm:$0xff]  ;;  %v1154_v11 = vld [vmem:[#allocation6 + $0xcb0] sm:$0xff] }
 0x1b9   : > { %v3299_v38 = vpack.c.bf16 %v2102_v30, %v2100_v29  ;;  %v2201_v26 = vld [vmem:[#allocation6 + $0x1a20] sm:$0xff]  ;;  %v1141_v29 = vld [vmem:[#allocation6 + $0xc48] sm:$0xff]  ;;  %v1143_v30 = vld [vmem:[#allocation6 + $0xc58] sm:$0xff] }
 0x1ba   : > { %2830 = vmatpush1.bf16.msra.mxu1 %v2829_v35  ;;  %v1035_v35 = vld [vmem:[#allocation6 + $0xbd0] sm:$0xff]  ;;  %v1152_v10 = vld [vmem:[#allocation6 + $0xca0] sm:$0xff]  ;;  %v1157_v15 = vld [vmem:[#allocation6 + $0xcc8] sm:$0xff] }
 0x1bb   : > { %3278 = vmatpush1.bf16.msra.mxu0 %v3277_v36  ;;  %2832 = vmatprep.subr.bf16.mxu1 %v2831_v37  ;;  %v2099_v36 = vld [vmem:[#allocation6 + $0x19c0] sm:$0xff]  ;;  %v2101_v37 = vld [vmem:[#allocation6 + $0x19d0] sm:$0xff]  ;;  %v2853_v45 = vpack.c.bf16 %v1035_v35, %v1033_v32  ;;  %v2208_v32 = vld [vmem:[#allocation6 + $0x1a58] sm:$0xff] }
 0x1bc   : > { %3280 = vmatprep.subr.bf16.mxu0 %v3279_v41  ;;  %v2104_v41 = vld [vmem:[#allocation6 + $0x19e8] sm:$0xff]  ;;  %v2217_v12 = vld [vmem:[#allocation6 + $0x1aa0] sm:$0xff]  ;;  %v2219_v14 = vld [vmem:[#allocation6 + $0x1ab0] sm:$0xff] }
 0x1bd   : > { %v3303_v54 = vpack.c.bf16 %v2106_v42, %v2104_v41  ;;  %v2207_v42 = vld [vmem:[#allocation6 + $0x1a50] sm:$0xff] }
 0x1be   : > { %2834 = vmatpush1.bf16.msra.mxu1 %v2833_v47  ;;  %v2105_v47 = vld [vmem:[#allocation6 + $0x19f0] sm:$0xff] }
 0x1bf   : > { %3282 = vmatpush1.bf16.msra.mxu0 %v3281_v48  ;;  %2836 = vmatprep.subr.bf16.mxu1 %v2835_v49  ;;  %v972_v48 = vld [vmem:[#allocation2 + $0x10] sm:$0xfc]  ;;  %v3301_v49 = vpack.c.bf16 %v2101_v37, %v2099_v36  ;;  %v3305_v3 = vpack.c.bf16 %v2105_v47, %v2103_v46  ;;  %v3313_v36 = vpack.c.bf16 %v2203_v28, %v2201_v26  ;;  %v2212_v46 = vld [vmem:[#allocation6 + $0x1a78] sm:$0xff] }
 0x1c0   : > { %3284 = vmatprep.subr.bf16.mxu0 %v3283_v53  ;;  %v2038_v53 = vld [vmem:[#allocation2 + $0x40] sm:$0xfc]  ;;  %v2867_v37 = vpack.c.bf16 %v1143_v30, %v1141_v29  ;;  %v2223_v26 = vld [vmem:[#allocation6 + $0x1ad0] sm:$0xff]  ;;  %v1163_v28 = vld [vmem:[#allocation6 + $0xcf8] sm:$0xff] }
 0x1c1   : > { %v2111_v0 = vrot.slane %v2038_v53, 2  ;;  %v2226_v29 = vld [vmem:[#allocation6 + $0x1ae8] sm:$0xff]  ;;  %v2228_v30 = vld [vmem:[#allocation6 + $0x1af8] sm:$0xff] }
 0x1c2   : > { %2838 = vmatpush1.bf16.msra.mxu1 %v2837_v59  ;;  %v1046_v59 = vrot.slane %v972_v48, 2  ;;  %v3317_v48 = vpack.c.bf16 %v2207_v42, %v2205_v40  ;;  %v1167_v40 = vld [vmem:[#allocation6 + $0xd18] sm:$0xff] }
 0x1c3   : > { %3286 = vmatpush1.bf16.msra.mxu0 %v3285_v60  ;;  %2840 = vmatprep.subr.bf16.mxu1 %v2839_v61  ;;  %v1132_v60 = vld [vmem:[#allocation6 + $0xc00] sm:$0xff]  ;;  %v1134_v61 = vld [vmem:[#allocation6 + $0xc10] sm:$0xff]  ;;  %v2232_v42 = vld [vmem:[#allocation6 + $0x1b18] sm:$0xff] }
 0x1c4   : > { %3288 = vmatprep.subr.bf16.mxu0 %v3287_v1  ;;  %v1128_v1 = vld [vmem:[#allocation2 + $0x18] sm:$0xf8]  ;;  %v1048_v18 = vsel %vm1045_vm4, %v1046_v59, %v1047_v63  ;;  %v1150_v63 = vld [vmem:[#allocation6 + $0xc90] sm:$0xff] }
 0x1c5   : > { %v1204_v16 = vrot.slane %v1128_v1, 3 }
 0x1c6   : > { %2842 = vmatpush1.bf16.msra.mxu1 %v2841_v7  ;;  %v2193_v7 = vld [vmem:[#allocation2 + $0x48] sm:$0xf8] }
 0x1c7   : > { %3290 = vmatpush1.bf16.msra.mxu0 %v3289_v8  ;;  %2844 = vmatprep.subr.bf16.mxu1 %v2843_v9  ;;  %v2195_v8 = vld [vmem:[#allocation2 + $0x58] sm:$0x7]  ;;  %v3307_v9 = vpack.c.bf16 %v2200_v58, %v2198_v56 }
 0x1c8   : > { %3292 = vmatprep.subr.bf16.mxu0 %v3291_v13  ;;  %v2861_v13 = vpack.c.bf16 %v1134_v61, %v1132_v60  ;;  %v1151_v56 = vld [vmem:[#allocation6 + $0xc98] sm:$0xff] }
 0x1c9   : > { %v2216_v58 = vld [vmem:[#allocation6 + $0x1a98] sm:$0xff]  ;;  %v2875_v61 = vpack.c.bf16 %v1151_v56, %v1149_v55 }
 0x1ca   : > { %2846 = vmatpush1.bf16.msra.mxu1 %v2845_v19  ;;  %v2268_v19 = vrot.slane %v2193_v7, 3  ;;  %v3323_v1 = vpack.c.bf16 %v2216_v58, %v2214_v57  ;;  %v1168_v58 = vld [vmem:[#allocation6 + $0xd20] sm:$0xff] }
 0x1cb   : > { %3294 = vmatpush1.bf16.msra.mxu0 %v3293_v20  ;;  %2848 = vmatprep.subr.bf16.mxu1 %v2847_v21  ;;  %v2269_v20 = vrot.slane %v2195_v8, 3  ;;  %v2113_v21 = vsel %vm1045_vm4, %v2111_v0, %v2112_v5  ;;  %v2213_v0 = vld [vmem:[#allocation6 + $0x1a80] sm:$0xff]  ;;  %v2218_v5 = vld [vmem:[#allocation6 + $0x1aa8] sm:$0xff] }
 0x1cc   : > { %3296 = vmatprep.subr.bf16.mxu0 %v3295_v25  ;;  %v1138_v25 = vld [vmem:[#allocation6 + $0xc30] sm:$0xff]  ;;  %v3325_v8 = vpack.c.bf16 %v2215_v2, %v2213_v0  ;;  %v1175_v0 = vld [vmem:[#allocation6 + $0xd58] sm:$0xff] }
 0x1cd   : > { %v2270_v35 = vsel %vm1200_vm5, %v2268_v19, %v2269_v20  ;;  %v2881_v19 = vpack.c.bf16 %v1154_v11, %v1152_v10  ;;  %v3329_v20 = vpack.c.bf16 %v2219_v14, %v2217_v12  ;;  %v2240_v2 = vld [vmem:[#allocation6 + $0x1b58] sm:$0xff]  ;;  %v2239_v10 = vld [vmem:[#allocation6 + $0x1b50] sm:$0xff]  ;;  %v1177_v11 = vld [vmem:[#allocation6 + $0xd68] sm:$0xff] }
 0x1ce   : > { %2850 = vmatpush1.bf16.msra.mxu1 %v2849_v31  ;;  %v2206_v31 = vld [vmem:[#allocation6 + $0x1a48] sm:$0xff]  ;;  %v1179_v12 = vld [vmem:[#allocation6 + $0xd78] sm:$0xff] }
 0x1cf   : > { %3298 = vmatpush1.bf16.msra.mxu0 %v3297_v33  ;;  %2852 = vmatprep.subr.bf16.mxu1 %v2851_v34  ;;  %v1206_v33 = vsel %vm1200_vm5, %v1204_v16, %v1205_v17  ;;  %v2865_v34 = vpack.c.bf16 %v1138_v25, %v1136_v24  ;;  %v3315_v41 = vpack.c.bf16 %v2208_v32, %v2206_v31  ;;  %v1159_v16 = vld [vmem:[#allocation6 + $0xcd8] sm:$0xff]  ;;  %v2222_v17 = vld [vmem:[#allocation6 + $0x1ac8] sm:$0xff]  ;;  %v2221_v24 = vld [vmem:[#allocation6 + $0x1ac0] sm:$0xff] }
 0x1d0   : > { %3300 = vmatprep.subr.bf16.mxu0 %v3299_v38  ;;  %v1140_v38 = vld [vmem:[#allocation6 + $0xc40] sm:$0xff]  ;;  %v3333_v32 = vpack.c.bf16 %v2223_v26, %v2221_v24  ;;  %v2244_v14 = vld [vmem:[#allocation6 + $0x1b78] sm:$0xff] }
 0x1d1   : > { %v2869_v47 = vpack.c.bf16 %v1142_v39, %v1140_v38  ;;  %v2227_v38 = vld [vmem:[#allocation6 + $0x1af0] sm:$0xff]  ;;  %v1165_v39 = vld [vmem:[#allocation6 + $0xd08] sm:$0xff]  ;;  %v1183_v24 = vld [vmem:[#allocation6 + $0xd98] sm:$0xff] }
 0x1d2   : > { %2854 = vmatpush1.bf16.msra.mxu1 %v2853_v45  ;;  %v2210_v45 = vld [vmem:[#allocation6 + $0x1a68] sm:$0xff]  ;;  %v2248_v26 = vld [vmem:[#allocation6 + $0x1b98] sm:$0xff] }
 0x1d3   : > { %3302 = vmatpush1.bf16.msra.mxu0 %v3301_v49  ;;  %2856 = vmatprep.subr.bf16.mxu1 %v2855_v50  ;;  %v2871_v49 = vpack.c.bf16 %v1147_v44, %v1145_v43  ;;  %v1144_v50 = vld [vmem:[#allocation6 + $0xc60] sm:$0xff]  ;;  %v3319_v53 = vpack.c.bf16 %v2212_v46, %v2210_v45  ;;  %v2891_v45 = vpack.c.bf16 %v1167_v40, %v1165_v39 }
 0x1d4   : > { %3304 = vmatprep.subr.bf16.mxu0 %v3303_v54  ;;  %v2211_v54 = vld [vmem:[#allocation6 + $0x1a70] sm:$0xff]  ;;  %v2873_v59 = vpack.c.bf16 %v1146_v51, %v1144_v50  ;;  %v1164_v46 = vld [vmem:[#allocation6 + $0xd00] sm:$0xff]  ;;  %v1169_v51 = vld [vmem:[#allocation6 + $0xd28] sm:$0xff] }
 0x1d5   : > { %v3321_v60 = vpack.c.bf16 %v2211_v54, %v2209_v52  ;;  %v2231_v50 = vld [vmem:[#allocation6 + $0x1b10] sm:$0xff]  ;;  %v1171_v52 = vld [vmem:[#allocation6 + $0xd38] sm:$0xff] }
 0x1d6   : > { %2858 = vmatpush1.bf16.msra.mxu1 %v2857_v62  ;;  %v1148_v62 = vld [vmem:[#allocation6 + $0xc80] sm:$0xff]  ;;  %v2236_v54 = vld [vmem:[#allocation6 + $0x1b38] sm:$0xff]  ;;  %v2895_v57 = vpack.c.bf16 %v1171_v52, %v1169_v51 }
 0x1d7   : > { %3306 = vmatpush1.bf16.msra.mxu0 %v3305_v3  ;;  %2860 = vmatprep.subr.bf16.mxu1 %v2859_v4  ;;  %v1153_v3 = vld [vmem:[#allocation6 + $0xca8] sm:$0xff]  ;;  %v1155_v4 = vld [vmem:[#allocation6 + $0xcb8] sm:$0xff]  ;;  %v2877_v7 = vpack.c.bf16 %v1150_v63, %v1148_v62  ;;  %v2235_v62 = vld [vmem:[#allocation6 + $0x1b30] sm:$0xff] }
 0x1d8   : > { %3308 = vmatprep.subr.bf16.mxu0 %v3307_v9  ;;  %v2879_v9 = vpack.c.bf16 %v1155_v4, %v1153_v3  ;;  %v1173_v63 = vld [vmem:[#allocation6 + $0xd48] sm:$0xff] }
 0x1d9   : > { %1119 = vmatmul.mubr.f32.vlgmr.msra.gmra.mrb[0].mxu1 %v1048_v18  ;;  %v2224_v18 = vld [vmem:[#allocation6 + $0x1ad8] sm:$0xff] }
 0x1da   : > { %2862 = vmatpush1.bf16.msra.mxu1 %v2861_v13  ;;  %2184 = vmatmul.mubr.f32.vlgmr.msra.gmra.mrb[0].mxu0 %v2113_v21  ;;  %v3327_v13 = vpack.c.bf16 %v2220_v6, %v2218_v5  ;;  %v2883_v21 = vpack.c.bf16 %v1159_v16, %v1157_v15  ;;  %v3331_v25 = vpack.c.bf16 %v2224_v18, %v2222_v17  ;;  %v1172_v6 = vld [vmem:[#allocation6 + $0xd40] sm:$0xff] }
 0x1db   : > { %3310 = vmatpush1.bf16.msra.mxu0 %v3309_v22  ;;  %2864 = vmatprep.subr.bf16.mxu1 %v2863_v23  ;;  %v1156_v22 = vld [vmem:[#allocation6 + $0xcc0] sm:$0xff]  ;;  %v1158_v23 = vld [vmem:[#allocation6 + $0xcd0] sm:$0xff]  ;;  %v2899_v5 = vpack.c.bf16 %v1175_v0, %v1173_v63  ;;  %v2903_v17 = vpack.c.bf16 %v1179_v12, %v1177_v11 }
 0x1dc   : > { %3312 = vmatprep.subr.bf16.mxu0 %v3311_v27  ;;  %1273 = vmatprep.mubr.f32.mxu1 %v1206_v33  ;;  %v1161_v27 = vld [vmem:[#allocation6 + $0xce8] sm:$0xff]  ;;  %v2885_v31 = vpack.c.bf16 %v1158_v23, %v1156_v22  ;;  %v1176_v18 = vld [vmem:[#allocation6 + $0xd60] sm:$0xff]  ;;  %v2243_v22 = vld [vmem:[#allocation6 + $0x1b70] sm:$0xff] }
 0x1dd   : > { %2337 = vmatprep.mubr.f32.mxu0 %v2270_v35  ;;  %v2887_v33 = vpack.c.bf16 %v1163_v28, %v1161_v27  ;;  %v1162_v35 = vld [vmem:[#allocation6 + $0xcf0] sm:$0xff]  ;;  %v1181_v23 = vld [vmem:[#allocation6 + $0xd88] sm:$0xff]  ;;  %v1192_v0 = vld [vmem:[#allocation6 + $0xde0] sm:$0xff] }
 0x1de   : > { %2866 = vmatpush1.bf16.msra.mxu1 %v2865_v34  ;;  %v1160_v34 = vld [vmem:[#allocation6 + $0xce0] sm:$0xff] }
 0x1df   : > { %3314 = vmatpush1.bf16.msra.mxu0 %v3313_v36  ;;  %2868 = vmatprep.subr.bf16.mxu1 %v2867_v37  ;;  %v2225_v36 = vld [vmem:[#allocation6 + $0x1ae0] sm:$0xff]  ;;  %v3335_v37 = vpack.c.bf16 %v2228_v30, %v2226_v29  ;;  %v2889_v43 = vpack.c.bf16 %v1162_v35, %v1160_v34  ;;  %v2907_v29 = vpack.c.bf16 %v1183_v24, %v1181_v23  ;;  %v2247_v34 = vld [vmem:[#allocation6 + $0x1b90] sm:$0xff]  ;;  %v1185_v35 = vld [vmem:[#allocation6 + $0xda8] sm:$0xff] }
 0x1e0   : > { %3316 = vmatprep.subr.bf16.mxu0 %v3315_v41  ;;  %v2230_v41 = vld [vmem:[#allocation6 + $0x1b08] sm:$0xff]  ;;  %v3337_v44 = vpack.c.bf16 %v2227_v38, %v2225_v36  ;;  %v1180_v30 = vld [vmem:[#allocation6 + $0xd80] sm:$0xff]  ;;  %v1187_v36 = vld [vmem:[#allocation6 + $0xdb8] sm:$0xff] }
 0x1e1   : > { %v2252_v38 = vld [vmem:[#allocation6 + $0x1bb8] sm:$0xff] }
 0x1e2   : > { %2870 = vmatpush1.bf16.msra.mxu1 %v2869_v47  ;;  %v1166_v47 = vld [vmem:[#allocation6 + $0xd10] sm:$0xff] }
 0x1e3   : > { %3318 = vmatpush1.bf16.msra.mxu0 %v3317_v48  ;;  %2872 = vmatprep.subr.bf16.mxu1 %v2871_v49  ;;  %v2229_v48 = vld [vmem:[#allocation6 + $0x1b00] sm:$0xff]  ;;  %v3339_v49 = vpack.c.bf16 %v2232_v42, %v2230_v41  ;;  %v2893_v55 = vpack.c.bf16 %v1166_v47, %v1164_v46  ;;  %v2911_v41 = vpack.c.bf16 %v1187_v36, %v1185_v35  ;;  %v2251_v46 = vld [vmem:[#allocation6 + $0x1bb0] sm:$0xff]  ;;  %v1189_v47 = vld [vmem:[#allocation6 + $0xdc8] sm:$0xff] }
 0x1e4   : > { %3320 = vmatprep.subr.bf16.mxu0 %v3319_v53  ;;  %v2234_v53 = vld [vmem:[#allocation6 + $0x1b28] sm:$0xff]  ;;  %v3341_v56 = vpack.c.bf16 %v2231_v50, %v2229_v48  ;;  %v1184_v42 = vld [vmem:[#allocation6 + $0xda0] sm:$0xff]  ;;  %v1191_v48 = vld [vmem:[#allocation6 + $0xdd8] sm:$0xff] }
 0x1e5   : > { %v2256_v50 = vld [vmem:[#allocation6 + $0x1bd8] sm:$0xff] }
 0x1e6   : > { %2874 = vmatpush1.bf16.msra.mxu1 %v2873_v59  ;;  %v1170_v59 = vld [vmem:[#allocation6 + $0xd30] sm:$0xff] }
 0x1e7   : > { %3322 = vmatpush1.bf16.msra.mxu0 %v3321_v60  ;;  %2876 = vmatprep.subr.bf16.mxu1 %v2875_v61  ;;  %v2233_v60 = vld [vmem:[#allocation6 + $0x1b20] sm:$0xff]  ;;  %v3343_v61 = vpack.c.bf16 %v2236_v54, %v2234_v53  ;;  %v2897_v3 = vpack.c.bf16 %v1170_v59, %v1168_v58  ;;  %v2915_v53 = vpack.c.bf16 %v1191_v48, %v1189_v47  ;;  %v2255_v58 = vld [vmem:[#allocation6 + $0x1bd0] sm:$0xff]  ;;  %v1193_v59 = vld [vmem:[#allocation6 + $0xde8] sm:$0xff] }
 0x1e8   : > { %3324 = vmatprep.subr.bf16.mxu0 %v3323_v1  ;;  %v2238_v1 = vld [vmem:[#allocation6 + $0x1b48] sm:$0xff]  ;;  %v3345_v4 = vpack.c.bf16 %v2235_v62, %v2233_v60  ;;  %v1188_v54 = vld [vmem:[#allocation6 + $0xdc0] sm:$0xff]  ;;  %v1195_v60 = vld [vmem:[#allocation6 + $0xdf8] sm:$0xff] }
 0x1e9   : > { %v2260_v62 = vld [vmem:[#allocation6 + $0x1bf8] sm:$0xff] }
 0x1ea   : > { %2878 = vmatpush1.bf16.msra.mxu1 %v2877_v7  ;;  %v1174_v7 = vld [vmem:[#allocation6 + $0xd50] sm:$0xff] }
 0x1eb   : > { %3326 = vmatpush1.bf16.msra.mxu0 %v3325_v8  ;;  %2880 = vmatprep.subr.bf16.mxu1 %v2879_v9  ;;  %v2237_v8 = vld [vmem:[#allocation6 + $0x1b40] sm:$0xff]  ;;  %v3347_v9 = vpack.c.bf16 %v2240_v2, %v2238_v1  ;;  %v2901_v15 = vpack.c.bf16 %v1174_v7, %v1172_v6  ;;  %v1194_v1 = vld [vmem:[#allocation6 + $0xdf0] sm:$0xff] }
 0x1ec   : > { %3328 = vmatprep.subr.bf16.mxu0 %v3327_v13  ;;  %v2242_v13 = vld [vmem:[#allocation6 + $0x1b68] sm:$0xff]  ;;  %v3349_v16 = vpack.c.bf16 %v2239_v10, %v2237_v8  ;;  %v1129_v6 = vld [vmem:[#allocation2 + $0x20] sm:$0x7]  ;;  %v2259_v8 = vld [vmem:[#allocation6 + $0x1bf0] sm:$0xff]  ;;  %v2921_v11 = vpack.c.bf16 %v1194_v1, %v1192_v0 }
 0x1ed   : > { %v2194_v10 = vld [vmem:[#allocation2 + $0x50] sm:$0x7] }
 0x1ee   : > { %2882 = vmatpush1.bf16.msra.mxu1 %v2881_v19  ;;  %v1178_v19 = vld [vmem:[#allocation6 + $0xd70] sm:$0xff] }
 0x1ef   : > { %3330 = vmatpush1.bf16.msra.mxu0 %v3329_v20  ;;  %2884 = vmatprep.subr.bf16.mxu1 %v2883_v21  ;;  %v2241_v20 = vld [vmem:[#allocation6 + $0x1b60] sm:$0xff]  ;;  %v3351_v21 = vpack.c.bf16 %v2244_v14, %v2242_v13  ;;  %v2905_v27 = vpack.c.bf16 %v1178_v19, %v1176_v18  ;;  %v1202_v13 = vrot.slane %v1129_v6, 3 }
 0x1f0   : > { %3332 = vmatprep.subr.bf16.mxu0 %v3331_v25  ;;  %v2246_v25 = vld [vmem:[#allocation6 + $0x1b88] sm:$0xff]  ;;  %v3353_v28 = vpack.c.bf16 %v2243_v22, %v2241_v20 }
 0x1f2   : > { %2886 = vmatpush1.bf16.msra.mxu1 %v2885_v31  ;;  %v1182_v31 = vld [vmem:[#allocation6 + $0xd90] sm:$0xff] }
 0x1f3   : > { %3334 = vmatpush1.bf16.msra.mxu0 %v3333_v32  ;;  %2888 = vmatprep.subr.bf16.mxu1 %v2887_v33  ;;  %v2245_v32 = vld [vmem:[#allocation6 + $0x1b80] sm:$0xff]  ;;  %v3355_v33 = vpack.c.bf16 %v2248_v26, %v2246_v25  ;;  %v2909_v39 = vpack.c.bf16 %v1182_v31, %v1180_v30 }
 0x1f4   : > { %3336 = vmatprep.subr.bf16.mxu0 %v3335_v37  ;;  %v2250_v37 = vld [vmem:[#allocation6 + $0x1ba8] sm:$0xff]  ;;  %v3357_v40 = vpack.c.bf16 %v2247_v34, %v2245_v32 }
 0x1f6   : > { %2890 = vmatpush1.bf16.msra.mxu1 %v2889_v43  ;;  %v1186_v43 = vld [vmem:[#allocation6 + $0xdb0] sm:$0xff] }
 0x1f7   : > { %3338 = vmatpush1.bf16.msra.mxu0 %v3337_v44  ;;  %2892 = vmatprep.subr.bf16.mxu1 %v2891_v45  ;;  %v2249_v44 = vld [vmem:[#allocation6 + $0x1ba0] sm:$0xff]  ;;  %v3359_v45 = vpack.c.bf16 %v2252_v38, %v2250_v37  ;;  %v2913_v51 = vpack.c.bf16 %v1186_v43, %v1184_v42 }
 0x1f8   : > { %3340 = vmatprep.subr.bf16.mxu0 %v3339_v49  ;;  %v2254_v49 = vld [vmem:[#allocation6 + $0x1bc8] sm:$0xff]  ;;  %v3361_v52 = vpack.c.bf16 %v2251_v46, %v2249_v44 }
 0x1fa   : > { %2894 = vmatpush1.bf16.msra.mxu1 %v2893_v55  ;;  %v1190_v55 = vld [vmem:[#allocation6 + $0xdd0] sm:$0xff] }
 0x1fb   : > { %3342 = vmatpush1.bf16.msra.mxu0 %v3341_v56  ;;  %2896 = vmatprep.subr.bf16.mxu1 %v2895_v57  ;;  %v2253_v56 = vld [vmem:[#allocation6 + $0x1bc0] sm:$0xff]  ;;  %v3363_v57 = vpack.c.bf16 %v2256_v50, %v2254_v49  ;;  %v2917_v63 = vpack.c.bf16 %v1190_v55, %v1188_v54 }
 0x1fc   : > { %3344 = vmatprep.subr.bf16.mxu0 %v3343_v61  ;;  %v2258_v61 = vld [vmem:[#allocation6 + $0x1be8] sm:$0xff]  ;;  %v3365_v2 = vpack.c.bf16 %v2255_v58, %v2253_v56 }
 0x1fd   : > { %v3367_v7 = vpack.c.bf16 %v2260_v62, %v2258_v61 }
 0x1fe   : > { %2898 = vmatpush1.bf16.msra.mxu1 %v2897_v3  ;;  %v2919_v3 = vpack.c.bf16 %v1195_v60, %v1193_v59 }
 0x1ff   : > { %3346 = vmatpush1.bf16.msra.mxu0 %v3345_v4  ;;  %2900 = vmatprep.subr.bf16.mxu1 %v2899_v5  ;;  %v2257_v4 = vld [vmem:[#allocation6 + $0x1be0] sm:$0xff]  ;;  %v1127_v5 = vld [vmem:[#allocation2 + $0x10] sm:$0xf8] }
 0x200   : > { %3348 = vmatprep.subr.bf16.mxu0 %v3347_v9  ;;  %v2192_v9 = vld [vmem:[#allocation2 + $0x40] sm:$0xf8]  ;;  %v1201_v12 = vrot.slane %v1127_v5, 3  ;;  %v3369_v14 = vpack.c.bf16 %v2259_v8, %v2257_v4 }
 0x202   : > { %2902 = vmatpush1.bf16.msra.mxu1 %v2901_v15  ;;  %v2265_v15 = vrot.slane %v2192_v9, 3 }
 0x203   : > { %3350 = vmatpush1.bf16.msra.mxu0 %v3349_v16  ;;  %2904 = vmatprep.subr.bf16.mxu1 %v2903_v17  ;;  %v2266_v16 = vrot.slane %v2194_v10, 3  ;;  %v1203_v17 = vsel %vm1200_vm5, %v1201_v12, %v1202_v13 }
 0x204   : > { %3352 = vmatprep.subr.bf16.mxu0 %v3351_v21 }
 0x205   : > { %v2267_v18 = vsel %vm1200_vm5, %v2265_v15, %v2266_v16 }
 0x206   : > { %2906 = vmatpush1.bf16.msra.mxu1 %v2905_v27 }
 0x207   : > { %3354 = vmatpush1.bf16.msra.mxu0 %v3353_v28  ;;  %2908 = vmatprep.subr.bf16.mxu1 %v2907_v29 }
 0x208   : > { %3356 = vmatprep.subr.bf16.mxu0 %v3355_v33 }
 0x20a   : > { %2910 = vmatpush1.bf16.msra.mxu1 %v2909_v39 }
 0x20b   : > { %3358 = vmatpush1.bf16.msra.mxu0 %v3357_v40  ;;  %2912 = vmatprep.subr.bf16.mxu1 %v2911_v41 }
 0x20c   : > { %3360 = vmatprep.subr.bf16.mxu0 %v3359_v45 }
 0x20e   : > { %2914 = vmatpush1.bf16.msra.mxu1 %v2913_v51 }
 0x20f   : > { %3362 = vmatpush1.bf16.msra.mxu0 %v3361_v52  ;;  %2916 = vmatprep.subr.bf16.mxu1 %v2915_v53 }
 0x210   : > { %3364 = vmatprep.subr.bf16.mxu0 %v3363_v57 }
 0x212   : > { %2918 = vmatpush1.bf16.msra.mxu1 %v2917_v63 }
 0x213   : > { %3366 = vmatpush1.bf16.msra.mxu0 %v3365_v2  ;;  %2920 = vmatprep.subr.bf16.mxu1 %v2919_v3 }
 0x214   : > { %3368 = vmatprep.subr.bf16.mxu0 %v3367_v7 }
 0x216   : > { %2922 = vmatpush1.bf16.msra.mxu1 %v2921_v11 }
 0x217   : > { %3370 = vmatpush1.bf16.msra.mxu0 %v3369_v14 }
 0x219   : > { %1274 = vmatmul.mubr.f32.vlgmr.msra.gmra.mrb[0].mxu1 %v1203_v17 }
 0x21a   : > { %2338 = vmatmul.mubr.f32.vlgmr.msra.gmra.mrb[0].mxu0 %v2267_v18 }
 0x2ec   : > { %v1275_v19 = vpop.f32.mrb[0].mxu1 }
 0x2ed   : > { %v2339_v20 = vpop.f32.mrb[0].mxu0  ;;  %v1277_v21 = vpop.f32.mrb[1].mxu1 }
 0x2ee   : > { %v3371_v22 = vadd.f32 %v2339_v20, %v1275_v19  ;;  %v2341_v23 = vpop.f32.mrb[1].mxu0 }
 0x2ef   : > { %v3372_v24 = vadd.f32 %v2341_v23, %v1277_v21 }
 0x2f0   : > { %v2466_v25 = vmul.f32 -1.442695, %v3371_v22 }
 0x2f1   : > { %v2467_v26 = vmul.f32 -1.442695, %v3372_v24 }
 0x2f2   : > { %3457 = vpow2.f32 %v2466_v25 }
 0x2f3   : > { %3459 = vpow2.f32 %v2467_v26 }
 0x2fc   : > { %v3458_v27 = vpop.eup %3457 }
 0x2fd   : > { %v3460_v28 = vpop.eup %3459  ;;  %v2352_v29 = vadd.f32 1.0, %v3458_v27 }
 0x2fe   : > { %v2353_v30 = vadd.f32 1.0, %v3460_v28 }
 0x2ff   : > { %3461 = vrcp.f32 %v2352_v29 }
 0x300   : > { %3463 = vrcp.f32 %v2353_v30 }
 0x309   : > { %v3462_v31 = vpop.eup %3461 }
 0x30a   : > { %v3464_v32 = vpop.eup %3463  ;;  %2358 = vst [vmem:[%s176_s4] sm:$0xff] %v3462_v31 }
 0x30b   : > { %2359 = vst [vmem:[%s176_s4 + $0x8] sm:$0xff] %v3464_v32 }
 0x30c   : > { %3536 = shalt.err (!%p3533_p7)
}
 0x30d   : > { %s3537_s18 = scalar_lea.hbm %s3812_s23, 256  ;;  %s3541_s26 = scalar_lea.hbm %s3858_s2, 512 }
 0x30e   : > { %p3538_p9 = scmp.ne.s32.totalorder %s3812_s23, %s3537_s18  ;;  %p3542_p5 = scmp.lt.u32.totalorder %s3812_s23, %s3858_s2 }
 0x30f   : > { %p3543_p11 = scmp.lt.u32.totalorder %s3541_s26, %s3537_s18  ;;  %p3545_p4 = scmp.lt.u32.totalorder %s3537_s18, %s3812_s23 }
 0x310   : > { %p3539_p1 = pnand %p3538_p9, %p3710_p12 }
 0x311   : > { %p3544_p2 = por %p3543_p11, %p3542_p5 }
 0x312   : > { %p3540_p0 = pneg %p3539_p1 }
 0x313   : > { %p3546_p6 = por %p3545_p4, %p3544_p2 }
 0x315   : > { %p3547_p8 = pnand %p3546_p6, %p3540_p0 }
 0x317   : > { %3550 = shalt.err (!%p3547_p8)
}
 0x318   : > { %3403 = dma.vmem_to_hbm [thread:$0]  (%p3710_p12), %s3814_s5, 256, %s3812_s23, %s2361_s28  }
 0x319 PF: > { %s2387_s30 = sand.u32 1, %s3581_s9   ;;  %p3873_p10 = scmp.ne.s32.totalorder %s3863_s16, 0 }
 0x31a   : > { %p3874_p13 = scmp.ge.s32.totalorder %s3593_s12, 2  ;;  %s2388_s3 = scalar_lea.sflag [#allocation5], %s2387_s30 }
 0x31c   : > { %p3414_p3 = pnand %p3874_p13, %p3873_p10 }
 0x31e   : > { %3576 = dma.done.wait (!%p3414_p3), %s2388_s3, 256  }
 0x31f   : > { %3578 = vsyncadd (!%p3414_p3), %s2388_s3, 4294967040  ;;  %p16_p7 = scmp.ge.s32.totalorder %s3672_s21, 4   ;;  %s3875_s9 = smov %s3585_s10 }
 0x320   : > { %s3876_s10 = smov %s3589_s11  ;;  %s3877_s11 = smov %s3706_s8 }
 0x321   : > { %s3878_s12 = smov %s3672_s21  ;;  %18 = sbr.rel (!%p16_p7) target bundleno = 6 (0x6), region = 91 }
 0x328   :  { %2393 = vsyncpa [#allocation4], 1 }
 0x329   :  { %2395 = vsyncpa [#allocation4 + $0x1], 1 }
 0x32a   :  { %2396 = vsyncpa [#allocation7], 1 }
 0x32b   :  { %2397 = vsyncpa [#allocation5], 1 }
 0x32c   :  { %2399 = vsyncpa [#allocation5 + $0x1], 1 }

</bundles_post_ra>
